<compile_context>
chip_gen: v7x
topology: tpu7x:2x2x1
jax: 0.10.0
libtpu: 0.0.40
codegen_flags: <defaults>
</compile_context>

<pallas_src>
import functools

import jax
import jax.numpy as jnp
from jax import lax
from jax.experimental import pallas as pl
from jax.experimental.pallas import tpu as pltpu


# ----------------------------------------------------------------------------
# Pallas kernel
# ----------------------------------------------------------------------------
def _bottleneck_kernel(x_ref, w1_ref, b1_ref, w2_ref, b2_ref, w3_ref, b3_ref,
                       o_ref, pad_ref, col_ref, *, dilation):
    # x_ref   : (BN, H, W, Cin)            float32
    # w1_ref  : (Cin, Cmid)                bfloat16   (BN-folded)
    # b1_ref  : (1, Cmid)                  float32
    # w2_ref  : (9*Cmid, Cmid)             bfloat16   (BN-folded, im2col order)
    # b2_ref  : (1, Cmid)                  float32
    # w3_ref  : (Cmid, Cin)                bfloat16   (BN-folded)
    # b3_ref  : (1, Cin)                   float32
    # pad_ref : (BN, H+2d, W+2d, Cmid)     bfloat16   VMEM scratch
    # col_ref : (BN*H*W, 9*Cmid)           bfloat16   VMEM scratch (im2col)
    BN, H, W, Cin = x_ref.shape
    Cmid = w1_ref.shape[1]
    d = dilation
    HW = H * W

    x = x_ref[...]                                    # f32, residual path
    x_bf = x.astype(jnp.bfloat16)                     # MXU operand

    # --- conv1: 1x1 conv (+ folded BN) + ReLU  ->  (BN*HW, Cmid)
    t1 = jnp.dot(x_bf.reshape(BN * HW, Cin), w1_ref[...],
                 preferred_element_type=jnp.float32) + b1_ref[...]
    t1 = jnp.maximum(t1, 0.0).astype(jnp.bfloat16)

    # --- conv2: 3x3 dilated conv (padding == dilation, same spatial size)
    # Re-zero only the halo strips of the padded scratch (interior is fully
    # overwritten below, so the whole padded image is valid every step even
    # though the scratch persists across grid iterations / cores).
    zrow = jnp.zeros((BN, d, W + 2 * d, Cmid), jnp.bfloat16)
    zcol = jnp.zeros((BN, H, d, Cmid), jnp.bfloat16)
    pad_ref[:, 0:d, :, :] = zrow                      # top halo rows
    pad_ref[:, d + H:d + H + d, :, :] = zrow          # bottom halo rows
    pad_ref[:, d:d + H, 0:d, :] = zcol                # left halo cols
    pad_ref[:, d:d + H, d + W:d + W + d, :] = zcol    # right halo cols
    pad_ref[:, d:d + H, d:d + W, :] = t1.reshape(BN, H, W, Cmid)

    # im2col: pack the 9 shifted windows into (BN*HW, 9*Cmid), then ONE long-K
    # MXU matmul against w2 reshaped to (9*Cmid, Cmid) in the wrapper.
    # H-shifts are leading-dim address offsets (free); W-shifts are sublane
    # offsets (aligned whenever kx*d is a multiple of 8, e.g. at kx==0).
    idx = 0
    for ky in range(3):
        for kx in range(3):
            win = pad_ref[:, ky * d:ky * d + H, kx * d:kx * d + W, :]
            col_ref[:, idx * Cmid:(idx + 1) * Cmid] = win.reshape(BN * HW, Cmid)
            idx += 1

    t2 = jnp.dot(col_ref[...], w2_ref[...],
                 preferred_element_type=jnp.float32) + b2_ref[...]
    t2 = jnp.maximum(t2, 0.0).astype(jnp.bfloat16)    # (BN*HW, Cmid)

    # --- conv3: 1x1 conv (+ folded BN) + ReLU
    t3 = jnp.dot(t2, w3_ref[...],
                 preferred_element_type=jnp.float32) + b3_ref[...]
    t3 = jnp.maximum(t3, 0.0)                         # (BN*HW, Cin), f32

    # --- residual add (f32) and store
    o_ref[...] = (t3.reshape(BN, H, W, Cin) + x).astype(o_ref.dtype)


# ----------------------------------------------------------------------------
# Wrappers
# ----------------------------------------------------------------------------
def bottleneck_pallas_nhwc(x_nhwc, params, dilation, *, block_n=1):
    """x_nhwc: (N, H, W, Cin) float32.  Returns (N, H, W, Cin).

    Native channels-last entry point (no layout transposes). `block_n` images
    are processed per grid step to amortize per-step overhead.
    """
    (w1, b1), (w2f, b2), (w3, b3) = params
    N, H, W, Cin = x_nhwc.shape
    Cmid = w1.shape[1]
    d = dilation
    assert N % block_n == 0, "block_n must divide the batch size"

    kernel = functools.partial(_bottleneck_kernel, dilation=d)

    def full(arr):
        nd = arr.ndim
        return pl.BlockSpec(arr.shape, lambda n, _nd=nd: (0,) * _nd)

    return pl.pallas_call(
        kernel,
        out_shape=jax.ShapeDtypeStruct((N, H, W, Cin), x_nhwc.dtype),
        grid_spec=pltpu.PrefetchScalarGridSpec(
            num_scalar_prefetch=0,
            grid=(N // block_n,),
            in_specs=[
                pl.BlockSpec((block_n, H, W, Cin), lambda n: (n, 0, 0, 0)),
                full(w1), full(b1), full(w2f), full(b2), full(w3), full(b3),
            ],
            out_specs=pl.BlockSpec((block_n, H, W, Cin),
                                   lambda n: (n, 0, 0, 0)),
            scratch_shapes=[
                pltpu.VMEM((block_n, H + 2 * d, W + 2 * d, Cmid),
                           jnp.bfloat16),                       # padded t1
                pltpu.VMEM((block_n * H * W, 9 * Cmid),
                           jnp.bfloat16),                       # im2col
            ],
        ),
        compiler_params=pltpu.CompilerParams(
            dimension_semantics=("parallel",),
            vmem_limit_bytes=64 * 1024 * 1024),
    )(x_nhwc, w1, b1, w2f, b2, w3, b3)


def bottleneck_pallas(x_nchw, params, dilation, *, block_n=1):
    """PyTorch-compatible NCHW entry point.

    In an NHWC end-to-end model call `bottleneck_pallas_nhwc` directly and
    these two full-tensor transposes (extra HBM round trips) disappear.
    """
    x_nhwc = jnp.transpose(x_nchw, (0, 2, 3, 1))              # NCHW -> NHWC
    out = bottleneck_pallas_nhwc(x_nhwc, params, dilation, block_n=block_n)
    return jnp.transpose(out, (0, 3, 1, 2))                   # NHWC -> NCHW


# ----------------------------------------------------------------------------
# Parameter construction (deterministic) + BN folding
# ----------------------------------------------------------------------------
def make_params(key, in_channels, mid_channels):
    """Raw (conv weight HWIO, conv bias, gamma, beta, mean, var) per stage."""
    ks = jax.random.split(key, 18)

    def conv_w(k, kh, kw, cin, cout):
        return 0.1 * jax.random.normal(k, (kh, kw, cin, cout), jnp.float32)

    def vec(k, c, scale=0.1, offset=0.0):
        return offset + scale * jax.random.normal(k, (c,), jnp.float32)

    stages = []
    chans = [(in_channels, mid_channels, 1),
             (mid_channels, mid_channels, 3),
             (mid_channels, in_channels, 1)]
    for s, (cin, cout, ksz) in enumerate(chans):
        base = 6 * s
        w = conv_w(ks[base + 0], ksz, ksz, cin, cout)
        b = vec(ks[base + 1], cout)
        gamma = 1.0 + 0.1 * jax.random.normal(ks[base + 2], (cout,), jnp.float32)
        beta = vec(ks[base + 3], cout)
        mean = vec(ks[base + 4], cout)
        var = 0.5 + jnp.abs(jax.random.normal(ks[base + 5], (cout,), jnp.float32))
        stages.append((w, b, gamma, beta, mean, var))
    return stages


def fold_bn(stages, eps=1e-3):
    """Fold eval-mode BatchNorm into conv weight/bias; cast MXU weights to bf16.

    1x1 convs -> (Cin, Cout); the 3x3 conv -> (9*Cin, Cout) in (ky, kx, cin)
    row order, matching the kernel's im2col column packing.  Biases stay f32.
    """
    folded = []
    for (w, b, gamma, beta, mean, var) in stages:
        scale = gamma / jnp.sqrt(var + eps)                   # (Cout,)
        w_f = w * scale                                       # HWIO, scale Cout
        b_f = (b - mean) * scale + beta                       # (Cout,)
        kh, kw, cin, cout = w.shape
        if kh == 1 and kw == 1:
            w_f = w_f.reshape(cin, cout)
        else:
            w_f = w_f.reshape(kh * kw * cin, cout)            # (9*Cin, Cout)
        folded.append((w_f.astype(jnp.bfloat16),
                       b_f.reshape(1, cout).astype(jnp.float32)))
    return folded


# ----------------------------------------------------------------------------
# Pure-JAX reference (UNfolded f32 params -> also checks BN folding)
# ----------------------------------------------------------------------------
def bottleneck_ref(x_nchw, stages, dilation, eps=1e-3):
    x = jnp.transpose(x_nchw, (0, 2, 3, 1))                   # NHWC
    identity = x
    dn = ('NHWC', 'HWIO', 'NHWC')
    pads = ['VALID', [(dilation, dilation), (dilation, dilation)], 'VALID']
    dils = [(1, 1), (dilation, dilation), (1, 1)]
    out = x
    for (w, b, gamma, beta, mean, var), pad, dil in zip(stages, pads, dils):
        out = lax.conv_general_dilated(out, w, (1, 1), pad,
                                       rhs_dilation=dil, dimension_numbers=dn)
        out = out + b
        out = (out - mean) / jnp.sqrt(var + eps) * gamma + beta
        out = jnp.maximum(out, 0.0)
    out = out + identity
    return jnp.transpose(out, (0, 3, 1, 2))                   # back to NCHW


# ----------------------------------------------------------------------------
if __name__ == "__main__":
    in_channels, mid_channels, dilation = 4, 8, 2
    N, H, W = 2, 16, 16

    key = jax.random.PRNGKey(0)
    k_x, k_p = jax.random.split(key)
    x = jax.random.normal(k_x, (N, in_channels, H, W), jnp.float32)

    stages = make_params(k_p, in_channels, mid_channels)
    params = fold_bn(stages, eps=1e-3)

    ref = jax.block_until_ready(bottleneck_ref(x, stages, dilation, eps=1e-3))

    # Run both per-image (block_n=1) and batch-blocked (block_n=2) paths.
    # Tolerance is loosened vs. a pure-f32 kernel because MXU operands are bf16.
    for bn in (1, 2):
        out = jax.block_until_ready(
            bottleneck_pallas(x, params, dilation, block_n=bn))
        assert out.shape == (N, in_channels, H, W)
        max_err = float(jnp.max(jnp.abs(out - ref)))
        assert jnp.allclose(out, ref, rtol=2e-2, atol=2e-2), (bn, max_err)

    print("KERNEL_OK")
</pallas_src>

<mosaic_0001>
module attributes {stable_mosaic.version = 11 : i64} {
  func.func @_bottleneck_kernel(%arg0: i32, %arg1: memref<1x16x16x4xf32, #tpu.memory_space<vmem>>, %arg2: memref<4x8xbf16, #tpu.memory_space<vmem>>, %arg3: memref<1x8xf32, #tpu.memory_space<vmem>>, %arg4: memref<72x8xbf16, #tpu.memory_space<vmem>>, %arg5: memref<1x8xf32, #tpu.memory_space<vmem>>, %arg6: memref<8x4xbf16, #tpu.memory_space<vmem>>, %arg7: memref<1x4xf32, #tpu.memory_space<vmem>>, %arg8: memref<1x16x16x4xf32, #tpu.memory_space<vmem>>, %arg9: memref<1x20x20x8xbf16, #tpu.memory_space<vmem>>, %arg10: memref<256x72xbf16, #tpu.memory_space<vmem>>) attributes {dimension_semantics = [#tpu.dimension_semantics<parallel>], iteration_bounds = array<i64: 2>, scalar_prefetch = 0 : i64, scratch_operands = 2 : i64, tpu.core_type = #tpu.core_type<tc>, window_params = [{transform_indices = @transform_0, window_bounds = array<i64: 1, 16, 16, 4>}, {pipeline_mode = #tpu.pipeline_mode<synchronous>, transform_indices = @transform_1, window_bounds = array<i64: 4, 8>}, {pipeline_mode = #tpu.pipeline_mode<synchronous>, transform_indices = @transform_2, window_bounds = array<i64: 1, 8>}, {pipeline_mode = #tpu.pipeline_mode<synchronous>, transform_indices = @transform_3, window_bounds = array<i64: 72, 8>}, {pipeline_mode = #tpu.pipeline_mode<synchronous>, transform_indices = @transform_4, window_bounds = array<i64: 1, 8>}, {pipeline_mode = #tpu.pipeline_mode<synchronous>, transform_indices = @transform_5, window_bounds = array<i64: 8, 4>}, {pipeline_mode = #tpu.pipeline_mode<synchronous>, transform_indices = @transform_6, window_bounds = array<i64: 1, 4>}, {transform_indices = @transform_7, window_bounds = array<i64: 1, 16, 16, 4>}]} {
    %c0 = arith.constant 0 : index
    %c0_0 = arith.constant 0 : index
    %c0_1 = arith.constant 0 : index
    %c0_2 = arith.constant 0 : index
    %0 = vector.load %arg1[%c0, %c0_0, %c0_1, %c0_2] : memref<1x16x16x4xf32, #tpu.memory_space<vmem>>, vector<1x16x16x4xf32>
    %1 = arith.truncf %0 : vector<1x16x16x4xf32> to vector<1x16x16x4xbf16>
    %2 = vector.shape_cast %1 : vector<1x16x16x4xbf16> to vector<256x4xbf16>
    %c0_3 = arith.constant 0 : index
    %c0_4 = arith.constant 0 : index
    %3 = vector.load %arg2[%c0_3, %c0_4] : memref<4x8xbf16, #tpu.memory_space<vmem>>, vector<4x8xbf16>
    %cst = arith.constant dense<0.000000e+00> : vector<256x8xf32>
    %4 = tpu.matmul %2, %3, %cst {dimension_numbers = #tpu.dot_dimension_numbers<[1], [0], [0], [1], [0, 0, 1, 1], [], []>} : vector<256x4xbf16>, vector<4x8xbf16>, vector<256x8xf32> -> vector<256x8xf32>
    %c0_5 = arith.constant 0 : index
    %c0_6 = arith.constant 0 : index
    %5 = vector.load %arg3[%c0_5, %c0_6] : memref<1x8xf32, #tpu.memory_space<vmem>>, vector<1x8xf32>
    %6 = vector.broadcast %5 : vector<1x8xf32> to vector<256x8xf32>
    %7 = arith.addf %4, %6 : vector<256x8xf32>
    %cst_7 = arith.constant 0.000000e+00 : f32
    %8 = vector.broadcast %cst_7 : f32 to vector<256x8xf32>
    %9 = arith.maximumf %7, %8 : vector<256x8xf32>
    %10 = arith.truncf %9 : vector<256x8xf32> to vector<256x8xbf16>
    %cst_8 = arith.constant 0.000000e+00 : bf16
    %11 = vector.broadcast %cst_8 : bf16 to vector<1x2x20x8xbf16>
    %cst_9 = arith.constant 0.000000e+00 : bf16
    %12 = vector.broadcast %cst_9 : bf16 to vector<1x16x2x8xbf16>
    %c0_10 = arith.constant 0 : index
    %c0_11 = arith.constant 0 : index
    %c0_12 = arith.constant 0 : index
    %c0_13 = arith.constant 0 : index
    %13 = vector.load %arg9[%c0_10, %c0_11, %c0_12, %c0_13] : memref<1x20x20x8xbf16, #tpu.memory_space<vmem>>, vector<1x2x20x8xbf16>
    tpu.vector_store %arg9[%c0_10, %c0_11, %c0_12, %c0_13], %11 {strides = array<i32>} : memref<1x20x20x8xbf16, #tpu.memory_space<vmem>>, vector<1x2x20x8xbf16>,
    %c0_14 = arith.constant 0 : index
    %c18 = arith.constant 18 : index
    %c0_15 = arith.constant 0 : index
    %c0_16 = arith.constant 0 : index
    %14 = vector.load %arg9[%c0_14, %c18, %c0_15, %c0_16] : memref<1x20x20x8xbf16, #tpu.memory_space<vmem>>, vector<1x2x20x8xbf16>
    tpu.vector_store %arg9[%c0_14, %c18, %c0_15, %c0_16], %11 {strides = array<i32>} : memref<1x20x20x8xbf16, #tpu.memory_space<vmem>>, vector<1x2x20x8xbf16>,
    %c0_17 = arith.constant 0 : index
    %c2 = arith.constant 2 : index
    %c0_18 = arith.constant 0 : index
    %c0_19 = arith.constant 0 : index
    %15 = vector.load %arg9[%c0_17, %c2, %c0_18, %c0_19] : memref<1x20x20x8xbf16, #tpu.memory_space<vmem>>, vector<1x16x2x8xbf16>
    tpu.vector_store %arg9[%c0_17, %c2, %c0_18, %c0_19], %12 {strides = array<i32>} : memref<1x20x20x8xbf16, #tpu.memory_space<vmem>>, vector<1x16x2x8xbf16>,
    %c0_20 = arith.constant 0 : index
    %c2_21 = arith.constant 2 : index
    %c18_22 = arith.constant 18 : index
    %c0_23 = arith.constant 0 : index
    %16 = vector.load %arg9[%c0_20, %c2_21, %c18_22, %c0_23] : memref<1x20x20x8xbf16, #tpu.memory_space<vmem>>, vector<1x16x2x8xbf16>
    tpu.vector_store %arg9[%c0_20, %c2_21, %c18_22, %c0_23], %12 {strides = array<i32>} : memref<1x20x20x8xbf16, #tpu.memory_space<vmem>>, vector<1x16x2x8xbf16>,
    %17 = vector.shape_cast %10 : vector<256x8xbf16> to vector<1x16x16x8xbf16>
    %c0_24 = arith.constant 0 : index
    %c2_25 = arith.constant 2 : index
    %c2_26 = arith.constant 2 : index
    %c0_27 = arith.constant 0 : index
    %18 = vector.load %arg9[%c0_24, %c2_25, %c2_26, %c0_27] : memref<1x20x20x8xbf16, #tpu.memory_space<vmem>>, vector<1x16x16x8xbf16>
    tpu.vector_store %arg9[%c0_24, %c2_25, %c2_26, %c0_27], %17 {strides = array<i32>} : memref<1x20x20x8xbf16, #tpu.memory_space<vmem>>, vector<1x16x16x8xbf16>,
    %c0_28 = arith.constant 0 : index
    %c0_29 = arith.constant 0 : index
    %c0_30 = arith.constant 0 : index
    %c0_31 = arith.constant 0 : index
    %19 = vector.load %arg9[%c0_28, %c0_29, %c0_30, %c0_31] : memref<1x20x20x8xbf16, #tpu.memory_space<vmem>>, vector<1x16x16x8xbf16>
    %20 = vector.shape_cast %19 : vector<1x16x16x8xbf16> to vector<256x8xbf16>
    %c0_32 = arith.constant 0 : index
    %c0_33 = arith.constant 0 : index
    %21 = vector.load %arg10[%c0_32, %c0_33] : memref<256x72xbf16, #tpu.memory_space<vmem>>, vector<256x8xbf16>
    tpu.vector_store %arg10[%c0_32, %c0_33], %20 {strides = array<i32>} : memref<256x72xbf16, #tpu.memory_space<vmem>>, vector<256x8xbf16>,
    %c0_34 = arith.constant 0 : index
    %c0_35 = arith.constant 0 : index
    %c2_36 = arith.constant 2 : index
    %c0_37 = arith.constant 0 : index
    %22 = vector.load %arg9[%c0_34, %c0_35, %c2_36, %c0_37] : memref<1x20x20x8xbf16, #tpu.memory_space<vmem>>, vector<1x16x16x8xbf16>
    %23 = vector.shape_cast %22 : vector<1x16x16x8xbf16> to vector<256x8xbf16>
    %c0_38 = arith.constant 0 : index
    %c8 = arith.constant 8 : index
    %24 = vector.load %arg10[%c0_38, %c8] : memref<256x72xbf16, #tpu.memory_space<vmem>>, vector<256x8xbf16>
    tpu.vector_store %arg10[%c0_38, %c8], %23 {strides = array<i32>} : memref<256x72xbf16, #tpu.memory_space<vmem>>, vector<256x8xbf16>,
    %c0_39 = arith.constant 0 : index
    %c0_40 = arith.constant 0 : index
    %c4 = arith.constant 4 : index
    %c0_41 = arith.constant 0 : index
    %25 = vector.load %arg9[%c0_39, %c0_40, %c4, %c0_41] : memref<1x20x20x8xbf16, #tpu.memory_space<vmem>>, vector<1x16x16x8xbf16>
    %26 = vector.shape_cast %25 : vector<1x16x16x8xbf16> to vector<256x8xbf16>
    %c0_42 = arith.constant 0 : index
    %c16 = arith.constant 16 : index
    %27 = vector.load %arg10[%c0_42, %c16] : memref<256x72xbf16, #tpu.memory_space<vmem>>, vector<256x8xbf16>
    tpu.vector_store %arg10[%c0_42, %c16], %26 {strides = array<i32>} : memref<256x72xbf16, #tpu.memory_space<vmem>>, vector<256x8xbf16>,
    %c0_43 = arith.constant 0 : index
    %c2_44 = arith.constant 2 : index
    %c0_45 = arith.constant 0 : index
    %c0_46 = arith.constant 0 : index
    %28 = vector.load %arg9[%c0_43, %c2_44, %c0_45, %c0_46] : memref<1x20x20x8xbf16, #tpu.memory_space<vmem>>, vector<1x16x16x8xbf16>
    %29 = vector.shape_cast %28 : vector<1x16x16x8xbf16> to vector<256x8xbf16>
    %c0_47 = arith.constant 0 : index
    %c24 = arith.constant 24 : index
    %30 = vector.load %arg10[%c0_47, %c24] : memref<256x72xbf16, #tpu.memory_space<vmem>>, vector<256x8xbf16>
    tpu.vector_store %arg10[%c0_47, %c24], %29 {strides = array<i32>} : memref<256x72xbf16, #tpu.memory_space<vmem>>, vector<256x8xbf16>,
    %c0_48 = arith.constant 0 : index
    %c2_49 = arith.constant 2 : index
    %c2_50 = arith.constant 2 : index
    %c0_51 = arith.constant 0 : index
    %31 = vector.load %arg9[%c0_48, %c2_49, %c2_50, %c0_51] : memref<1x20x20x8xbf16, #tpu.memory_space<vmem>>, vector<1x16x16x8xbf16>
    %32 = vector.shape_cast %31 : vector<1x16x16x8xbf16> to vector<256x8xbf16>
    %c0_52 = arith.constant 0 : index
    %c32 = arith.constant 32 : index
    %33 = vector.load %arg10[%c0_52, %c32] : memref<256x72xbf16, #tpu.memory_space<vmem>>, vector<256x8xbf16>
    tpu.vector_store %arg10[%c0_52, %c32], %32 {strides = array<i32>} : memref<256x72xbf16, #tpu.memory_space<vmem>>, vector<256x8xbf16>,
    %c0_53 = arith.constant 0 : index
    %c2_54 = arith.constant 2 : index
    %c4_55 = arith.constant 4 : index
    %c0_56 = arith.constant 0 : index
    %34 = vector.load %arg9[%c0_53, %c2_54, %c4_55, %c0_56] : memref<1x20x20x8xbf16, #tpu.memory_space<vmem>>, vector<1x16x16x8xbf16>
    %35 = vector.shape_cast %34 : vector<1x16x16x8xbf16> to vector<256x8xbf16>
    %c0_57 = arith.constant 0 : index
    %c40 = arith.constant 40 : index
    %36 = vector.load %arg10[%c0_57, %c40] : memref<256x72xbf16, #tpu.memory_space<vmem>>, vector<256x8xbf16>
    tpu.vector_store %arg10[%c0_57, %c40], %35 {strides = array<i32>} : memref<256x72xbf16, #tpu.memory_space<vmem>>, vector<256x8xbf16>,
    %c0_58 = arith.constant 0 : index
    %c4_59 = arith.constant 4 : index
    %c0_60 = arith.constant 0 : index
    %c0_61 = arith.constant 0 : index
    %37 = vector.load %arg9[%c0_58, %c4_59, %c0_60, %c0_61] : memref<1x20x20x8xbf16, #tpu.memory_space<vmem>>, vector<1x16x16x8xbf16>
    %38 = vector.shape_cast %37 : vector<1x16x16x8xbf16> to vector<256x8xbf16>
    %c0_62 = arith.constant 0 : index
    %c48 = arith.constant 48 : index
    %39 = vector.load %arg10[%c0_62, %c48] : memref<256x72xbf16, #tpu.memory_space<vmem>>, vector<256x8xbf16>
    tpu.vector_store %arg10[%c0_62, %c48], %38 {strides = array<i32>} : memref<256x72xbf16, #tpu.memory_space<vmem>>, vector<256x8xbf16>,
    %c0_63 = arith.constant 0 : index
    %c4_64 = arith.constant 4 : index
    %c2_65 = arith.constant 2 : index
    %c0_66 = arith.constant 0 : index
    %40 = vector.load %arg9[%c0_63, %c4_64, %c2_65, %c0_66] : memref<1x20x20x8xbf16, #tpu.memory_space<vmem>>, vector<1x16x16x8xbf16>
    %41 = vector.shape_cast %40 : vector<1x16x16x8xbf16> to vector<256x8xbf16>
    %c0_67 = arith.constant 0 : index
    %c56 = arith.constant 56 : index
    %42 = vector.load %arg10[%c0_67, %c56] : memref<256x72xbf16, #tpu.memory_space<vmem>>, vector<256x8xbf16>
    tpu.vector_store %arg10[%c0_67, %c56], %41 {strides = array<i32>} : memref<256x72xbf16, #tpu.memory_space<vmem>>, vector<256x8xbf16>,
    %c0_68 = arith.constant 0 : index
    %c4_69 = arith.constant 4 : index
    %c4_70 = arith.constant 4 : index
    %c0_71 = arith.constant 0 : index
    %43 = vector.load %arg9[%c0_68, %c4_69, %c4_70, %c0_71] : memref<1x20x20x8xbf16, #tpu.memory_space<vmem>>, vector<1x16x16x8xbf16>
    %44 = vector.shape_cast %43 : vector<1x16x16x8xbf16> to vector<256x8xbf16>
    %c0_72 = arith.constant 0 : index
    %c64 = arith.constant 64 : index
    %45 = vector.load %arg10[%c0_72, %c64] : memref<256x72xbf16, #tpu.memory_space<vmem>>, vector<256x8xbf16>
    tpu.vector_store %arg10[%c0_72, %c64], %44 {strides = array<i32>} : memref<256x72xbf16, #tpu.memory_space<vmem>>, vector<256x8xbf16>,
    %c0_73 = arith.constant 0 : index
    %c0_74 = arith.constant 0 : index
    %46 = vector.load %arg10[%c0_73, %c0_74] : memref<256x72xbf16, #tpu.memory_space<vmem>>, vector<256x72xbf16>
    %c0_75 = arith.constant 0 : index
    %c0_76 = arith.constant 0 : index
    %47 = vector.load %arg4[%c0_75, %c0_76] : memref<72x8xbf16, #tpu.memory_space<vmem>>, vector<72x8xbf16>
    %cst_77 = arith.constant dense<0.000000e+00> : vector<256x8xf32>
    %48 = tpu.matmul %46, %47, %cst_77 {dimension_numbers = #tpu.dot_dimension_numbers<[1], [0], [0], [1], [0, 0, 1, 1], [], []>} : vector<256x72xbf16>, vector<72x8xbf16>, vector<256x8xf32> -> vector<256x8xf32>
    %c0_78 = arith.constant 0 : index
    %c0_79 = arith.constant 0 : index
    %49 = vector.load %arg5[%c0_78, %c0_79] : memref<1x8xf32, #tpu.memory_space<vmem>>, vector<1x8xf32>
    %50 = vector.broadcast %49 : vector<1x8xf32> to vector<256x8xf32>
    %51 = arith.addf %48, %50 : vector<256x8xf32>
    %cst_80 = arith.constant 0.000000e+00 : f32
    %52 = vector.broadcast %cst_80 : f32 to vector<256x8xf32>
    %53 = arith.maximumf %51, %52 : vector<256x8xf32>
    %54 = arith.truncf %53 : vector<256x8xf32> to vector<256x8xbf16>
    %c0_81 = arith.constant 0 : index
    %c0_82 = arith.constant 0 : index
    %55 = vector.load %arg6[%c0_81, %c0_82] : memref<8x4xbf16, #tpu.memory_space<vmem>>, vector<8x4xbf16>
    %cst_83 = arith.constant dense<0.000000e+00> : vector<256x4xf32>
    %56 = tpu.matmul %54, %55, %cst_83 {dimension_numbers = #tpu.dot_dimension_numbers<[1], [0], [0], [1], [0, 0, 1, 1], [], []>} : vector<256x8xbf16>, vector<8x4xbf16>, vector<256x4xf32> -> vector<256x4xf32>
    %c0_84 = arith.constant 0 : index
    %c0_85 = arith.constant 0 : index
    %57 = vector.load %arg7[%c0_84, %c0_85] : memref<1x4xf32, #tpu.memory_space<vmem>>, vector<1x4xf32>
    %58 = vector.broadcast %57 : vector<1x4xf32> to vector<256x4xf32>
    %59 = arith.addf %56, %58 : vector<256x4xf32>
    %cst_86 = arith.constant 0.000000e+00 : f32
    %60 = vector.broadcast %cst_86 : f32 to vector<256x4xf32>
    %61 = arith.maximumf %59, %60 : vector<256x4xf32>
    %62 = vector.shape_cast %61 : vector<256x4xf32> to vector<1x16x16x4xf32>
    %63 = arith.addf %62, %0 : vector<1x16x16x4xf32>
    %c0_87 = arith.constant 0 : index
    %c0_88 = arith.constant 0 : index
    %c0_89 = arith.constant 0 : index
    %c0_90 = arith.constant 0 : index
    %64 = vector.load %arg8[%c0_87, %c0_88, %c0_89, %c0_90] : memref<1x16x16x4xf32, #tpu.memory_space<vmem>>, vector<1x16x16x4xf32>
    tpu.vector_store %arg8[%c0_87, %c0_88, %c0_89, %c0_90], %63 {strides = array<i32>} : memref<1x16x16x4xf32, #tpu.memory_space<vmem>>, vector<1x16x16x4xf32>,
    return
  }
  func.func @transform_0(%arg0: i32) -> (i32, i32, i32, i32) {
    %c0_i32 = arith.constant 0 : i32
    %c0_i32_0 = arith.constant 0 : i32
    %c0_i32_1 = arith.constant 0 : i32
    %c0_i32_2 = arith.constant 0 : i32
    return %arg0, %c0_i32, %c0_i32_0, %c0_i32_1 : i32, i32, i32, i32
  }
  func.func @transform_1(%arg0: i32) -> (i32, i32) {
    %c0_i32 = arith.constant 0 : i32
    %c0_i32_0 = arith.constant 0 : i32
    %c0_i32_1 = arith.constant 0 : i32
    return %c0_i32, %c0_i32_0 : i32, i32
  }
  func.func @transform_2(%arg0: i32) -> (i32, i32) {
    %c0_i32 = arith.constant 0 : i32
    %c0_i32_0 = arith.constant 0 : i32
    %c0_i32_1 = arith.constant 0 : i32
    return %c0_i32, %c0_i32_0 : i32, i32
  }
  func.func @transform_3(%arg0: i32) -> (i32, i32) {
    %c0_i32 = arith.constant 0 : i32
    %c0_i32_0 = arith.constant 0 : i32
    %c0_i32_1 = arith.constant 0 : i32
    return %c0_i32, %c0_i32_0 : i32, i32
  }
  func.func @transform_4(%arg0: i32) -> (i32, i32) {
    %c0_i32 = arith.constant 0 : i32
    %c0_i32_0 = arith.constant 0 : i32
    %c0_i32_1 = arith.constant 0 : i32
    return %c0_i32, %c0_i32_0 : i32, i32
  }
  func.func @transform_5(%arg0: i32) -> (i32, i32) {
    %c0_i32 = arith.constant 0 : i32
    %c0_i32_0 = arith.constant 0 : i32
    %c0_i32_1 = arith.constant 0 : i32
    return %c0_i32, %c0_i32_0 : i32, i32
  }
  func.func @transform_6(%arg0: i32) -> (i32, i32) {
    %c0_i32 = arith.constant 0 : i32
    %c0_i32_0 = arith.constant 0 : i32
    %c0_i32_1 = arith.constant 0 : i32
    return %c0_i32, %c0_i32_0 : i32, i32
  }
  func.func @transform_7(%arg0: i32) -> (i32, i32, i32, i32) {
    %c0_i32 = arith.constant 0 : i32
    %c0_i32_0 = arith.constant 0 : i32
    %c0_i32_1 = arith.constant 0 : i32
    %c0_i32_2 = arith.constant 0 : i32
    return %arg0, %c0_i32, %c0_i32_0, %c0_i32_1 : i32, i32, i32, i32
  }
}

</mosaic_0001>

<bundles_post_ra>
// kernel: tpu_custom_call.1
= control target key start
LH: loop header
LB: loop body
LE: loop exit
PB: predicated region body
PF: predicated region fallthrough
CT: control target
= control target key end

     0   :  { %12 = vsyncpa [#allocation5], 0  ;;  %s7237_s0 = inlined_call_operand.hbm [shape: f32[2,16,16,4], index: 0, kind: input, shape index: {}]   ;;  %s7238_s1 = inlined_call_operand.hbm [shape: bf16[4,8], index: 1, kind: input, shape index: {}]   ;;  %s7239_s2 = inlined_call_operand.hbm [shape: f32[1,8], index: 2, kind: input, shape index: {}]   ;;  %s7240_s3 = inlined_call_operand.hbm [shape: bf16[72,8], index: 3, kind: input, shape index: {}]   ;;  %s7241_s4 = inlined_call_operand.hbm [shape: f32[1,8], index: 4, kind: input, shape index: {}]   ;;  %s7242_s5 = inlined_call_operand.hbm [shape: bf16[8,4], index: 5, kind: input, shape index: {}]   ;;  %s7243_s6 = inlined_call_operand.hbm [shape: f32[1,4], index: 6, kind: input, shape index: {}]   ;;  %s7244_s7 = inlined_call_operand.hbm [shape: f32[2,16,16,4], index: 7, kind: output, shape index: {}]  }
   0x1   :  { %14 = vsyncpa [#allocation5 + $0x1], 0 }
   0x2   :  { %15 = vsyncpa [#allocation8], 0 }
   0x3   :  { %16 = vsyncpa [#allocation11], 0 }
   0x4   :  { %17 = vsyncpa [#allocation14], 0 }
   0x5   :  { %18 = vsyncpa [#allocation6], 0 }
   0x6   :  { %20 = vsyncpa [#allocation6 + $0x1], 0  ;;  %s5322_s24 = smov 0   ;;  %s5324_s25 = smov 0  }
   0x7   :  { %s5326_s26 = smov 0   ;;  %s5328_s27 = smov 0  }
   0x8 LB: > { %s5260_s28 = smov [#allocation7]   ;;  %s5343_s30 = sadd.s32 4294967295, %s5258_s27   ;;  %s5258_s27 = sphi %s5328_s27, %s7276_s27   ;;  %s5254_s26 = sphi %s5326_s26, %s7275_s26   ;;  %s5250_s25 = sphi %s5324_s25, %s7274_s25   ;;  %s5246_s24 = sphi %s5322_s24, %s7273_s24  }
   0x9   : > { %s222_s29 = sshll.u32 %s5260_s28, 4  ;;  %p4217_p0 = scmp.ge.s32.totalorder %s5258_s27, 1  ;;  %s223_s29 = int_to_ptr.vmem [resolvable:$true] %s222_s29 }
   0xa   : > { %p7245_p1 = scmp.eq.s32.totalorder %s5343_s30, 0  ;;  %p209_p2 = scmp.lt.s32.totalorder %s5258_s27, 3 }
   0xb   : > { %s5261_s9 = smov [#allocation10]   ;;  %s5262_s12 = smov [#allocation13]  }
   0xc   : > { %p5348_p3 = pnand %p4217_p0, %p209_p2  ;;  %s243_s10 = sshll.u32 %s5261_s9, 4  ;;  %s5355_s10 = int_to_ptr.vmem [resolvable:$true] %s243_s10 }
   0xd   : > { %s268_s13 = sshll.u32 %s5262_s12, 4  ;;  %s4982_s16 = scalar_lea.hbm %s7238_s1, 32  ;;  %s5363_s13 = int_to_ptr.vmem [resolvable:$true] %s268_s13 }
   0xe   : > { %s7248_s8 = scalar_select %p5348_p3, 1, 0 }
   0xf   : > { %p4803_p5 = pneg %p5348_p3  ;;  %p4983_p7 = scmp.ne.s32.totalorder %s7238_s1, %s4982_s16 }
  0x10   : > { %p4989_p11 = scmp.lt.u32.totalorder %s4982_s16, %s7238_s1 }
  0x11   : > { %p5359_p6 = pnand %p4803_p5, %p7245_p1 }
  0x13   : > { %p5373_p8 = pneg %p5359_p6 }
  0x15   : > { %p4985_p9 = pnand %p5373_p8, %p4983_p7 }
  0x17   : > { %p4986_p10 = pneg %p4985_p9 }
  0x19   : > { %p4991_p12 = pnand %p4989_p11, %p4986_p10 }
  0x1b   : > { %4994 = shalt.err (!%p4991_p12)
}
  0x1c   : > { %s4995_s22 = scalar_lea.vmem %s223_s29, 32  ;;  %p5003_p5 = scmp.lt.s32.totalorder %s223_s29, %s223_s29 }
  0x1d   : > { %p4996_p13 = scmp.ne.s32.totalorder %s223_s29, %s4995_s22  ;;  %p5004_p4 = scmp.lt.s32.totalorder %s4995_s22, %s4995_s22 }
  0x1f   : > { %p4998_p0 = pnand %p4996_p13, %p5373_p8  ;;  %p5005_p1 = por %p5004_p4, %p5003_p5 }
  0x21   : > { %p4999_p2 = pneg %p4998_p0 }
  0x23   : > { %p5006_p3 = pnand %p5005_p1, %p4999_p2 }
  0x25   : > { %5009 = shalt.err (!%p5006_p3)
}
  0x26   : > { %4806 = dma.hbm_to_vmem [thread:$0]  (!%p5359_p6), %s7238_s1, 32, %s223_s29, [#allocation8]  }
  0x27   : > { %s5010_s14 = scalar_lea.hbm %s7240_s3, 576 }
  0x28   : > { %p5011_p7 = scmp.ne.s32.totalorder %s7240_s3, %s5010_s14  ;;  %p5017_p1 = scmp.lt.u32.totalorder %s5010_s14, %s7240_s3 }
  0x2a   : > { %p5013_p9 = pnand %p5011_p7, %p5373_p8 }
  0x2c   : > { %p5014_p4 = pneg %p5013_p9 }
  0x2e   : > { %p5019_p3 = pnand %p5017_p1, %p5014_p4 }
  0x30   : > { %5022 = shalt.err (!%p5019_p3)
}
  0x31   : > { %s5023_s29 = scalar_lea.vmem %s5355_s10, 576  ;;  %p5031_p13 = scmp.lt.s32.totalorder %s5355_s10, %s5355_s10 }
  0x32   : > { %p5024_p10 = scmp.ne.s32.totalorder %s5355_s10, %s5023_s29  ;;  %p5032_p0 = scmp.lt.s32.totalorder %s5023_s29, %s5023_s29 }
  0x34   : > { %p5026_p11 = pnand %p5024_p10, %p5373_p8  ;;  %p5033_p2 = por %p5032_p0, %p5031_p13 }
  0x36   : > { %p5027_p12 = pneg %p5026_p11 }
  0x38   : > { %p5034_p5 = pnand %p5033_p2, %p5027_p12 }
  0x3a   : > { %5037 = shalt.err (!%p5034_p5)
}
  0x3b   : > { %s5263_s20 = smov 64   ;;  %s5264_s21 = smov 4  }
  0x3c   : > { %4812 = dma.hbm_to_vmem [thread:$0]  (!%p5359_p6), %s7240_s3, 576, %s5355_s10, [#allocation11], %s5263_s20, %s5263_s20, %s5264_s21  }
  0x3d   : > { %s5038_s12 = scalar_lea.hbm %s7242_s5, 64 }
  0x3e   : > { %p5039_p7 = scmp.ne.s32.totalorder %s7242_s5, %s5038_s12  ;;  %p5045_p1 = scmp.lt.u32.totalorder %s5038_s12, %s7242_s5 }
  0x40   : > { %p5041_p9 = pnand %p5039_p7, %p5373_p8 }
  0x42   : > { %p5042_p4 = pneg %p5041_p9 }
  0x44   : > { %p5047_p3 = pnand %p5045_p1, %p5042_p4 }
  0x46   : > { %5050 = shalt.err (!%p5047_p3)
}
  0x47   : > { %s5051_s10 = scalar_lea.vmem %s5363_s13, 64  ;;  %p5059_p13 = scmp.lt.s32.totalorder %s5363_s13, %s5363_s13 }
  0x48   : > { %p5052_p10 = scmp.ne.s32.totalorder %s5363_s13, %s5051_s10  ;;  %p5060_p0 = scmp.lt.s32.totalorder %s5051_s10, %s5051_s10 }
  0x4a   : > { %p5054_p11 = pnand %p5052_p10, %p5373_p8  ;;  %p5061_p2 = por %p5060_p0, %p5059_p13 }
  0x4c   : > { %p5055_p12 = pneg %p5054_p11 }
  0x4e   : > { %p5062_p5 = pnand %p5061_p2, %p5055_p12 }
  0x50   : > { %5065 = shalt.err (!%p5062_p5)
}
  0x51   : > { %4818 = dma.hbm_to_vmem [thread:$0]  (!%p5359_p6), %s7242_s5, 64, %s5363_s13, [#allocation14]  }
  0x52   : > { %s5265_s20 = smov [#allocation9]   ;;  %s5266_s22 = smov [#allocation12]  }
  0x53   : > { %s233_s21 = sshll.u32 %s5265_s20, 4  ;;  %s257_s23 = sshll.u32 %s5266_s22, 4  ;;  %s234_s21 = int_to_ptr.vmem [resolvable:$true] %s233_s21  ;;  %s258_s23 = int_to_ptr.vmem [resolvable:$true] %s257_s23 }
  0x54   : > { %s5066_s12 = scalar_lea.hbm %s7239_s2, 16 }
  0x55   : > { %p5067_p7 = scmp.ne.s32.totalorder %s7239_s2, %s5066_s12  ;;  %p5073_p1 = scmp.lt.u32.totalorder %s5066_s12, %s7239_s2 }
  0x57   : > { %p5069_p9 = pnand %p5067_p7, %p5373_p8 }
  0x59   : > { %p5070_p4 = pneg %p5069_p9 }
  0x5b   : > { %p5075_p3 = pnand %p5073_p1, %p5070_p4 }
  0x5d   : > { %5078 = shalt.err (!%p5075_p3)
}
  0x5e   : > { %s5079_s13 = scalar_lea.vmem %s234_s21, 16  ;;  %s5086_s10 = scalar_lea.vmem %s234_s21, 32 }
  0x5f   : > { %p5080_p10 = scmp.ne.s32.totalorder %s234_s21, %s5079_s13  ;;  %p5087_p13 = scmp.lt.s32.totalorder %s234_s21, %s234_s21 }
  0x60   : > { %p5088_p0 = scmp.lt.s32.totalorder %s5086_s10, %s5079_s13 }
  0x61   : > { %p5082_p11 = pnand %p5080_p10, %p5373_p8 }
  0x62   : > { %p5089_p2 = por %p5088_p0, %p5087_p13 }
  0x63   : > { %p5083_p12 = pneg %p5082_p11 }
  0x65   : > { %p5090_p5 = pnand %p5089_p2, %p5083_p12 }
  0x67   : > { %5093 = shalt.err (!%p5090_p5)
}
  0x68   : > { %4809 = dma.hbm_to_vmem [thread:$0]  (!%p5359_p6), %s7239_s2, 16, %s234_s21, [#allocation8]  }
  0x69   : > { %s5094_s28 = scalar_lea.hbm %s7241_s4, 16 }
  0x6a   : > { %p5095_p7 = scmp.ne.s32.totalorder %s7241_s4, %s5094_s28  ;;  %p5101_p1 = scmp.lt.u32.totalorder %s5094_s28, %s7241_s4 }
  0x6c   : > { %p5097_p9 = pnand %p5095_p7, %p5373_p8 }
  0x6e   : > { %p5098_p4 = pneg %p5097_p9 }
  0x70   : > { %p5103_p3 = pnand %p5101_p1, %p5098_p4 }
  0x72   : > { %5106 = shalt.err (!%p5103_p3)
}
  0x73   : > { %s5107_s16 = scalar_lea.vmem %s258_s23, 16  ;;  %s5114_s21 = scalar_lea.vmem %s258_s23, 32 }
  0x74   : > { %p5108_p10 = scmp.ne.s32.totalorder %s258_s23, %s5107_s16  ;;  %p5115_p13 = scmp.lt.s32.totalorder %s258_s23, %s258_s23 }
  0x75   : > { %p5116_p0 = scmp.lt.s32.totalorder %s5114_s21, %s5107_s16 }
  0x76   : > { %p5110_p11 = pnand %p5108_p10, %p5373_p8 }
  0x77   : > { %p5117_p2 = por %p5116_p0, %p5115_p13 }
  0x78   : > { %p5111_p12 = pneg %p5110_p11 }
  0x7a   : > { %p5118_p5 = pnand %p5117_p2, %p5111_p12 }
  0x7c   : > { %5121 = shalt.err (!%p5118_p5)
}
  0x7d   : > { %4815 = dma.hbm_to_vmem [thread:$0]  (!%p5359_p6), %s7241_s4, 16, %s258_s23, [#allocation11]  }
  0x7e   : > { %s5267_s10 = smov [#allocation15]   ;;  %s5122_s22 = scalar_lea.hbm %s7243_s6, 16 }
  0x7f   : > { %s279_s18 = sshll.u32 %s5267_s10, 4  ;;  %p5123_p7 = scmp.ne.s32.totalorder %s7243_s6, %s5122_s22  ;;  %s280_s18 = int_to_ptr.vmem [resolvable:$true] %s279_s18 }
  0x80   : > { %p5129_p1 = scmp.lt.u32.totalorder %s5122_s22, %s7243_s6 }
  0x81   : > { %p5125_p9 = pnand %p5123_p7, %p5373_p8 }
  0x83   : > { %p5126_p4 = pneg %p5125_p9 }
  0x85   : > { %p5131_p3 = pnand %p5129_p1, %p5126_p4 }
  0x87   : > { %5134 = shalt.err (!%p5131_p3)
}
  0x88   : > { %s5135_s23 = scalar_lea.vmem %s280_s18, 16  ;;  %s5142_s15 = scalar_lea.vmem %s280_s18, 32 }
  0x89   : > { %p5136_p10 = scmp.ne.s32.totalorder %s280_s18, %s5135_s23  ;;  %p5143_p13 = scmp.lt.s32.totalorder %s280_s18, %s280_s18 }
  0x8a   : > { %p5144_p0 = scmp.lt.s32.totalorder %s5142_s15, %s5135_s23 }
  0x8b   : > { %p5138_p11 = pnand %p5136_p10, %p5373_p8 }
  0x8c   : > { %p5145_p2 = por %p5144_p0, %p5143_p13 }
  0x8d   : > { %p5139_p12 = pneg %p5138_p11 }
  0x8f   : > { %p5146_p5 = pnand %p5145_p2, %p5139_p12 }
  0x91   : > { %5149 = shalt.err (!%p5146_p5)
}
  0x92   : > { %4821 = dma.hbm_to_vmem [thread:$0]  (!%p5359_p6), %s7243_s6, 16, %s280_s18, [#allocation14]  }
  0x93   : > { %s4216_s19 = sadd.s32 4294967294, %s5258_s27   ;;  %s5491_s11 = sadd.s32 1, %s5258_s27  }
  0x94   : > { %s30_s17 = ssub.s32 %s5258_s27, %s5491_s11  ;;  %s33_s13 = sadd.s32 1, %s5254_s26 }
  0x95   : > { %p31_p8 = scmp.eq.s32.totalorder %s30_s17, 0  ;;  %p40_p7 = scmp.ne.s32.totalorder %s5254_s26, %s5250_s25 }
  0x96   : > { %p41_p9 = scmp.eq.s32.totalorder %s5258_s27, 0  ;;  %p46_p4 = scmp.ne.s32.totalorder %s5250_s25, %s5246_s24 }
  0x97   : > { %s5502_s10 = scalar_select %p31_p8, %s5254_s26, %s33_s13  }
  0x98   : > { %p5504_p1 = por %p41_p9, %p40_p7  ;;  %p7252_p3 = scmp.eq.s32.totalorder %s5343_s30, 0 }
  0x99   : > { %p196_p10 = scmp.eq.s32.totalorder %s5343_s30, 1  ;;  %p202_p11 = scmp.eq.s32.totalorder %s4216_s19, 1 }
  0x9a   : > { %p5510_p6 = por %p7252_p3, %p46_p4  ;;  %p4836_p12 = scmp.lt.s32.totalorder %s5258_s27, 2 }
  0x9b   : > { %s290_s20 = sand.u32 1, %s5254_s26   ;;  %p5517_p13 = por %p196_p10, %p40_p7 }
  0x9c   : > { %p5521_p0 = por %p202_p11, %p46_p4  ;;  %s4225_s9 = sshll.u32 %s290_s20, 8 }
  0x9d   : > { %s7254_s22 = scalar_select %p5517_p13, 1, 0 }
  0x9e   : > { %s7255_s28 = scalar_select %p5521_p0, 1, 0 }
  0x9f   : > { %s4570_s12 = sshll.u32 %s5258_s27, 12  ;;  %s294_s16 = scalar_lea.vmem [#allocation4], %s4225_s9 }
  0xa0   : > { %s5529_s15 = scalar_lea.hbm %s7237_s0, %s4570_s12  ;;  %s301_s21 = sshll.u32 %s294_s16, 4  ;;  %s5531_s21 = int_to_ptr.vmem [resolvable:$true] %s301_s21 }
  0xa1   : > { %p5535_p2 = pnand %p4836_p12, %p5504_p1  ;;  %s5539_s17 = scalar_lea.sflag [#allocation5], %s290_s20 }
  0xa2   : > { %s5150_s13 = scalar_lea.hbm %s5529_s15, 4096  ;;  %s5155_s29 = scalar_lea.hbm %s7237_s0, 8192 }
  0xa3   : > { %p5151_p5 = scmp.ne.s32.totalorder %s5529_s15, %s5150_s13  ;;  %p5152_p8 = pneg %p5535_p2 }
  0xa4   : > { %p5156_p4 = scmp.lt.u32.totalorder %s5529_s15, %s7237_s0  ;;  %p5157_p1 = scmp.lt.u32.totalorder %s5155_s29, %s5150_s13 }
  0xa5   : > { %p5153_p7 = pnand %p5152_p8, %p5151_p5  ;;  %p5159_p10 = scmp.lt.u32.totalorder %s5150_s13, %s5529_s15 }
  0xa6   : > { %p5158_p3 = por %p5157_p1, %p5156_p4 }
  0xa7   : > { %p5154_p9 = pneg %p5153_p7 }
  0xa8   : > { %p5160_p11 = por %p5159_p10, %p5158_p3 }
  0xaa   : > { %p5161_p12 = pnand %p5160_p11, %p5154_p9 }
  0xac   : > { %5164 = shalt.err (!%p5161_p12)
}
  0xad   : > { %s5165_s20 = scalar_lea.vmem %s5531_s21, 4096  ;;  %s5268_s16 = smov [#allocation4]  }
  0xae   : > { %p5166_p5 = scmp.ne.s32.totalorder %s5531_s21, %s5165_s20  ;;  %s5170_s9 = sshll.u32 %s5268_s16, 4  ;;  %s5171_s9 = int_to_ptr.vmem [resolvable:$false] %s5170_s9 }
  0xaf   : > { %s5172_s12 = scalar_lea.vmem %s5171_s9, 8192  ;;  %p5173_p13 = scmp.lt.s32.totalorder %s5531_s21, %s5171_s9 }
  0xb0   : > { %p5168_p7 = pnand %p5166_p5, %p5152_p8  ;;  %p5174_p4 = scmp.lt.s32.totalorder %s5172_s12, %s5165_s20 }
  0xb2   : > { %p5169_p0 = pneg %p5168_p7  ;;  %p5175_p1 = por %p5174_p4, %p5173_p13 }
  0xb4   : > { %p5176_p3 = pnand %p5175_p1, %p5169_p0 }
  0xb6   : > { %5179 = shalt.err (!%p5176_p3)
}
  0xb7   : > { %s5269_s13 = smov 128   ;;  %s5270_s29 = smov 8  }
  0xb8   : > { %4825 = dma.hbm_to_vmem [thread:$0]  (!%p5535_p2), %s5529_s15, 4096, %s5531_s21, %s5539_s17, %s5269_s13, %s5269_s13, %s5270_s29  }
  0xb9   : > { %p7257_p8 = scmp.ne.s32.totalorder %s7248_s8, 0 }
  0xba   : > { %s5570_s14 = sand.u32 (!%p7257_p8), 1, %s5250_s25  }
  0xbb   : > { %313 = sbr.rel (%p7257_p8) target bundleno = 1271 (0x4f7), region = 48  ;;  %s4229_s23 = sshll.u32 (!%p7257_p8), %s5570_s14, 8 }
  0xbc   : > { %s316_s20 = scalar_lea.sflag (!%p7257_p8), [#allocation5], %s5570_s14  ;;  %s5576_s16 = scalar_lea.vmem (!%p7257_p8), [#allocation4], %s4229_s23 }
  0xc2   : > { %5225 = dma.done.wait (%p5510_p6), %s316_s20, 4096  }
  0xc3   : > { %5227 = vsyncadd (%p5510_p6), %s316_s20, 4294963200  ;;  %p7258_p13 = scmp.eq.s32.totalorder %s5343_s30, 0 }
  0xc5   : > { %5229 = dma.done.wait (%p7258_p13), [#allocation8], 48   ;;  %p7259_p0 = pmov %p7258_p13 }
  0xc7   : > { %5231 = vsyncadd (%p7259_p0), [#allocation8], 4294967248  ;;  %p7260_p2 = pmov %p7259_p0 }
  0xc8   : > { %p7261_p9 = pmov %p7259_p0 }
  0xc9   : > { %5233 = dma.done.wait (%p7260_p2), [#allocation11], 592  }
  0xca   : > { %5235 = vsyncadd (%p7261_p9), [#allocation11], 4294966704  ;;  %p7262_p10 = pmov %p7259_p0 }
  0xcb   : > { %p7263_p11 = pmov %p7259_p0 }
  0xcc   : > { %5237 = dma.done.wait (%p7262_p10), [#allocation14], 80  }
  0xcd   : > { %5239 = vsyncadd (%p7263_p11), [#allocation14], 4294967216  ;;  %vm480_vm0 = vcmask 1041408   ;;  %v423_v0 = vld [vmem:[#allocation7] sm:$0x3]  ;;  %v376_v2 = vld [vmem:[%s5576_s16 + $0x8] sm:$0xff] }
  0xce   : > { %v375_v1 = vld [vmem:[%s5576_s16] sm:$0xff]  ;;  %vm431_vm1 = vcmask 31744   ;;  %4771 = vmatprep.subr.msk.bf16.mxu0 %vm480_vm0, %v423_v0  ;;  %4772 = vmatprep.subr.msk.bf16.mxu1 %vm480_vm0, %v423_v0  ;;  %v482_v3 = vsel %vm480_vm0, %v423_v0, 0  ;;  %v392_v6 = vld [vmem:[%s5576_s16 + $0x88] sm:$0xff]  ;;  %v377_v7 = vld [vmem:[%s5576_s16 + $0x10] sm:$0xff]  ;;  %vm693_vm2 = vcmask 60416  }
  0xcf   : > { %v407_v4 = vpack.c.bf16 %v376_v2, %v375_v1  ;;  %v391_v5 = vld [vmem:[%s5576_s16 + $0x80] sm:$0xff]  ;;  %4660 = vmatpush3.bf16.msra.mxu0 %v482_v3  ;;  %4770 = vmatpush3.bf16.msra.mxu1 %v482_v3  ;;  %v378_v9 = vld [vmem:[%s5576_s16 + $0x18] sm:$0xff]  ;;  %v393_v10 = vld [vmem:[%s5576_s16 + $0x90] sm:$0xff]  ;;  %v5271_v50 = vmov 0   ;;  %vm696_vm3 = vcmask 58368   ;;  %vm1569_vm4 = vcmask 1045508  }
  0xd0   : > { %v415_v8 = vpack.c.bf16 %v392_v6, %v391_v5  ;;  %v394_v11 = vld [vmem:[%s5576_s16 + $0x98] sm:$0xff]  ;;  %v408_v12 = vpack.c.bf16 %v378_v9, %v377_v7  ;;  %v379_v14 = vld [vmem:[%s5576_s16 + $0x20] sm:$0xff]  ;;  %v380_v15 = vld [vmem:[%s5576_s16 + $0x28] sm:$0xff]  ;;  %694 = vst.msk [vmem:[#allocation2] sm:$0xf] %vm693_vm2, %v5271_v50  ;;  %vm709_vm6 = vcmask 57344  }
  0xd1   : > { %4661 = vmatprep.mubr.msk.bf16.mxu0 %vm431_vm1, %v407_v4  ;;  %v416_v13 = vpack.c.bf16 %v394_v11, %v393_v10  ;;  %v409_v16 = vpack.c.bf16 %v380_v15, %v379_v14  ;;  %v395_v17 = vld [vmem:[%s5576_s16 + $0xa0] sm:$0xff]  ;;  %v396_v18 = vld [vmem:[%s5576_s16 + $0xa8] sm:$0xff]  ;;  %v381_v19 = vld [vmem:[%s5576_s16 + $0x30] sm:$0xff]  ;;  %695 = vst.msk [vmem:[#allocation2 + $0x4] sm:$0xf] %vm693_vm2, %v5271_v50  ;;  %vm1244_vm7 = vcmask 1042432  }
  0xd2   : > { %4677 = vmatprep.mubr.msk.bf16.mxu1 %vm431_vm1, %v415_v8  ;;  %4662 = vmatmul.mubr.msk.bf16.vlgmr.msra.gmra.mrb[0].mxu0 %vm431_vm1, %v408_v12  ;;  %v382_v20 = vld [vmem:[%s5576_s16 + $0x38] sm:$0xff]  ;;  %v417_v21 = vpack.c.bf16 %v396_v18, %v395_v17  ;;  %v397_v22 = vld [vmem:[%s5576_s16 + $0xb0] sm:$0xff]  ;;  %v383_v24 = vld [vmem:[%s5576_s16 + $0x40] sm:$0xff]  ;;  %698 = vst.msk [vmem:[#allocation2 + $0xc] sm:$0xf] %vm693_vm2, %v5271_v50  ;;  %vm1245_vm8 = vcmask 1046532  }
  0xd3   : > { %4678 = vmatmul.mubr.msk.bf16.vlgmr.msra.gmra.mrb[0].mxu1 %vm431_vm1, %v416_v13  ;;  %4665 = vmatprep.mubr.msk.bf16.mxu0 %vm431_vm1, %v409_v16  ;;  %v398_v23 = vld [vmem:[%s5576_s16 + $0xb8] sm:$0xff]  ;;  %v384_v25 = vld [vmem:[%s5576_s16 + $0x48] sm:$0xff]  ;;  %v399_v26 = vld [vmem:[%s5576_s16 + $0xc0] sm:$0xff]  ;;  %v410_v28 = vpack.c.bf16 %v382_v20, %v381_v19  ;;  %699 = vst.msk [vmem:[#allocation2 + $0x10] sm:$0xf] %vm693_vm2, %v5271_v50  ;;  %s5272_s8 = smov 16  }
  0xd4   : > { %4681 = vmatprep.mubr.msk.bf16.mxu1 %vm431_vm1, %v417_v21  ;;  %v400_v27 = vld [vmem:[%s5576_s16 + $0xc8] sm:$0xff]  ;;  %v418_v29 = vpack.c.bf16 %v398_v23, %v397_v22  ;;  %v411_v30 = vpack.c.bf16 %v384_v25, %v383_v24  ;;  %v385_v32 = vld [vmem:[%s5576_s16 + $0x50] sm:$0xff]  ;;  %v386_v33 = vld [vmem:[%s5576_s16 + $0x58] sm:$0xff]  ;;  %702 = vst.msk [vmem:[#allocation2 + $0xd8] sm:$0xf] %vm693_vm2, %v5271_v50  ;;  %s5273_s18 = smov 8  }
  0xd5   : > { %v419_v31 = vpack.c.bf16 %v400_v27, %v399_v26  ;;  %v401_v34 = vld [vmem:[%s5576_s16 + $0xd0] sm:$0xff]  ;;  %v402_v35 = vld [vmem:[%s5576_s16 + $0xd8] sm:$0xff]  ;;  %v387_v36 = vld [vmem:[%s5576_s16 + $0x60] sm:$0xff]  ;;  %v412_v40 = vpack.c.bf16 %v386_v33, %v385_v32  ;;  %703 = vst.msk [vmem:[#allocation2 + $0xdc] sm:$0xf] %vm693_vm2, %v5271_v50  ;;  %vm726_vm10 = vcmask 58369  }
  0xd6   : > { %v388_v37 = vld [vmem:[%s5576_s16 + $0x68] sm:$0xff]  ;;  %v403_v38 = vld [vmem:[%s5576_s16 + $0xe0] sm:$0xff]  ;;  %v420_v41 = vpack.c.bf16 %v402_v35, %v401_v34  ;;  %v389_v44 = vld [vmem:[%s5576_s16 + $0x70] sm:$0xff]  ;;  %705 = vst.msk [vmem:[#allocation2 + $0xe4] sm:$0xf] %vm693_vm2, %v5271_v50  ;;  %vm1131_vm11 = vcmask 64512  }
  0xd7   : > { %v404_v39 = vld [vmem:[%s5576_s16 + $0xe8] sm:$0xff]  ;;  %v413_v42 = vpack.c.bf16 %v388_v37, %v387_v36  ;;  %v390_v45 = vld [vmem:[%s5576_s16 + $0x78] sm:$0xff]  ;;  %v405_v46 = vld [vmem:[%s5576_s16 + $0xf0] sm:$0xff]  ;;  %706 = vst.msk [vmem:[#allocation2 + $0xe8] sm:$0xf] %vm693_vm2, %v5271_v50  ;;  %vm954_vm12 = vcmask 60417  }
  0xd8   : > { %v421_v43 = vpack.c.bf16 %v404_v39, %v403_v38  ;;  %v406_v47 = vld [vmem:[%s5576_s16 + $0xf8] sm:$0xff]  ;;  %v414_v48 = vpack.c.bf16 %v390_v45, %v389_v44  ;;  %697 = vst.msk [vmem:[#allocation2 + $0x8] sm:$0x3] %vm696_vm3, %v5271_v50  ;;  %700 = vst.msk [vmem:[#allocation2 + $0x14] sm:$0x3] %vm696_vm3, %v5271_v50  ;;  %vm823_vm13 = vcmask 1040384  }
  0xd9   : > { %v422_v49 = vpack.c.bf16 %v406_v47, %v405_v46  ;;  %704 = vst.msk [vmem:[#allocation2 + $0xe0] sm:$0x3] %vm696_vm3, %v5271_v50  ;;  %707 = vst.msk [vmem:[#allocation2 + $0xec] sm:$0x3] %vm696_vm3, %v5271_v50  ;;  %v1473_v51 = vld [vmem:[#allocation2 + $0x4] sm:$0xf] }
  0xda   : > { %4666 = vmatmul.mubr.msk.bf16.gmra.mrb[4].mxu0 %vm431_vm1, %v410_v28  ;;  %v1573_v52 = vrot.slane %v1473_v51, 6  ;;  %v1149_v53 = vld [vmem:[#allocation2 + $0x4] sm:$0xf]  ;;  %vm5666_vm5 = vmor %vm480_vm0, %vm1569_vm4  ;;  %v1472_v55 = vld [vmem:[#allocation2] sm:$0xc]  ;;  %vm824_vm14 = vcmask 1044484  }
  0xdb   : > { %4682 = vmatmul.mubr.msk.bf16.gmra.mrb[4].mxu1 %vm431_vm1, %v418_v29  ;;  %4669 = vmatprep.mubr.msk.bf16.mxu0 %vm431_vm1, %v411_v30  ;;  %v1249_v57 = vrot.slane %v1149_v53, 5  ;;  %v4334_v58 = vrot.slane %v1472_v55, 10  ;;  %v1148_v60 = vld [vmem:[#allocation2] sm:$0xe]  ;;  %710 = vst.msk [vmem:[#allocation2 + $0x18] sm:$0x1] %vm709_vm6, %v5271_v50  ;;  %vm5706_vm9 = vmor %vm1244_vm7, %vm1245_vm8 }
  0xdc   : > { %4685 = vmatprep.mubr.msk.bf16.mxu1 %vm431_vm1, %v419_v31  ;;  %v1575_v59 = vrot.slane %v1573_v52, 4  ;;  %711 = vst.msk [vmem:[#allocation2 + $0x24] sm:$0x1] %vm709_vm6, %v5271_v50  ;;  %712 = vst.msk [vmem:[#allocation2 + $0x30] sm:$0x1] %vm709_vm6, %v5271_v50  ;;  %v4302_v0 = vrot.slane %v1148_v60, 9 }
  0xdd   : > { %713 = vst.msk [vmem:[#allocation2 + $0x3c] sm:$0x1] %vm709_vm6, %v5271_v50  ;;  %714 = vst.msk [vmem:[#allocation2 + $0x48] sm:$0x1] %vm709_vm6, %v5271_v50  ;;  %v1574_v63 = vsel %vm5666_vm5, %v4334_v58, %v1573_v52  ;;  %v1251_v1 = vrot.slane %v1249_v57, 4  ;;  %v4910_v30 = vld [vmem:[#allocation2] sm:$0xff]  }
  0xde   : > { %715 = vst.msk [vmem:[#allocation2 + $0x54] sm:$0x1] %vm709_vm6, %v5271_v50  ;;  %716 = vst.msk [vmem:[#allocation2 + $0x60] sm:$0x1] %vm709_vm6, %v5271_v50  ;;  %v1476_v2 = vld [vmem:[#allocation2 + $0x10] sm:$0xf]  ;;  %v1250_v10 = vsel %vm5706_vm9, %v4302_v0, %v1249_v57 }
  0xdf   : > { %v1474_v56 = vld [vmem:[#allocation2 + $0x8] sm:$0x3]  ;;  %717 = vst.msk [vmem:[#allocation2 + $0x6c] sm:$0x1] %vm709_vm6, %v5271_v50  ;;  %718 = vst.msk [vmem:[#allocation2 + $0x78] sm:$0x1] %vm709_vm6, %v5271_v50 }
  0xe0   : > { %v1576_v61 = vrot.slane %v1474_v56, 6  ;;  %719 = vst.msk [vmem:[#allocation2 + $0x84] sm:$0x1] %vm709_vm6, %v5271_v50  ;;  %720 = vst.msk [vmem:[#allocation2 + $0x90] sm:$0x1] %vm709_vm6, %v5271_v50  ;;  %v1580_v8 = vrot.slane %v1476_v2, 6 }
  0xe1   : > { %721 = vst.msk [vmem:[#allocation2 + $0x9c] sm:$0x1] %vm709_vm6, %v5271_v50  ;;  %722 = vst.msk [vmem:[#allocation2 + $0xa8] sm:$0x1] %vm709_vm6, %v5271_v50  ;;  %v1150_v62 = vld [vmem:[#allocation2 + $0x8] sm:$0x1] }
  0xe2   : > { %4670 = vmatmul.mubr.msk.bf16.gmra.mrb[8].mxu0 %vm431_vm1, %v412_v40  ;;  %723 = vst.msk [vmem:[#allocation2 + $0xb4] sm:$0x1] %vm709_vm6, %v5271_v50  ;;  %724 = vst.msk [vmem:[#allocation2 + $0xc0] sm:$0x1] %vm709_vm6, %v5271_v50  ;;  %v1577_v3 = vsel %vm5666_vm5, %v1575_v59, %v1576_v61  ;;  %v1252_v5 = vrot.slane %v1150_v62, 5  ;;  %v1582_v15 = vrot.slane %v1580_v8, 4 }
  0xe3   : > { %4686 = vmatmul.mubr.msk.bf16.gmra.mrb[8].mxu1 %vm431_vm1, %v420_v41  ;;  %4673 = vmatprep.mubr.msk.bf16.mxu0 %vm431_vm1, %v413_v42  ;;  %725 = vst.msk [vmem:[#allocation2 + $0xcc] sm:$0x1] %vm709_vm6, %v5271_v50  ;;  %v1475_v6 = vld [vmem:[#allocation2 + $0xc] sm:$0xc]  ;;  %v1477_v7 = vld [vmem:[#allocation2 + $0x14] sm:$0x3]  ;;  %v4350_v9 = vcombine.low %v1574_v63, %v1577_v3  ;;  %vm5773_vm0 = vmor %vm823_vm13, %vm824_vm14 }
  0xe4   : > { %4689 = vmatprep.mubr.msk.bf16.mxu1 %vm431_vm1, %v421_v43  ;;  %v4335_v11 = vrot.slane %v1475_v6, 10  ;;  %v1583_v12 = vrot.slane %v1477_v7, 6  ;;  %v1151_v13 = vld [vmem:[#allocation2 + $0xc] sm:$0xe]  ;;  %v1253_v14 = vsel %vm5706_vm9, %v1251_v1, %v1252_v5  ;;  %v1152_v16 = vld [vmem:[#allocation2 + $0x10] sm:$0xf] }
  0xe5   : > { %v1153_v17 = vld [vmem:[#allocation2 + $0x14] sm:$0x1]  ;;  %1731 = vrot.lane.b32.xlu1 %v4350_v9, %s5272_s8  ;;  %v4318_v18 = vcombine.low %v1250_v10, %v1253_v14  ;;  %v4303_v20 = vrot.slane %v1151_v13, 9  ;;  %v1256_v21 = vrot.slane %v1152_v16, 5  ;;  %736 = vst.msk [vmem:[#allocation2 + $0x8c] sm:$0x2] %vm726_vm10, %v5271_v50 }
  0xe6   : > { %v1581_v19 = vsel %vm5666_vm5, %v4335_v11, %v1580_v8  ;;  %v1584_v22 = vsel %vm5666_vm5, %v1582_v15, %v1583_v12  ;;  %v1259_v23 = vrot.slane %v1153_v17, 5  ;;  %727 = vst.msk [vmem:[#allocation2 + $0x20] sm:$0x2] %vm726_vm10, %v5271_v50  ;;  %728 = vst.msk [vmem:[#allocation2 + $0x2c] sm:$0x2] %vm726_vm10, %v5271_v50  ;;  %vm1455_vm15 = vcmask 130112  }
  0xe7   : > { %1407 = vrot.lane.b32.xlu0 %v4318_v18, %s5273_s18  ;;  %v4351_v24 = vcombine.low %v1581_v19, %v1584_v22  ;;  %v1257_v25 = vsel %vm5706_vm9, %v4303_v20, %v1256_v21  ;;  %v1258_v26 = vrot.slane %v1256_v21, 4  ;;  %729 = vst.msk [vmem:[#allocation2 + $0x38] sm:$0x2] %vm726_vm10, %v5271_v50  ;;  %730 = vst.msk [vmem:[#allocation2 + $0x44] sm:$0x2] %vm726_vm10, %v5271_v50  ;;  %v4911_v47 = vld [vmem:[#allocation2 + $0xc] sm:$0xff]  }
  0xe8   : > { %731 = vst.msk [vmem:[#allocation2 + $0x50] sm:$0x2] %vm726_vm10, %v5271_v50  ;;  %732 = vst.msk [vmem:[#allocation2 + $0x5c] sm:$0x2] %vm726_vm10, %v5271_v50  ;;  %v5758_v29 = vld [vmem:[#allocation9] ss:$0 sm:$0xff] }
  0xe9   : > { %733 = vst.msk [vmem:[#allocation2 + $0x68] sm:$0x2] %vm726_vm10, %v5271_v50  ;;  %734 = vst.msk [vmem:[#allocation2 + $0x74] sm:$0x2] %vm726_vm10, %v5271_v50  ;;  %1733 = vrot.lane.b32.xlu1 %v4351_v24, %s5272_s8  ;;  %v1260_v27 = vsel %vm5706_vm9, %v1258_v26, %v1259_v23  ;;  %s5274_s15 = smov 24   ;;  %s5275_s21 = smov 48  }
  0xea   : > { %4674 = vmatmul.mubr.msk.bf16.gmra.mrb[12].mxu0 %vm431_vm1, %v414_v48  ;;  %735 = vst.msk [vmem:[#allocation2 + $0x80] sm:$0x2] %vm726_vm10, %v5271_v50  ;;  %737 = vst.msk [vmem:[#allocation2 + $0x98] sm:$0x2] %vm726_vm10, %v5271_v50  ;;  %v4319_v28 = vcombine.low %v1257_v25, %v1260_v27  ;;  %s5276_s19 = smov 32   ;;  %s5277_s17 = smov 64  }
  0xeb   : > { %4690 = vmatmul.mubr.msk.bf16.gmra.mrb[12].mxu1 %vm431_vm1, %v422_v49  ;;  %738 = vst.msk [vmem:[#allocation2 + $0xa4] sm:$0x2] %vm726_vm10, %v5271_v50  ;;  %739 = vst.msk [vmem:[#allocation2 + $0xb0] sm:$0x2] %vm726_vm10, %v5271_v50  ;;  %s5278_s9 = smov 40   ;;  %s5279_s12 = smov 56  }
  0xec   : > { %740 = vst.msk [vmem:[#allocation2 + $0xbc] sm:$0x2] %vm726_vm10, %v5271_v50  ;;  %741 = vst.msk [vmem:[#allocation2 + $0xc8] sm:$0x2] %vm726_vm10, %v5271_v50  ;;  %1409 = vrot.lane.b32.xlu0 %v4319_v28, %s5273_s18  ;;  %vm1779_vm3 = vcmask 195712   ;;  %vm1956_vm4 = vcmask 261312  }
  0xed   : > { %742 = vst.msk [vmem:[#allocation2 + $0xd4] sm:$0x2] %vm726_vm10, %v5271_v50  ;;  %vm2277_vm7 = vcmask 326912   ;;  %vm2598_vm8 = vcmask 392512   ;;  %vm3097_vm10 = vcmask 523712   ;;  %vm3494_vm13 = vcmask 588800  }
  0xee   : > { %1132 = vst.msk [vmem:[#allocation3] sm:$0xff] %vm1131_vm11, %v4910_v30  ;;  %1133 = vst.msk [vmem:[#allocation3 + $0x8] sm:$0xff] %vm1131_vm11, %v4911_v47  ;;  %s7061_s13 = scalar_lea.vmem [#allocation16], %s4229_s23  ;;  %s4603_s29 = sshll.u32 %s5343_s30, 12 }
  0xef   : > { %s4086_s23 = sshll.u32 %s7061_s13, 4  ;;  %s4073_s30 = scalar_lea.sflag [#allocation6], %s5570_s14  ;;  %s7188_s23 = int_to_ptr.vmem [resolvable:$true] %s4086_s23 }
  0xf0   : > { %p7270_p12 = scmp.ne.s32.totalorder %s7254_s22, 0 }
 0x159   : > { %v1408_v52 = vpop.permute.xlu0 %1407 }
 0x15a   : > { %1456 = vst.msk [vmem:[#allocation3] sm:$0xff] %vm1455_vm15, %v1408_v52 }
 0x1a5   : > { %v4663_v31 = vpop.f32.mrb[0].mxu0 }
 0x1a6   : > { %v4679_v32 = vpop.f32.mrb[0].mxu1  ;;  %v527_v33 = vadd.f32 %v4663_v31, %v5758_v29  ;;  %v518_v35 = vpop.f32.mrb[1].mxu0 }
 0x1a7   : > { %v591_v34 = vadd.f32 %v4679_v32, %v5758_v29  ;;  %v582_v36 = vpop.f32.mrb[1].mxu1  ;;  %v519_v37 = vadd.f32 %v5758_v29, %v518_v35  ;;  %v4664_v39 = vpop.f32.mrb[2].mxu0 }
 0x1a8   : > { %v583_v38 = vadd.f32 %v5758_v29, %v582_v36  ;;  %v4680_v40 = vpop.f32.mrb[2].mxu1  ;;  %v647_v41 = vmax.f32 %v527_v33, 0.0  ;;  %v530_v43 = vadd.f32 %v4664_v39, %v5758_v29  ;;  %v521_v45 = vpop.f32.mrb[3].mxu0 }
 0x1a9   : > { %v663_v42 = vmax.f32 %v591_v34, 0.0  ;;  %v594_v44 = vadd.f32 %v4680_v40, %v5758_v29  ;;  %v585_v46 = vpop.f32.mrb[3].mxu1  ;;  %v645_v48 = vmax.f32 %v519_v37, 0.0  ;;  %v522_v50 = vadd.f32 %v5758_v29, %v521_v45  ;;  %v1410_v33 = vpop.permute.xlu0 %1409 }
 0x1aa   : > { %v661_v49 = vmax.f32 %v583_v38, 0.0  ;;  %v586_v51 = vadd.f32 %v5758_v29, %v585_v46  ;;  %v4573_v53 = vpack.c.bf16 %v647_v41, %v647_v41  ;;  %v648_v56 = vmax.f32 %v530_v43, 0.0  ;;  %1457 = vst.msk [vmem:[#allocation3 + $0x8] sm:$0xff] %vm1455_vm15, %v1410_v33 }
 0x1ab   : > { %v4589_v55 = vpack.c.bf16 %v663_v42, %v663_v42  ;;  %v664_v57 = vmax.f32 %v594_v44, 0.0  ;;  %v4571_v58 = vpack.c.bf16 %v645_v48, %v645_v48  ;;  %v646_v60 = vmax.f32 %v522_v50, 0.0 }
 0x1ac   : > { %v4587_v59 = vpack.c.bf16 %v661_v49, %v661_v49  ;;  %v662_v61 = vmax.f32 %v586_v51, 0.0  ;;  %v831_v62 = vrot.slane %v4573_v53, 7  ;;  %v4574_v0 = vpack.c.bf16 %v648_v56, %v648_v56 }
 0x1ad   : > { %v871_v63 = vrot.slane %v4589_v55, 7  ;;  %v4590_v1 = vpack.c.bf16 %v664_v57, %v664_v57  ;;  %v826_v2 = vrot.slane %v4571_v58, 7  ;;  %v4572_v6 = vpack.c.bf16 %v646_v60, %v646_v60  ;;  %v4667_v8 = vpop.f32.mrb[4].mxu0 }
 0x1ae   : > { %v866_v3 = vrot.slane %v4587_v59, 7  ;;  %v4588_v7 = vpack.c.bf16 %v662_v61, %v662_v61  ;;  %v5777_v9 = vpop.f32.mrb[4].mxu1  ;;  %v832_v10 = vrot.slane %v831_v62, 4  ;;  %958 = vst.msk [vmem:[#allocation2 + $0x24] sm:$0xe] %vm954_vm12, %v831_v62  ;;  %v833_v12 = vrot.slane %v4574_v0, 7 }
 0x1af   : > { %v872_v11 = vrot.slane %v871_v63, 4  ;;  %982 = vst.msk [vmem:[#allocation2 + $0x84] sm:$0xe] %vm954_vm12, %v871_v63  ;;  %v873_v13 = vrot.slane %v4590_v1, 7  ;;  %v534_v14 = vpop.f32.mrb[5].mxu0  ;;  %v598_v15 = vpop.f32.mrb[5].mxu1  ;;  %v543_v34 = vadd.f32 %v4667_v8, %v5758_v29  ;;  %v5817_v62 = vadd.f32 %v5777_v9, %v5758_v29 }
 0x1b0   : > { %v827_v16 = vrot.slane %v826_v2, 4  ;;  %955 = vst.msk [vmem:[#allocation2 + $0x18] sm:$0xe] %vm954_vm12, %v826_v2  ;;  %v867_v17 = vrot.slane %v866_v3, 4  ;;  %979 = vst.msk [vmem:[#allocation2 + $0x78] sm:$0xe] %vm954_vm12, %v866_v3  ;;  %v834_v22 = vsel %vm5773_vm0, %v832_v10, %v833_v12  ;;  %v535_v35 = vadd.f32 %v5758_v29, %v534_v14 }
 0x1b1   : > { %v828_v18 = vrot.slane %v4572_v6, 7  ;;  %v868_v19 = vrot.slane %v4588_v7, 7  ;;  %v4668_v20 = vpop.f32.mrb[6].mxu0  ;;  %v4684_v21 = vpop.f32.mrb[6].mxu1  ;;  %v835_v23 = vrot.slane %v833_v12, 4  ;;  %v874_v24 = vsel %vm5773_vm0, %v872_v11, %v873_v13 }
 0x1b2   : > { %v875_v25 = vrot.slane %v873_v13, 4  ;;  %v537_v26 = vpop.f32.mrb[7].mxu0  ;;  %v5787_v27 = vpop.f32.mrb[7].mxu1  ;;  %959 = vst.msk [vmem:[#allocation2 + $0x28] sm:$0xf] %vm693_vm2, %v834_v22  ;;  %v546_v36 = vadd.f32 %v4668_v20, %v5758_v29  ;;  %v651_v37 = vmax.f32 %v543_v34, 0.0  ;;  %v5820_v63 = vadd.f32 %v5758_v29, %v598_v15 }
 0x1b3   : > { %983 = vst.msk [vmem:[#allocation2 + $0x88] sm:$0xf] %vm693_vm2, %v874_v24  ;;  %v829_v28 = vsel %vm5773_vm0, %v827_v16, %v828_v18  ;;  %v830_v30 = vrot.slane %v828_v18, 4  ;;  %v869_v31 = vsel %vm5773_vm0, %v867_v17, %v868_v19  ;;  %v870_v32 = vrot.slane %v868_v19, 4 }
 0x1b4   : > { %960 = vst.msk [vmem:[#allocation2 + $0x2c] sm:$0x1] %vm709_vm6, %v835_v23  ;;  %984 = vst.msk [vmem:[#allocation2 + $0x8c] sm:$0x1] %vm709_vm6, %v875_v25  ;;  %v649_v38 = vmax.f32 %v535_v35, 0.0  ;;  %v652_v39 = vmax.f32 %v546_v36, 0.0  ;;  %v538_v40 = vadd.f32 %v5758_v29, %v537_v26  ;;  %v4577_v41 = vpack.c.bf16 %v651_v37, %v651_v37 }
 0x1b5   : > { %956 = vst.msk [vmem:[#allocation2 + $0x1c] sm:$0xf] %vm693_vm2, %v829_v28  ;;  %980 = vst.msk [vmem:[#allocation2 + $0x7c] sm:$0xf] %vm693_vm2, %v869_v31  ;;  %v1976_v42 = vld [vmem:[#allocation2 + $0x24] sm:$0xe]  ;;  %v5823_v0 = vadd.f32 %v4684_v21, %v5758_v29  ;;  %v5833_v14 = vadd.f32 %v5758_v29, %v5787_v27 }
 0x1b6   : > { %957 = vst.msk [vmem:[#allocation2 + $0x20] sm:$0x1] %vm709_vm6, %v830_v30  ;;  %981 = vst.msk [vmem:[#allocation2 + $0x80] sm:$0x1] %vm709_vm6, %v870_v32  ;;  %v3135_v43 = vld [vmem:[#allocation2 + $0x84] sm:$0xc]  ;;  %v4575_v45 = vpack.c.bf16 %v649_v38, %v649_v38  ;;  %v5808_v46 = vpack.c.bf16 %v652_v39, %v652_v39 }
 0x1b7   : > { %v5806_v44 = vld [vmem:[#allocation2 + $0x24] sm:$0xc]  ;;  %v4383_v49 = vrot.slane %v1976_v42, 9  ;;  %v650_v50 = vmax.f32 %v538_v40, 0.0  ;;  %v4501_v52 = vrot.slane %v3135_v43, 10  ;;  %v841_v53 = vrot.slane %v4577_v41, 7 }
 0x1b8   : > { %v4415_v56 = vrot.slane %v5806_v44, 10  ;;  %v836_v57 = vrot.slane %v4575_v45, 7  ;;  %v843_v58 = vrot.slane %v5808_v46, 7  ;;  %v1973_v20 = vld [vmem:[#allocation2 + $0x18] sm:$0xe]  ;;  %v5848_v34 = vpop.f32.mrb[8].mxu0 }
 0x1b9   : > { %v4896_v47 = vld [vmem:[#allocation2 + $0x24] sm:$0xff]   ;;  %964 = vst.msk [vmem:[#allocation2 + $0x3c] sm:$0xe] %vm954_vm12, %v841_v53  ;;  %v842_v7 = vrot.slane %v841_v53, 4  ;;  %v5829_v13 = vpack.c.bf16 %v650_v50, %v650_v50  ;;  %v4382_v25 = vrot.slane %v1973_v20, 9  ;;  %v5854_v41 = vpop.f32.mrb[9].mxu0 }
 0x1ba   : > { %1910 = vrot.lane.b32.xlu1 %v4896_v47, %s5274_s15  ;;  %v4898_v51 = vld [vmem:[#allocation2 + $0x84] sm:$0xff]   ;;  %961 = vst.msk [vmem:[#allocation2 + $0x30] sm:$0xe] %vm954_vm12, %v836_v57  ;;  %v5827_v12 = vrot.slane %v836_v57, 4  ;;  %v2294_v40 = vld [vmem:[#allocation2 + $0x18] sm:$0xc] }
 0x1bb   : > { %v1977_v59 = vld [vmem:[#allocation2 + $0x28] sm:$0xf]  ;;  %v1978_v60 = vld [vmem:[#allocation2 + $0x2c] sm:$0x1]  ;;  %v1157_v31 = vld [vmem:[#allocation2 + $0x24] sm:$0xe]  ;;  %v844_v33 = vsel %vm5773_vm0, %v842_v7, %v843_v58 }
 0x1bc   : > { %v4897_v48 = vld [vmem:[#allocation2 + $0x18] sm:$0xff]   ;;  %v3136_v61 = vld [vmem:[#allocation2 + $0x88] sm:$0xf]  ;;  %v2078_v1 = vrot.slane %v1977_v59, 5  ;;  %v2081_v2 = vrot.slane %v1978_v60, 5  ;;  %v4305_v44 = vrot.slane %v1157_v31, 9 }
 0x1bd   : > { %1908 = vrot.lane.b32.xlu0 %v4897_v48, %s5274_s15  ;;  %v4899_v55 = vld [vmem:[#allocation2 + $0x78] sm:$0xff]   ;;  %v3137_v3 = vld [vmem:[#allocation2 + $0x8c] sm:$0x3]  ;;  %v3261_v6 = vrot.slane %v3136_v61, 6  ;;  %v4900_v8 = vld [vmem:[#allocation2 + $0x84] sm:$0xff]   ;;  %v5859_v48 = vpop.f32.mrb[10].mxu0 }
 0x1be   : > { %2742 = vrot.lane.b32.xlu1 %v4898_v51, %s5275_s21  ;;  %v3264_v10 = vrot.slane %v3137_v3, 6  ;;  %v2298_v9 = vld [vmem:[#allocation2 + $0x28] sm:$0xf]  ;;  %v2299_v11 = vld [vmem:[#allocation2 + $0x2c] sm:$0x3]  ;;  %v4901_v15 = vld [vmem:[#allocation2 + $0x78] sm:$0xff]   ;;  %v2079_v16 = vsel %vm5706_vm9, %v4383_v49, %v2078_v1 }
 0x1bf   : > { %v2080_v17 = vrot.slane %v2078_v1, 4  ;;  %v3262_v18 = vsel %vm5666_vm5, %v4501_v52, %v3261_v6  ;;  %v3263_v19 = vrot.slane %v3261_v6, 4  ;;  %v1974_v21 = vld [vmem:[#allocation2 + $0x1c] sm:$0xf]  ;;  %v2399_v22 = vrot.slane %v2298_v9, 6 }
 0x1c0   : > { %v2402_v23 = vrot.slane %v2299_v11, 6  ;;  %v1975_v24 = vld [vmem:[#allocation2 + $0x20] sm:$0x1]  ;;  %v2071_v26 = vrot.slane %v1974_v21, 5  ;;  %v1158_v32 = vld [vmem:[#allocation2 + $0x28] sm:$0xf] }
 0x1c1   : > { %2740 = vrot.lane.b32.xlu0 %v4899_v55, %s5275_s21  ;;  %v2082_v27 = vsel %vm5706_vm9, %v2080_v17, %v2081_v2  ;;  %v3265_v28 = vsel %vm5666_vm5, %v3263_v19, %v3264_v10  ;;  %v2074_v30 = vrot.slane %v1975_v24, 5  ;;  %v2400_v37 = vsel %vm5666_vm5, %v4415_v56, %v2399_v22  ;;  %v1159_v39 = vld [vmem:[#allocation2 + $0x2c] sm:$0x1]  ;;  %965 = vst.msk [vmem:[#allocation2 + $0x40] sm:$0xf] %vm693_vm2, %v844_v33  ;;  %v5863_v55 = vpop.f32.mrb[11].mxu0 }
 0x1c2   : > { %1926 = vrot.lane.b32.xlu1 %v4900_v8, %s5274_s15  ;;  %v4399_v35 = vcombine.low %v2079_v16, %v2082_v27  ;;  %v4517_v36 = vcombine.low %v3262_v18, %v3265_v28  ;;  %v2401_v38 = vrot.slane %v2399_v22, 4  ;;  %v2072_v42 = vsel %vm5706_vm9, %v4382_v25, %v2071_v26  ;;  %v2295_v47 = vld [vmem:[#allocation2 + $0x1c] sm:$0xf]  ;;  %v2296_v51 = vld [vmem:[#allocation2 + $0x20] sm:$0x3]  ;;  %v5869_v2 = vpop.f32.mrb[8].mxu1 }
 0x1c3   : > { %v2073_v43 = vrot.slane %v2071_v26, 4  ;;  %v1270_v45 = vrot.slane %v1158_v32, 5  ;;  %v1273_v50 = vrot.slane %v1159_v39, 5  ;;  %v4414_v52 = vrot.slane %v2294_v40, 10  ;;  %v1481_v61 = vld [vmem:[#allocation2 + $0x24] sm:$0xc] }
 0x1c4   : > { %v2403_v49 = vsel %vm5666_vm5, %v2401_v38, %v2402_v23  ;;  %v2392_v53 = vrot.slane %v2295_v47, 6  ;;  %v1482_v1 = vld [vmem:[#allocation2 + $0x28] sm:$0xf]  ;;  %v2395_v8 = vrot.slane %v2296_v51, 6  ;;  %v1483_v10 = vld [vmem:[#allocation2 + $0x2c] sm:$0x3] }
 0x1c5   : > { %1924 = vrot.lane.b32.xlu0 %v4901_v15, %s5274_s15  ;;  %v4431_v56 = vcombine.low %v2400_v37, %v2403_v49  ;;  %v2075_v57 = vsel %vm5706_vm9, %v2073_v43, %v2074_v30  ;;  %v1271_v59 = vsel %vm5706_vm9, %v4305_v44, %v1270_v45  ;;  %v1272_v60 = vrot.slane %v1270_v45, 4  ;;  %v1478_v9 = vld [vmem:[#allocation2 + $0x18] sm:$0xc]  ;;  %v1479_v18 = vld [vmem:[#allocation2 + $0x1c] sm:$0xf]  ;;  %v5880_v19 = vpop.f32.mrb[9].mxu1 }
 0x1c6   : > { %2231 = vrot.lane.b32.xlu1 %v4399_v35, %s5276_s19  ;;  %v4398_v3 = vcombine.low %v2072_v42, %v2075_v57  ;;  %v2393_v6 = vsel %vm5666_vm5, %v4414_v52, %v2392_v53  ;;  %v2394_v7 = vrot.slane %v2392_v53, 4  ;;  %v845_v15 = vrot.slane %v843_v58, 4  ;;  %v1480_v24 = vld [vmem:[#allocation2 + $0x20] sm:$0x3]  ;;  %v2814_v25 = vld [vmem:[#allocation2 + $0x84] sm:$0xe] }
 0x1c7   : > { %v1274_v11 = vsel %vm5706_vm9, %v1272_v60, %v1273_v50  ;;  %v838_v16 = vrot.slane %v5829_v13, 7  ;;  %v4337_v17 = vrot.slane %v1481_v61, 10  ;;  %v1594_v22 = vrot.slane %v1482_v1, 6  ;;  %v2815_v27 = vld [vmem:[#allocation2 + $0x88] sm:$0xf] }
 0x1c8   : > { %v4321_v20 = vcombine.low %v1271_v59, %v1274_v11  ;;  %v2396_v21 = vsel %vm5666_vm5, %v2394_v7, %v2395_v8  ;;  %v1597_v23 = vrot.slane %v1483_v10, 6  ;;  %966 = vst.msk [vmem:[#allocation2 + $0x44] sm:$0x1] %vm709_vm6, %v845_v15  ;;  %v4336_v13 = vrot.slane %v1478_v9, 10  ;;  %v2816_v28 = vld [vmem:[#allocation2 + $0x8c] sm:$0x1] }
 0x1c9   : > { %3384 = vrot.lane.b32.xlu0 %v4517_v36, %s5277_s17  ;;  %v4430_v26 = vcombine.low %v2393_v6, %v2396_v21  ;;  %v839_v46 = vsel %vm5773_vm0, %v5827_v12, %v838_v16  ;;  %v840_v58 = vrot.slane %v838_v16, 4  ;;  %v1595_v30 = vsel %vm5666_vm5, %v4337_v17, %v1594_v22  ;;  %v2811_v35 = vld [vmem:[#allocation2 + $0x78] sm:$0xe]  ;;  %v2812_v39 = vld [vmem:[#allocation2 + $0x7c] sm:$0xf] }
 0x1ca   : > { %2552 = vrot.lane.b32.xlu1 %v4431_v56, %s5278_s9  ;;  %962 = vst.msk [vmem:[#allocation2 + $0x34] sm:$0xf] %vm693_vm2, %v839_v46  ;;  %v1596_v31 = vrot.slane %v1594_v22, 4  ;;  %v1587_v32 = vrot.slane %v1479_v18, 6  ;;  %v1590_v33 = vrot.slane %v1480_v24, 6  ;;  %v667_v12 = vmax.f32 %v5817_v62, 0.0 }
 0x1cb   : > { %963 = vst.msk [vmem:[#allocation2 + $0x38] sm:$0x1] %vm709_vm6, %v840_v58  ;;  %v4469_v36 = vrot.slane %v2814_v25, 9  ;;  %v2940_v37 = vrot.slane %v2815_v27, 5  ;;  %v2943_v38 = vrot.slane %v2816_v28, 5  ;;  %v665_v44 = vmax.f32 %v5820_v63, 0.0 }
 0x1cc   : > { %v1598_v40 = vsel %vm5666_vm5, %v1596_v31, %v1597_v23  ;;  %v1588_v42 = vsel %vm5666_vm5, %v4336_v13, %v1587_v32  ;;  %v1589_v43 = vrot.slane %v1587_v32, 4  ;;  %v2813_v45 = vld [vmem:[#allocation2 + $0x80] sm:$0x1]  ;;  %v4593_v49 = vpack.c.bf16 %v667_v12, %v667_v12  ;;  %v2000_v57 = vld [vmem:[#allocation2 + $0x84] sm:$0xe]  ;;  %v5922_v12 = vpop.f32.mrb[10].mxu1 }
 0x1cd   : > { %2229 = vrot.lane.b32.xlu0 %v4398_v3, %s5276_s19  ;;  %v4353_v47 = vcombine.low %v1595_v30, %v1598_v40  ;;  %v2941_v50 = vsel %vm5706_vm9, %v4469_v36, %v2940_v37  ;;  %v2942_v62 = vrot.slane %v2940_v37, 4  ;;  %v4591_v52 = vpack.c.bf16 %v665_v44, %v665_v44  ;;  %v2001_v59 = vld [vmem:[#allocation2 + $0x88] sm:$0xf]  ;;  %v2002_v3 = vld [vmem:[#allocation2 + $0x8c] sm:$0x1] }
 0x1ce   : > { %1413 = vrot.lane.b32.xlu1 %v4321_v20, %s5273_s18  ;;  %v1591_v51 = vsel %vm5666_vm5, %v1589_v43, %v1590_v33  ;;  %v4468_v53 = vrot.slane %v2811_v35, 9  ;;  %v2933_v56 = vrot.slane %v2812_v39, 5  ;;  %v881_v60 = vrot.slane %v4593_v49, 7  ;;  %v3132_v6 = vld [vmem:[#allocation2 + $0x78] sm:$0xc] }
 0x1cf   : > { %v4352_v63 = vcombine.low %v1588_v42, %v1591_v51  ;;  %v2944_v61 = vsel %vm5706_vm9, %v2942_v62, %v2943_v38  ;;  %v2936_v1 = vrot.slane %v2813_v45, 5  ;;  %v876_v8 = vrot.slane %v4591_v52, 7  ;;  %v3133_v11 = vld [vmem:[#allocation2 + $0x7c] sm:$0xf]  ;;  %v3134_v15 = vld [vmem:[#allocation2 + $0x80] sm:$0x3] }
 0x1d0   : > { %v4485_v7 = vcombine.low %v2941_v50, %v2944_v61  ;;  %v2934_v10 = vsel %vm5706_vm9, %v4468_v53, %v2933_v56  ;;  %v2935_v9 = vrot.slane %v2933_v56, 4  ;;  %v882_v16 = vrot.slane %v881_v60, 4  ;;  %988 = vst.msk [vmem:[#allocation2 + $0x9c] sm:$0xe] %vm954_vm12, %v881_v60  ;;  %v2321_v21 = vld [vmem:[#allocation2 + $0x84] sm:$0xc] }
 0x1d1   : > { %2550 = vrot.lane.b32.xlu0 %v4430_v26, %s5278_s9  ;;  %v668_v17 = vmax.f32 %v5823_v0, 0.0  ;;  %v666_v18 = vmax.f32 %v5833_v14, 0.0  ;;  %v4391_v20 = vrot.slane %v2000_v57, 9  ;;  %v877_v22 = vrot.slane %v876_v8, 4  ;;  %985 = vst.msk [vmem:[#allocation2 + $0x90] sm:$0xe] %vm954_vm12, %v876_v8 }
 0x1d2   : > { %1737 = vrot.lane.b32.xlu1 %v4353_v47, %s5272_s8  ;;  %v2937_v23 = vsel %vm5706_vm9, %v2935_v9, %v2936_v1  ;;  %v2134_v24 = vrot.slane %v2001_v59, 5  ;;  %v2137_v25 = vrot.slane %v2002_v3, 5  ;;  %v2322_v26 = vld [vmem:[#allocation2 + $0x88] sm:$0xf]  ;;  %v4500_v13 = vrot.slane %v3132_v6, 10  ;;  %v5940_v6 = vpop.f32.mrb[11].mxu1 }
 0x1d3   : > { %v4484_v46 = vcombine.low %v2934_v10, %v2937_v23  ;;  %v4594_v58 = vpack.c.bf16 %v668_v17, %v668_v17  ;;  %v4592_v0 = vpack.c.bf16 %v666_v18, %v666_v18  ;;  %v2323_v14 = vld [vmem:[#allocation2 + $0x8c] sm:$0x3]  ;;  %v3254_v30 = vrot.slane %v3133_v11, 6  ;;  %v1997_v32 = vld [vmem:[#allocation2 + $0x78] sm:$0xe] }
 0x1d4   : > { %v2135_v27 = vsel %vm5706_vm9, %v4391_v20, %v2134_v24  ;;  %v2136_v28 = vrot.slane %v2134_v24, 4  ;;  %v3257_v31 = vrot.slane %v3134_v15, 6  ;;  %v1998_v33 = vld [vmem:[#allocation2 + $0x7c] sm:$0xf]  ;;  %v5920_v35 = vld [vmem:[#allocation2 + $0x80] sm:$0x1] }
 0x1d5   : > { %1735 = vrot.lane.b32.xlu0 %v4352_v63, %s5272_s8  ;;  %v883_v36 = vrot.slane %v4594_v58, 7  ;;  %v878_v37 = vrot.slane %v4592_v0, 7  ;;  %v4423_v38 = vrot.slane %v2321_v21, 10  ;;  %v2455_v39 = vrot.slane %v2322_v26, 6  ;;  %v1181_v40 = vld [vmem:[#allocation2 + $0x84] sm:$0xe] }
 0x1d6   : > { %v1182_v42 = vld [vmem:[#allocation2 + $0x88] sm:$0xf]  ;;  %3063 = vrot.lane.b32.xlu1 %v4485_v7, %s5279_s12  ;;  %v2138_v43 = vsel %vm5706_vm9, %v2136_v28, %v2137_v25  ;;  %v3255_v44 = vsel %vm5666_vm5, %v4500_v13, %v3254_v30  ;;  %v3256_v45 = vrot.slane %v3254_v30, 4  ;;  %v2458_v47 = vrot.slane %v2323_v14, 6  ;;  %v1183_v49 = vld [vmem:[#allocation2 + $0x8c] sm:$0x1] }
 0x1d7   : > { %v2318_v50 = vld [vmem:[#allocation2 + $0x78] sm:$0xc]  ;;  %v884_v62 = vsel %vm5773_vm0, %v882_v16, %v883_v36  ;;  %v885_v51 = vrot.slane %v883_v36, 4  ;;  %v879_v52 = vsel %vm5773_vm0, %v877_v22, %v878_v37  ;;  %v880_v53 = vrot.slane %v878_v37, 4  ;;  %v2319_v56 = vld [vmem:[#allocation2 + $0x7c] sm:$0xf] }
 0x1d8   : > { %v2320_v57 = vld [vmem:[#allocation2 + $0x80] sm:$0x3]  ;;  %989 = vst.msk [vmem:[#allocation2 + $0xa0] sm:$0xf] %vm693_vm2, %v884_v62  ;;  %986 = vst.msk [vmem:[#allocation2 + $0x94] sm:$0xf] %vm693_vm2, %v879_v52  ;;  %v4407_v59 = vcombine.low %v2135_v27, %v2138_v43  ;;  %v3258_v63 = vsel %vm5666_vm5, %v3256_v45, %v3257_v31  ;;  %v2456_v60 = vsel %vm5666_vm5, %v4423_v38, %v2455_v39 }
 0x1d9   : > { %3061 = vrot.lane.b32.xlu0 %v4484_v46, %s5279_s12  ;;  %v2457_v61 = vrot.slane %v2455_v39, 4  ;;  %v1505_v1 = vld [vmem:[#allocation2 + $0x84] sm:$0xc]  ;;  %v1506_v3 = vld [vmem:[#allocation2 + $0x88] sm:$0xf]  ;;  %v4516_v7 = vcombine.low %v3255_v44, %v3258_v63  ;;  %v4390_v8 = vrot.slane %v1997_v32, 9 }
 0x1da   : > { %990 = vst.msk [vmem:[#allocation2 + $0xa4] sm:$0x1] %vm709_vm6, %v885_v51  ;;  %987 = vst.msk [vmem:[#allocation2 + $0x98] sm:$0x1] %vm709_vm6, %v880_v53  ;;  %v2127_v10 = vrot.slane %v1998_v33, 5  ;;  %v2130_v9 = vrot.slane %v5920_v35, 5  ;;  %2247 = vrot.lane.b32.xlu1 %v4407_v59, %s5276_s19 }
 0x1db   : > { %v1507_v11 = vld [vmem:[#allocation2 + $0x8c] sm:$0x3]  ;;  %v4920_v15 = vld [vmem:[#allocation2 + $0x24] sm:$0xff]   ;;  %v2459_v16 = vsel %vm5666_vm5, %v2457_v61, %v2458_v47  ;;  %v4313_v17 = vrot.slane %v1181_v40, 9  ;;  %v1326_v18 = vrot.slane %v1182_v42, 5  ;;  %v1329_v20 = vrot.slane %v1183_v49, 5 }
 0x1dc   : > { %v1502_v21 = vld [vmem:[#allocation2 + $0x78] sm:$0xc]  ;;  %v5948_v22 = vpop.f32.mrb[12].mxu0  ;;  %v4439_v23 = vcombine.low %v2456_v60, %v2459_v16  ;;  %v2128_v24 = vsel %vm5706_vm9, %v4390_v8, %v2127_v10  ;;  %v2129_v25 = vrot.slane %v2127_v10, 4  ;;  %v4422_v26 = vrot.slane %v2318_v50, 10  ;;  %1135 = vst.msk [vmem:[#allocation3 + $0x18] sm:$0xff] %vm1131_vm11, %v4920_v15 }
 0x1dd   : > { %3382 = vrot.lane.b32.xlu0 %v4516_v7, %s5277_s17  ;;  %v1503_v46 = vld [vmem:[#allocation2 + $0x7c] sm:$0xf]  ;;  %v1504_v58 = vld [vmem:[#allocation2 + $0x80] sm:$0x3]  ;;  %v1327_v0 = vsel %vm5706_vm9, %v4313_v17, %v1326_v18  ;;  %v1328_v13 = vrot.slane %v1326_v18, 4  ;;  %v2448_v14 = vrot.slane %v2319_v56, 6 }
 0x1de   : > { %v2451_v27 = vrot.slane %v2320_v57, 6  ;;  %v1155_v28 = vld [vmem:[#allocation2 + $0x1c] sm:$0xf]  ;;  %v5956_v30 = vpop.f32.mrb[13].mxu0  ;;  %v2131_v31 = vsel %vm5706_vm9, %v2129_v25, %v2130_v9  ;;  %v4345_v32 = vrot.slane %v1505_v1, 10  ;;  %v1650_v33 = vrot.slane %v1506_v3, 6  ;;  %2568 = vrot.lane.b32.xlu1 %v4439_v23, %s5278_s9 }
 0x1df   : > { %v1653_v35 = vrot.slane %v1507_v11, 6  ;;  %v1156_v36 = vld [vmem:[#allocation2 + $0x20] sm:$0x1]  ;;  %v5960_v37 = vpop.f32.mrb[14].mxu0  ;;  %v4406_v38 = vcombine.low %v2128_v24, %v2131_v31  ;;  %v1330_v39 = vsel %vm5706_vm9, %v1328_v13, %v1329_v20  ;;  %v2450_v40 = vrot.slane %v2448_v14, 4  ;;  %v4902_v25 = vld [vmem:[#allocation2 + $0x30] sm:$0xff]  }
 0x1e0   : > { %v5965_v42 = vpop.f32.mrb[15].mxu0  ;;  %v2449_v43 = vsel %vm5666_vm5, %v4422_v26, %v2448_v14  ;;  %v1652_v44 = vrot.slane %v1650_v33, 4  ;;  %v4344_v45 = vrot.slane %v1502_v21, 10  ;;  %v1154_v47 = vld [vmem:[#allocation2 + $0x18] sm:$0xe]  ;;  %v4329_v49 = vcombine.low %v1327_v0, %v1330_v39 }
 0x1e1   : > { %2245 = vrot.lane.b32.xlu0 %v4406_v38, %s5276_s19  ;;  %v2452_v50 = vsel %vm5666_vm5, %v2450_v40, %v2451_v27  ;;  %v1643_v62 = vrot.slane %v1503_v46, 6  ;;  %v1646_v51 = vrot.slane %v1504_v58, 6  ;;  %v1179_v52 = vld [vmem:[#allocation2 + $0x7c] sm:$0xf]  ;;  %v1180_v53 = vld [vmem:[#allocation2 + $0x80] sm:$0x1]  ;;  %v1651_v56 = vsel %vm5666_vm5, %v4345_v32, %v1650_v33 }
 0x1e2   : > { %v1654_v57 = vsel %vm5666_vm5, %v1652_v44, %v1653_v35  ;;  %v1263_v59 = vrot.slane %v1155_v28, 5  ;;  %v1266_v63 = vrot.slane %v1156_v36, 5  ;;  %1429 = vrot.lane.b32.xlu1 %v4329_v49, %s5273_s18  ;;  %v4438_v60 = vcombine.low %v2449_v43, %v2452_v50  ;;  %v1178_v1 = vld [vmem:[#allocation2 + $0x78] sm:$0xe]  ;;  %v3118_v23 = vld [vmem:[#allocation2 + $0x40] sm:$0xf] }
 0x1e3   : > { %v1645_v61 = vrot.slane %v1643_v62, 4  ;;  %v4304_v3 = vrot.slane %v1154_v47, 9  ;;  %v1319_v8 = vrot.slane %v1179_v52, 5  ;;  %v4361_v10 = vcombine.low %v1651_v56, %v1654_v57  ;;  %v3117_v46 = vld [vmem:[#allocation2 + $0x3c] sm:$0xc]  ;;  %v5991_v28 = vpop.f32.mrb[12].mxu1 }
 0x1e4   : > { %v1265_v7 = vrot.slane %v1263_v59, 4  ;;  %v1644_v11 = vsel %vm5666_vm5, %v4344_v45, %v1643_v62  ;;  %v1322_v17 = vrot.slane %v1180_v53, 5  ;;  %v4312_v21 = vrot.slane %v1178_v1, 9  ;;  %v3142_v0 = vld [vmem:[#allocation2 + $0xa0] sm:$0xf]  ;;  %v5996_v47 = vpop.f32.mrb[13].mxu1 }
 0x1e5   : > { %2566 = vrot.lane.b32.xlu0 %v4438_v60, %s5278_s9  ;;  %v1647_v9 = vsel %vm5666_vm5, %v1645_v61, %v1646_v51  ;;  %v1321_v16 = vrot.slane %v1319_v8, 4  ;;  %v1264_v20 = vsel %vm5706_vm9, %v4304_v3, %v1263_v59  ;;  %v3219_v58 = vrot.slane %v3118_v23, 6  ;;  %v3119_v13 = vld [vmem:[#allocation2 + $0x44] sm:$0x3]  ;;  %v3141_v14 = vld [vmem:[#allocation2 + $0x9c] sm:$0xc] }
 0x1e6   : > { %v1267_v15 = vsel %vm5706_vm9, %v1265_v7, %v1266_v63  ;;  %1753 = vrot.lane.b32.xlu1 %v4361_v10, %s5272_s8  ;;  %v4360_v18 = vcombine.low %v1644_v11, %v1647_v9  ;;  %v3275_v27 = vrot.slane %v3142_v0, 6  ;;  %v1320_v31 = vsel %vm5706_vm9, %v4312_v21, %v1319_v8  ;;  %v3143_v32 = vld [vmem:[#allocation2 + $0xa4] sm:$0x3]  ;;  %v2796_v33 = vld [vmem:[#allocation2 + $0x3c] sm:$0xe]  ;;  %v4903_v49 = vld [vmem:[#allocation2 + $0x30] sm:$0xff]  }
 0x1e7   : > { %v4320_v24 = vcombine.low %v1264_v20, %v1267_v15  ;;  %v1323_v26 = vsel %vm5706_vm9, %v1321_v16, %v1322_v17  ;;  %v2797_v35 = vld [vmem:[#allocation2 + $0x40] sm:$0xf]  ;;  %v2798_v38 = vld [vmem:[#allocation2 + $0x44] sm:$0x1]  ;;  %v2794_v40 = vld [vmem:[#allocation2 + $0x34] sm:$0xf]  ;;  %v559_v7 = vadd.f32 %v5848_v34, %v5758_v29  ;;  %v6014_v8 = vadd.f32 %v5758_v29, %v5854_v41 }
 0x1e8   : > { %v4328_v36 = vcombine.low %v1320_v31, %v1323_v26  ;;  %v2898_v39 = vrot.slane %v2797_v35, 5  ;;  %v4495_v43 = vrot.slane %v3117_v46, 10  ;;  %v3221_v44 = vrot.slane %v3219_v58, 4  ;;  %v2793_v57 = vld [vmem:[#allocation2 + $0x30] sm:$0xe]  ;;  %v4904_v63 = vld [vmem:[#allocation2 + $0x3c] sm:$0xff]  }
 0x1e9   : > { %1751 = vrot.lane.b32.xlu0 %v4360_v18, %s5272_s8  ;;  %v3222_v45 = vrot.slane %v3119_v13, 6  ;;  %v4503_v50 = vrot.slane %v3141_v14, 10  ;;  %v3277_v62 = vrot.slane %v3275_v27, 4  ;;  %v3278_v51 = vrot.slane %v3143_v32, 6  ;;  %v2795_v60 = vld [vmem:[#allocation2 + $0x38] sm:$0x1] }
 0x1ea   : > { %1411 = vrot.lane.b32.xlu1 %v4320_v24, %s5273_s18  ;;  %v4463_v52 = vrot.slane %v2796_v33, 9  ;;  %v2900_v53 = vrot.slane %v2898_v39, 4  ;;  %v2901_v56 = vrot.slane %v2798_v38, 5  ;;  %v2891_v59 = vrot.slane %v2794_v40, 5  ;;  %v6000_v61 = vld [vmem:[#allocation2 + $0x40] sm:$0xf] }
 0x1eb   : > { %v6004_v1 = vsel %vm5666_vm5, %v4495_v43, %v3219_v58  ;;  %v6008_v3 = vsel %vm5666_vm5, %v3221_v44, %v3222_v45  ;;  %v4905_v10 = vld [vmem:[#allocation2 + $0x90] sm:$0xff]   ;;  %v4906_v9 = vld [vmem:[#allocation2 + $0x3c] sm:$0xff]   ;;  %v6019_v11 = vsel %vm5666_vm5, %v4503_v50, %v3275_v27  ;;  %v6023_v15 = vsel %vm5666_vm5, %v3277_v62, %v3278_v51  ;;  %v6033_v23 = vld [vmem:[#allocation2 + $0x44] sm:$0x1] }
 0x1ec   : > { %v6027_v16 = vsel %vm5706_vm9, %v4463_v52, %v2898_v39  ;;  %v4462_v34 = vrot.slane %v2793_v57, 9  ;;  %v1982_v17 = vld [vmem:[#allocation2 + $0x3c] sm:$0xe]  ;;  %v3115_v41 = vld [vmem:[#allocation2 + $0x34] sm:$0xf]  ;;  %v6031_v18 = vsel %vm5706_vm9, %v2900_v53, %v2901_v56  ;;  %v2893_v20 = vrot.slane %v2891_v59, 4 }
 0x1ed   : > { %2728 = vrot.lane.b32.xlu0 %v4902_v25, %s5275_s21  ;;  %v2894_v21 = vrot.slane %v2795_v60, 5  ;;  %v2092_v24 = vrot.slane %v6000_v61, 5  ;;  %v6036_v25 = vpop.f32.mrb[14].mxu1  ;;  %v4907_v26 = vld [vmem:[#allocation2 + $0x90] sm:$0xff]   ;;  %v6039_v58 = vld [vmem:[#allocation2 + $0x38] sm:$0x3]  ;;  %v6043_v0 = vadd.f32 %v5859_v48, %v5758_v29  ;;  %v6047_v13 = vadd.f32 %v5758_v29, %v5863_v55 }
 0x1ee   : > { %1427 = vrot.lane.b32.xlu1 %v4328_v36, %s5273_s18  ;;  %v3114_v46 = vld [vmem:[#allocation2 + $0x30] sm:$0xc]  ;;  %v6051_v14 = vadd.f32 %v5869_v2, %v5758_v29  ;;  %v6055_v27 = vadd.f32 %v5758_v29, %v5880_v19  ;;  %v4921_v31 = vld [vmem:[#allocation2 + $0x84] sm:$0xff]   ;;  %v4511_v32 = vcombine.low %v6004_v1, %v6008_v3  ;;  %v4519_v48 = vcombine.low %v6019_v11, %v6023_v15  ;;  %v6061_v35 = vld [vmem:[#allocation2 + $0x40] sm:$0xf]  ;;  %v6069_v36 = vpop.f32.mrb[15].mxu1 }
 0x1ef   : > { %v3212_v33 = vrot.slane %v3115_v41, 6  ;;  %v6063_v55 = vld [vmem:[#allocation2 + $0x34] sm:$0xf]  ;;  %v6067_v2 = vadd.f32 %v5922_v12, %v5758_v29  ;;  %v4479_v19 = vcombine.low %v6027_v16, %v6031_v18  ;;  %v6076_v38 = vsel %vm5706_vm9, %v4462_v34, %v2891_v59  ;;  %v6079_v43 = vld [vmem:[#allocation2 + $0x3c] sm:$0xc]  ;;  %1143 = vst.msk [vmem:[#allocation3 + $0x58] sm:$0xff] %vm1131_vm11, %v4921_v31 }
 0x1f0   : > { %v4385_v39 = vrot.slane %v1982_v17, 9  ;;  %v2095_v40 = vrot.slane %v6033_v23, 5  ;;  %v6081_v44 = vld [vmem:[#allocation2 + $0x44] sm:$0x3]  ;;  %v6086_v29 = vsel %vm5706_vm9, %v2893_v20, %v2894_v21  ;;  %v2094_v12 = vrot.slane %v2092_v24, 4  ;;  %v4922_v62 = vld [vmem:[#allocation2 + $0x18] sm:$0xff]  }
 0x1f1   : > { %1912 = vrot.lane.b32.xlu0 %v4903_v49, %s5274_s15  ;;  %v4494_v45 = vrot.slane %v3114_v46, 10  ;;  %v655_v49 = vmax.f32 %v559_v7, 0.0  ;;  %v6088_v50 = vld [vmem:[#allocation2 + $0x40] sm:$0xf]  ;;  %v3215_v52 = vrot.slane %v6039_v58, 6  ;;  %v2413_v53 = vrot.slane %v6061_v35, 6 }
 0x1f2   : > { %2730 = vrot.lane.b32.xlu1 %v4904_v63, %s5275_s21  ;;  %v4908_v51 = vld [vmem:[#allocation2 + $0x9c] sm:$0xff]   ;;  %v2085_v56 = vrot.slane %v6063_v55, 5  ;;  %v653_v57 = vmax.f32 %v6014_v8, 0.0  ;;  %v3214_v59 = vrot.slane %v3212_v33, 4  ;;  %v4417_v63 = vrot.slane %v6079_v43, 10  ;;  %1134 = vst.msk [vmem:[#allocation3 + $0x10] sm:$0xff] %vm1131_vm11, %v4922_v62 }
 0x1f3   : > { %v2416_v60 = vrot.slane %v6081_v44, 6  ;;  %v1979_v61 = vld [vmem:[#allocation2 + $0x30] sm:$0xe]  ;;  %v4581_v1 = vpack.c.bf16 %v655_v49, %v655_v49  ;;  %v4923_v3 = vld [vmem:[#allocation2 + $0x78] sm:$0xff]   ;;  %v4478_v7 = vcombine.low %v6076_v38, %v6086_v29  ;;  %v1284_v34 = vrot.slane %v6088_v50, 5  ;;  %v4932_v62 = vld [vmem:[#allocation10 + $0x10] sm:$0xff]  }
 0x1f4   : > { %v1981_v8 = vld [vmem:[#allocation2 + $0x38] sm:$0x1]  ;;  %v4579_v17 = vpack.c.bf16 %v653_v57, %v653_v57  ;;  %v6108_v20 = vsel %vm5666_vm5, %v4494_v45, %v3212_v33  ;;  %v1165_v23 = vld [vmem:[#allocation2 + $0x44] sm:$0x1]  ;;  %v654_v46 = vmax.f32 %v6047_v13, 0.0  ;;  %1142 = vst.msk [vmem:[#allocation3 + $0x50] sm:$0xff] %vm1131_vm11, %v4923_v3  ;;  %v6123_v57 = vsel %vm5666_vm5, %v3214_v59, %v3215_v52 }
 0x1f5   : > { %2744 = vrot.lane.b32.xlu0 %v4905_v10, %s5275_s21  ;;  %v6103_v10 = vsel %vm5706_vm9, %v4385_v39, %v2092_v24  ;;  %v4928_v41 = vld [vmem:[#allocation10] sm:$0xff]   ;;  %v851_v21 = vrot.slane %v4581_v1, 7  ;;  %v4931_v24 = vld [vmem:[#allocation10 + $0x8] sm:$0xff]   ;;  %v2415_v31 = vrot.slane %v2413_v53, 4  ;;  %v4384_v35 = vrot.slane %v1979_v61, 9  ;;  %v4933_v18 = vld [vmem:[#allocation10 + $0x18] sm:$0xff]  }
 0x1f6   : > { %1914 = vrot.lane.b32.xlu1 %v4906_v9, %s5274_s15  ;;  %v1163_v9 = vld [vmem:[#allocation2 + $0x3c] sm:$0xe]  ;;  %v2087_v55 = vrot.slane %v2085_v56, 4  ;;  %v846_v39 = vrot.slane %v4579_v17, 7  ;;  %4693 = vmatprep.subr.bf16.mxu1 %v4928_v41  ;;  %v2088_v43 = vrot.slane %v1981_v8, 5  ;;  %v4580_v45 = vpack.c.bf16 %v654_v46, %v654_v46 }
 0x1f7   : > { %v4909_v58 = vld [vmem:[#allocation2 + $0x9c] sm:$0xff]   ;;  %v852_v33 = vrot.slane %v851_v21, 4  ;;  %970 = vst.msk [vmem:[#allocation2 + $0x54] sm:$0xe] %vm954_vm12, %v851_v21  ;;  %v6115_v44 = vld [vmem:[#allocation2 + $0x34] sm:$0xf]  ;;  %4694 = vmatpush3.bf16.msra.mxu1 %v4928_v41  ;;  %v6131_v3 = vsel %vm5666_vm5, %v4417_v63, %v2413_v53  ;;  %v6135_v8 = vsel %vm5666_vm5, %v2415_v31, %v2416_v60 }
 0x1f8   : > { %v4307_v13 = vrot.slane %v1163_v9, 9  ;;  %v1286_v49 = vrot.slane %v1284_v34, 4  ;;  %v847_v50 = vrot.slane %v846_v39, 4  ;;  %967 = vst.msk [vmem:[#allocation2 + $0x48] sm:$0xe] %vm954_vm12, %v846_v39  ;;  %4695 = vmatprep.subr.bf16.mxu1 %v4931_v24  ;;  %v848_v1 = vrot.slane %v4580_v45, 7 }
 0x1f9   : > { %1928 = vrot.lane.b32.xlu0 %v4907_v26, %s5274_s15  ;;  %v656_v26 = vmax.f32 %v6043_v0, 0.0  ;;  %v6142_v52 = vld [vmem:[#allocation2 + $0x40] sm:$0xf]  ;;  %v2300_v9 = vld [vmem:[#allocation2 + $0x30] sm:$0xc]  ;;  %v671_v16 = vmax.f32 %v6051_v14, 0.0 }
 0x1fa   : > { %2746 = vrot.lane.b32.xlu1 %v4908_v51, %s5275_s21  ;;  %v2096_v51 = vsel %vm5706_vm9, %v2094_v12, %v2095_v40  ;;  %v6139_v40 = vsel %vm5706_vm9, %v4384_v35, %v2085_v56  ;;  %v2406_v12 = vrot.slane %v6115_v44, 6  ;;  %v4935_v59 = vld [vmem:[#allocation2 + $0x3c] sm:$0xff]   ;;  %v850_v53 = vrot.slane %v848_v1, 4  ;;  %v2302_v17 = vld [vmem:[#allocation2 + $0x38] sm:$0x3]  ;;  %v4940_v44 = vld [vmem:[#allocation2 + $0x30] sm:$0xff]  }
 0x1fb   : > { %v4582_v0 = vpack.c.bf16 %v656_v26, %v656_v26  ;;  %4696 = vmatpush3.bf16.msra.mxu1 %v4931_v24  ;;  %v6154_v56 = vsel %vm5706_vm9, %v2087_v55, %v2088_v43  ;;  %v6158_v63 = vsel %vm5706_vm9, %v4307_v13, %v1284_v34  ;;  %1137 = vst.msk [vmem:[#allocation3 + $0x28] sm:$0xff] %vm1131_vm11, %v4935_v59  ;;  %v1487_v41 = vld [vmem:[#allocation2 + $0x3c] sm:$0xc]  ;;  %v1608_v21 = vrot.slane %v6142_v52, 6  ;;  %v1489_v46 = vld [vmem:[#allocation2 + $0x44] sm:$0x3] }
 0x1fc   : > { %4697 = vmatprep.subr.bf16.mxu1 %v4932_v62  ;;  %v4510_v34 = vcombine.low %v6108_v20, %v6123_v57  ;;  %969 = vst.msk [vmem:[#allocation2 + $0x50] sm:$0x1] %vm709_vm6, %v850_v53  ;;  %v4937_v26 = vld [vmem:[#allocation2 + $0x9c] sm:$0xff]   ;;  %v4416_v20 = vrot.slane %v2300_v9, 10  ;;  %v6184_v24 = vld [vmem:[#allocation2 + $0x34] sm:$0xf]  ;;  %v4400_v35 = vcombine.low %v6139_v40, %v6154_v56 }
 0x1fd   : > { %3372 = vrot.lane.b32.xlu0 %v4511_v32, %s5277_s17  ;;  %v1287_v32 = vrot.slane %v1165_v23, 5  ;;  %v853_v61 = vrot.slane %v4582_v0, 7  ;;  %v6174_v23 = vld [vmem:[#allocation9] ss:$0 sm:$0xff]  ;;  %v669_v31 = vmax.f32 %v6055_v27, 0.0  ;;  %v2408_v55 = vrot.slane %v2406_v12, 4 }
 0x1fe   : > { %1930 = vrot.lane.b32.xlu1 %v4909_v58, %s5274_s15  ;;  %v618_v14 = vadd.f32 %v6174_v23, %v5940_v6  ;;  %v4597_v58 = vpack.c.bf16 %v671_v16, %v671_v16  ;;  %v2409_v39 = vrot.slane %v2302_v17, 6  ;;  %v6191_v38 = vld [vmem:[#allocation2 + $0x30] sm:$0xc]  ;;  %1145 = vst.msk [vmem:[#allocation3 + $0x68] sm:$0xff] %vm1131_vm11, %v4937_v26  ;;  %v4339_v29 = vrot.slane %v1487_v41, 10  ;;  %1136 = vst.msk [vmem:[#allocation3 + $0x20] sm:$0xff] %vm1131_vm11, %v4940_v44 }
 0x1ff   : > { %v854_v11 = vsel %vm5773_vm0, %v852_v33, %v853_v61  ;;  %v855_v15 = vrot.slane %v853_v61, 4  ;;  %v6162_v60 = vsel %vm5706_vm9, %v1286_v49, %v1287_v32  ;;  %4698 = vmatpush3.bf16.msra.mxu1 %v4932_v62  ;;  %v6195_v43 = vld [vmem:[#allocation2 + $0xa0] sm:$0xf]  ;;  %v4595_v27 = vpack.c.bf16 %v669_v31, %v669_v31  ;;  %v6199_v49 = vld [vmem:[#allocation2 + $0x94] sm:$0xf] }
 0x200   : > { %971 = vst.msk [vmem:[#allocation2 + $0x58] sm:$0xf] %vm693_vm2, %v854_v11  ;;  %v4323_v6 = vcombine.low %v6158_v63, %v6162_v60  ;;  %v672_v33 = vmax.f32 %v6067_v2, 0.0  ;;  %4699 = vmatprep.subr.bf16.mxu1 %v4933_v18  ;;  %v1610_v0 = vrot.slane %v1608_v21, 4  ;;  %v1611_v45 = vrot.slane %v1489_v46, 6 }
 0x201   : > { %3388 = vrot.lane.b32.xlu0 %v4519_v48, %s5277_s17  ;;  %v849_v48 = vsel %vm5773_vm0, %v847_v50, %v848_v1  ;;  %972 = vst.msk [vmem:[#allocation2 + $0x5c] sm:$0x1] %vm709_vm6, %v855_v15  ;;  %v1601_v13 = vrot.slane %v6184_v24, 6  ;;  %v670_v32 = vmax.f32 %v618_v14, 0.0  ;;  %v2407_v50 = vsel %vm5666_vm5, %v4416_v20, %v2406_v12  ;;  %v1486_v62 = vld [vmem:[#allocation2 + $0x38] sm:$0x3] }
 0x202   : > { %3051 = vrot.lane.b32.xlu1 %v4479_v19, %s5279_s12  ;;  %968 = vst.msk [vmem:[#allocation2 + $0x4c] sm:$0xf] %vm693_vm2, %v849_v48  ;;  %v4401_v19 = vcombine.low %v6103_v10, %v2096_v51  ;;  %v4433_v10 = vcombine.low %v6131_v3, %v6135_v8  ;;  %v2820_v57 = vld [vmem:[#allocation2 + $0x9c] sm:$0xe]  ;;  %v886_v2 = vrot.slane %v4595_v27, 7  ;;  %v4598_v61 = vpack.c.bf16 %v672_v33, %v672_v33 }
 0x203   : > { %v2410_v1 = vsel %vm5666_vm5, %v2408_v55, %v2409_v39  ;;  %v4338_v3 = vrot.slane %v6191_v38, 10  ;;  %v2822_v8 = vld [vmem:[#allocation2 + $0xa4] sm:$0x1]  ;;  %v2954_v40 = vrot.slane %v6195_v43, 5  ;;  %v2817_v52 = vld [vmem:[#allocation2 + $0x90] sm:$0xe]  ;;  %v4596_v59 = vpack.c.bf16 %v670_v32, %v670_v32  ;;  %4700 = vmatpush3.bf16.msra.mxu1 %v4933_v18 }
 0x204   : > { %v1609_v12 = vsel %vm5666_vm5, %v4339_v29, %v1608_v21  ;;  %v887_v9 = vrot.slane %v886_v2, 4  ;;  %991 = vst.msk [vmem:[#allocation2 + $0xa8] sm:$0xe] %vm954_vm12, %v886_v2  ;;  %v2947_v11 = vrot.slane %v6199_v49, 5  ;;  %v893_v15 = vrot.slane %v4598_v61, 7 }
 0x205   : > { %3049 = vrot.lane.b32.xlu0 %v4478_v7, %s5279_s12  ;;  %v891_v7 = vrot.slane %v4597_v58, 7  ;;  %v6215_v48 = vld [vmem:[#allocation2 + $0xa0] sm:$0xf]  ;;  %v1612_v53 = vsel %vm5666_vm5, %v1610_v0, %v1611_v45  ;;  %v1603_v56 = vrot.slane %v1601_v13, 4  ;;  %v1604_v63 = vrot.slane %v1486_v62, 6 }
 0x206   : > { %2235 = vrot.lane.b32.xlu1 %v4401_v19, %s5276_s19  ;;  %v2819_v60 = vld [vmem:[#allocation2 + $0x98] sm:$0x1]  ;;  %v888_v17 = vrot.slane %v4596_v59, 7  ;;  %v4471_v16 = vrot.slane %v2820_v57, 9  ;;  %v2957_v18 = vrot.slane %v2822_v8, 5  ;;  %v2956_v26 = vrot.slane %v2954_v40, 4 }
 0x207   : > { %v892_v51 = vrot.slane %v891_v7, 4  ;;  %994 = vst.msk [vmem:[#allocation2 + $0xb4] sm:$0xe] %vm954_vm12, %v891_v7  ;;  %v2006_v41 = vld [vmem:[#allocation2 + $0x9c] sm:$0xe]  ;;  %v2148_v46 = vrot.slane %v6215_v48, 5  ;;  %v4432_v58 = vcombine.low %v2407_v50, %v2410_v1  ;;  %v1602_v38 = vsel %vm5666_vm5, %v4338_v3, %v1601_v13 }
 0x208   : > { %v2008_v21 = vld [vmem:[#allocation2 + $0xa4] sm:$0x1]  ;;  %v6222_v14 = vld [vmem:[#allocation2 + $0x94] sm:$0xf]  ;;  %v890_v20 = vrot.slane %v888_v17, 4  ;;  %v4470_v31 = vrot.slane %v2817_v52, 9  ;;  %v1605_v29 = vsel %vm5666_vm5, %v1603_v56, %v1604_v63  ;;  %v4355_v27 = vcombine.low %v1609_v12, %v1612_v53 }
 0x209   : > { %3370 = vrot.lane.b32.xlu0 %v4510_v34, %s5277_s17  ;;  %v894_v19 = vsel %vm5773_vm0, %v892_v51, %v893_v15  ;;  %v895_v34 = vrot.slane %v893_v15, 4  ;;  %v6228_v24 = vld [vmem:[#allocation2 + $0xa0] sm:$0xf]  ;;  %v2950_v55 = vrot.slane %v2819_v60, 5  ;;  %v3138_v39 = vld [vmem:[#allocation2 + $0x90] sm:$0xc]  ;;  %v2955_v33 = vsel %vm5706_vm9, %v4471_v16, %v2954_v40 }
 0x20a   : > { %2556 = vrot.lane.b32.xlu1 %v4433_v10, %s5278_s9  ;;  %995 = vst.msk [vmem:[#allocation2 + $0xb8] sm:$0xf] %vm693_vm2, %v894_v19  ;;  %v889_v10 = vsel %vm5773_vm0, %v887_v9, %v888_v17  ;;  %v3140_v7 = vld [vmem:[#allocation2 + $0x98] sm:$0x3]  ;;  %v2327_v43 = vld [vmem:[#allocation2 + $0x9c] sm:$0xc]  ;;  %v2958_v13 = vsel %vm5706_vm9, %v2956_v26, %v2957_v18  ;;  %v4354_v57 = vcombine.low %v1602_v38, %v1605_v29  ;;  %v1732_v9 = vpop.permute.xlu1 %1731 }
 0x20b   : > { %996 = vst.msk [vmem:[#allocation2 + $0xbc] sm:$0x1] %vm709_vm6, %v895_v34  ;;  %993 = vst.msk [vmem:[#allocation2 + $0xb0] sm:$0x1] %vm709_vm6, %v890_v20  ;;  %v2329_v44 = vld [vmem:[#allocation2 + $0xa4] sm:$0x3]  ;;  %v2948_v2 = vsel %vm5706_vm9, %v4470_v31, %v2947_v11  ;;  %v4487_v48 = vcombine.low %v2955_v33, %v2958_v13 }
 0x20c   : > { %992 = vst.msk [vmem:[#allocation2 + $0xac] sm:$0xf] %vm693_vm2, %v889_v10  ;;  %v2469_v0 = vrot.slane %v6228_v24, 6  ;;  %v2004_v45 = vld [vmem:[#allocation2 + $0x94] sm:$0xf]  ;;  %v4393_v49 = vrot.slane %v2006_v41, 9 }
 0x20d   : > { %2233 = vrot.lane.b32.xlu0 %v4400_v35, %s5276_s19  ;;  %v2949_v35 = vrot.slane %v2947_v11, 4  ;;  %v2150_v32 = vrot.slane %v2148_v46, 4  ;;  %v2151_v50 = vrot.slane %v2008_v21, 5  ;;  %v2003_v62 = vld [vmem:[#allocation2 + $0x90] sm:$0xe]  ;;  %v4502_v8 = vrot.slane %v3138_v39, 10 }
 0x20e   : > { %1417 = vrot.lane.b32.xlu1 %v4323_v6, %s5273_s18  ;;  %v3268_v6 = vrot.slane %v6222_v14, 6  ;;  %v2005_v51 = vld [vmem:[#allocation2 + $0x98] sm:$0x1]  ;;  %v1188_v1 = vld [vmem:[#allocation2 + $0xa0] sm:$0xf]  ;;  %v3271_v52 = vrot.slane %v3140_v7, 6  ;;  %v2149_v60 = vsel %vm5706_vm9, %v4393_v49, %v2148_v46 }
 0x20f   : > { %v2951_v61 = vsel %vm5706_vm9, %v2949_v35, %v2950_v55  ;;  %v6250_v3 = vld [vmem:[#allocation2 + $0x94] sm:$0xf]  ;;  %v2141_v59 = vrot.slane %v2004_v45, 5  ;;  %v1187_v12 = vld [vmem:[#allocation2 + $0x9c] sm:$0xe]  ;;  %v4425_v53 = vrot.slane %v2327_v43, 10  ;;  %v2152_v17 = vsel %vm5706_vm9, %v2150_v32, %v2151_v50 }
 0x210   : > { %v3270_v40 = vrot.slane %v3268_v6, 4  ;;  %v4941_v15 = vld [vmem:[#allocation2 + $0x90] sm:$0xff]   ;;  %v2471_v56 = vrot.slane %v2469_v0, 4  ;;  %v2472_v63 = vrot.slane %v2329_v44, 6  ;;  %v1189_v11 = vld [vmem:[#allocation2 + $0xa4] sm:$0x1]  ;;  %v4486_v34 = vcombine.low %v2948_v2, %v2951_v61 }
 0x211   : > { %2554 = vrot.lane.b32.xlu0 %v4432_v58, %s5278_s9  ;;  %v1340_v16 = vrot.slane %v1188_v1, 5  ;;  %v2324_v18 = vld [vmem:[#allocation2 + $0x90] sm:$0xc]  ;;  %v1512_v19 = vld [vmem:[#allocation2 + $0xa0] sm:$0xf]  ;;  %1144 = vst.msk [vmem:[#allocation3 + $0x60] sm:$0xff] %vm1131_vm11, %v4941_v15  ;;  %v3269_v10 = vsel %vm5666_vm5, %v4502_v8, %v3268_v6  ;;  %v4409_v31 = vcombine.low %v2149_v60, %v2152_v17  ;;  %v2470_v35 = vsel %vm5666_vm5, %v4425_v53, %v2469_v0 }
 0x212   : > { %1741 = vrot.lane.b32.xlu1 %v4355_v27, %s5272_s8  ;;  %v4392_v41 = vrot.slane %v2003_v62, 9  ;;  %v2144_v21 = vrot.slane %v2005_v51, 5  ;;  %v2326_v14 = vld [vmem:[#allocation2 + $0x98] sm:$0x3]  ;;  %v1509_v26 = vld [vmem:[#allocation2 + $0x94] sm:$0xf]  ;;  %v3272_v20 = vsel %vm5666_vm5, %v3270_v40, %v3271_v52  ;;  %v2473_v55 = vsel %vm5666_vm5, %v2471_v56, %v2472_v63  ;;  %v1734_v27 = vpop.permute.xlu1 %1733 }
 0x213   : > { %v2143_v46 = vrot.slane %v2141_v59, 4  ;;  %v2462_v24 = vrot.slane %v6250_v3, 6  ;;  %v1511_v58 = vld [vmem:[#allocation2 + $0x9c] sm:$0xc]  ;;  %v4315_v39 = vrot.slane %v1187_v12, 9  ;;  %v1342_v7 = vrot.slane %v1340_v16, 4 }
 0x214   : > { %v1513_v38 = vld [vmem:[#allocation2 + $0xa4] sm:$0x3]  ;;  %v1161_v29 = vld [vmem:[#allocation2 + $0x34] sm:$0xf]  ;;  %v1343_v6 = vrot.slane %v1189_v11, 5  ;;  %v1664_v43 = vrot.slane %v1512_v19, 6  ;;  %v4518_v33 = vcombine.low %v3269_v10, %v3272_v20  ;;  %v2142_v44 = vsel %vm5706_vm9, %v4392_v41, %v2141_v59 }
 0x215   : > { %1739 = vrot.lane.b32.xlu0 %v4354_v57, %s5272_s8  ;;  %v4424_v45 = vrot.slane %v2324_v18, 10  ;;  %v1508_v13 = vld [vmem:[#allocation2 + $0x90] sm:$0xc]  ;;  %v1510_v0 = vld [vmem:[#allocation2 + $0x98] sm:$0x3]  ;;  %1781 = vst.msk [vmem:[#allocation3 + $0x8] sm:$0xff] %vm1779_vm3, %v1734_v27  ;;  %v2145_v49 = vsel %vm5706_vm9, %v2143_v46, %v2144_v21  ;;  %v4441_v51 = vcombine.low %v2470_v35, %v2473_v55  ;;  %v1341_v57 = vsel %vm5706_vm9, %v4315_v39, %v1340_v16 }
 0x216   : > { %3067 = vrot.lane.b32.xlu1 %v4487_v48, %s5279_s12  ;;  %1780 = vst.msk [vmem:[#allocation3] sm:$0xff] %vm1779_vm3, %v1732_v9  ;;  %v2464_v32 = vrot.slane %v2462_v24, 4  ;;  %v2465_v50 = vrot.slane %v2326_v14, 6  ;;  %v1657_v62 = vrot.slane %v1509_v26, 6  ;;  %v4347_v2 = vrot.slane %v1511_v58, 10  ;;  %v4912_v27 = vld [vmem:[#allocation2 + $0x48] sm:$0xff]  }
 0x217   : > { %v1160_v61 = vld [vmem:[#allocation2 + $0x30] sm:$0xe]  ;;  %v1344_v1 = vsel %vm5706_vm9, %v1342_v7, %v1343_v6  ;;  %v1666_v3 = vrot.slane %v1664_v43, 4  ;;  %v1667_v8 = vrot.slane %v1513_v38, 6  ;;  %v1162_v40 = vld [vmem:[#allocation2 + $0x38] sm:$0x1]  ;;  %v4408_v59 = vcombine.low %v2142_v44, %v2145_v49 }
 0x218   : > { %v1277_v52 = vrot.slane %v1161_v29, 5  ;;  %v2463_v12 = vsel %vm5666_vm5, %v4424_v45, %v2462_v24  ;;  %v1185_v9 = vld [vmem:[#allocation2 + $0x94] sm:$0xf]  ;;  %v2466_v15 = vsel %vm5666_vm5, %v2464_v32, %v2465_v50  ;;  %v4346_v48 = vrot.slane %v1508_v13, 10  ;;  %v1184_v41 = vld [vmem:[#allocation2 + $0x90] sm:$0xe] }
 0x219   : > { %3065 = vrot.lane.b32.xlu0 %v4486_v34, %s5279_s12  ;;  %v1659_v53 = vrot.slane %v1657_v62, 4  ;;  %v1660_v56 = vrot.slane %v1510_v0, 6  ;;  %v4331_v63 = vcombine.low %v1341_v57, %v1344_v1  ;;  %v1665_v11 = vsel %vm5666_vm5, %v4347_v2, %v1664_v43  ;;  %v1186_v21 = vld [vmem:[#allocation2 + $0x98] sm:$0x1]  ;;  %v3125_v13 = vld [vmem:[#allocation2 + $0x5c] sm:$0x3] }
 0x21a   : > { %2251 = vrot.lane.b32.xlu1 %v4409_v31, %s5276_s19  ;;  %v4306_v60 = vrot.slane %v1160_v61, 9  ;;  %v1668_v17 = vsel %vm5666_vm5, %v1666_v3, %v1667_v8  ;;  %v1279_v16 = vrot.slane %v1277_v52, 4  ;;  %v1280_v18 = vrot.slane %v1162_v40, 5  ;;  %v3124_v39 = vld [vmem:[#allocation2 + $0x58] sm:$0xf] }
 0x21b   : > { %v1333_v19 = vrot.slane %v1185_v9, 5  ;;  %v4440_v34 = vcombine.low %v2463_v12, %v2466_v15  ;;  %v1658_v14 = vsel %vm5666_vm5, %v4346_v48, %v1657_v62  ;;  %v1661_v26 = vsel %vm5666_vm5, %v1659_v53, %v1660_v56  ;;  %v6317_v50 = vld [vmem:[#allocation2 + $0xb4] sm:$0xc]  ;;  %v6320_v2 = vld [vmem:[#allocation2 + $0xb8] sm:$0xf]  ;;  %v4915_v48 = vld [vmem:[#allocation2 + $0xa8] sm:$0xff]  }
 0x21c   : > { %v4363_v10 = vcombine.low %v1665_v11, %v1668_v17  ;;  %v1278_v20 = vsel %vm5706_vm9, %v4306_v60, %v1277_v52  ;;  %v575_v46 = vadd.f32 %v6174_v23, %v5948_v22  ;;  %v1281_v24 = vsel %vm5706_vm9, %v1279_v16, %v1280_v18  ;;  %v6324_v3 = vld [vmem:[#allocation2 + $0xbc] sm:$0x3]  ;;  %v4914_v52 = vld [vmem:[#allocation2 + $0x54] sm:$0xff]  }
 0x21d   : > { %3386 = vrot.lane.b32.xlu0 %v4518_v33, %s5277_s17  ;;  %v4314_v58 = vrot.slane %v1184_v41, 9  ;;  %v1335_v31 = vrot.slane %v1333_v19, 4  ;;  %v1336_v35 = vrot.slane %v1186_v21, 5  ;;  %v4362_v55 = vcombine.low %v1658_v14, %v1661_v26  ;;  %v3123_v33 = vld [vmem:[#allocation2 + $0x54] sm:$0xc] }
 0x21e   : > { %2572 = vrot.lane.b32.xlu1 %v4441_v51, %s5278_s9  ;;  %v567_v38 = vadd.f32 %v6174_v23, %v5956_v30  ;;  %v4322_v29 = vcombine.low %v1278_v20, %v1281_v24  ;;  %v659_v7 = vmax.f32 %v575_v46, 0.0  ;;  %v578_v43 = vadd.f32 %v6174_v23, %v5960_v37  ;;  %v4913_v51 = vld [vmem:[#allocation2 + $0x48] sm:$0xff]   ;;  %v6328_v12 = vld [vmem:[#allocation2 + $0x58] sm:$0xf]  ;;  %v6334_v56 = vld [vmem:[#allocation2 + $0x54] sm:$0xe] }
 0x21f   : > { %v1334_v22 = vsel %vm5706_vm9, %v4314_v58, %v1333_v19  ;;  %v1337_v6 = vsel %vm5706_vm9, %v1335_v31, %v1336_v35  ;;  %v3233_v44 = vrot.slane %v3124_v39, 6  ;;  %v570_v45 = vadd.f32 %v6174_v23, %v5965_v42  ;;  %v6347_v41 = vld [vmem:[#allocation2 + $0x48] sm:$0xe]  ;;  %v4916_v26 = vld [vmem:[#allocation2 + $0x54] sm:$0xff]   ;;  %v6358_v46 = vld [vmem:[#allocation2 + $0x50] sm:$0x1] }
 0x220   : > { %v4585_v30 = vpack.c.bf16 %v659_v7, %v659_v7  ;;  %v657_v0 = vmax.f32 %v567_v38, 0.0  ;;  %v4330_v32 = vcombine.low %v1334_v22, %v1337_v6  ;;  %v4497_v57 = vrot.slane %v3123_v33, 10  ;;  %v4943_v31 = vld [vmem:[#allocation2 + $0x54] sm:$0xff]   ;;  %v4944_v7 = vld [vmem:[#allocation2 + $0x48] sm:$0xff]  }
 0x221   : > { %2249 = vrot.lane.b32.xlu0 %v4408_v59, %s5276_s19  ;;  %v3235_v42 = vrot.slane %v3233_v44, 4  ;;  %v3236_v1 = vrot.slane %v3125_v13, 6  ;;  %v660_v8 = vmax.f32 %v578_v43, 0.0  ;;  %v658_v40 = vmax.f32 %v570_v45, 0.0  ;;  %v4917_v6 = vld [vmem:[#allocation2 + $0xa8] sm:$0xff]   ;;  %1139 = vst.msk [vmem:[#allocation3 + $0x38] sm:$0xff] %vm1131_vm11, %v4943_v31 }
 0x222   : > { %1433 = vrot.lane.b32.xlu1 %v4331_v63, %s5273_s18  ;;  %v861_v62 = vrot.slane %v4585_v30, 7  ;;  %v4583_v61 = vpack.c.bf16 %v657_v0, %v657_v0  ;;  %v4505_v59 = vrot.slane %v6317_v50, 10  ;;  %v3289_v53 = vrot.slane %v6320_v2, 6  ;;  %v6336_v63 = vld [vmem:[#allocation2 + $0x4c] sm:$0xf]  ;;  %1138 = vst.msk [vmem:[#allocation3 + $0x30] sm:$0xff] %vm1131_vm11, %v4944_v7 }
 0x223   : > { %v4586_v60 = vpack.c.bf16 %v660_v8, %v660_v8  ;;  %v4584_v17 = vpack.c.bf16 %v658_v40, %v658_v40  ;;  %v6342_v18 = vsel %vm5666_vm5, %v4497_v57, %v3233_v44  ;;  %v3292_v19 = vrot.slane %v6324_v3, 6  ;;  %v6390_v30 = vld [vmem:[#allocation2 + $0x5c] sm:$0x1]  ;;  %v6392_v45 = vld [vmem:[#allocation2 + $0x48] sm:$0xc] }
 0x224   : > { %976 = vst.msk [vmem:[#allocation2 + $0x6c] sm:$0xe] %vm954_vm12, %v861_v62  ;;  %v856_v9 = vrot.slane %v4583_v61, 7  ;;  %v862_v11 = vrot.slane %v861_v62, 4  ;;  %v639_v14 = vadd.f32 %v6174_v23, %v5991_v28  ;;  %v2912_v20 = vrot.slane %v6328_v12, 5 }
 0x225   : > { %2570 = vrot.lane.b32.xlu0 %v4440_v34, %s5278_s9  ;;  %v6345_v34 = vld [vmem:[#allocation2 + $0x5c] sm:$0x1]  ;;  %v863_v24 = vrot.slane %v4586_v60, 7  ;;  %v858_v58 = vrot.slane %v4584_v17, 7  ;;  %v2905_v35 = vrot.slane %v6336_v63, 5  ;;  %v631_v39 = vadd.f32 %v6174_v23, %v5996_v47 }
 0x226   : > { %1757 = vrot.lane.b32.xlu1 %v4363_v10, %s5272_s8  ;;  %v857_v21 = vrot.slane %v856_v9, 4  ;;  %973 = vst.msk [vmem:[#allocation2 + $0x60] sm:$0xe] %vm954_vm12, %v856_v9  ;;  %v6355_v10 = vsel %vm5666_vm5, %v3235_v42, %v3236_v1  ;;  %v6363_v28 = vld [vmem:[#allocation2 + $0x58] sm:$0xf]  ;;  %v642_v38 = vadd.f32 %v6174_v23, %v6036_v25  ;;  %v4465_v44 = vrot.slane %v6334_v56, 9 }
 0x227   : > { %v864_v43 = vsel %vm5773_vm0, %v862_v11, %v863_v24  ;;  %v860_v33 = vrot.slane %v858_v58, 4  ;;  %v675_v13 = vmax.f32 %v639_v14, 0.0  ;;  %v3291_v0 = vrot.slane %v3289_v53, 4  ;;  %v6400_v62 = vld [vmem:[#allocation2 + $0x4c] sm:$0xf]  ;;  %v4918_v1 = vld [vmem:[#allocation2 + $0xb4] sm:$0xff]  }
 0x228   : > { %v859_v47 = vsel %vm5773_vm0, %v857_v21, %v858_v58  ;;  %977 = vst.msk [vmem:[#allocation2 + $0x70] sm:$0xf] %vm693_vm2, %v864_v43  ;;  %v4464_v50 = vrot.slane %v6347_v41, 9  ;;  %v6406_v57 = vld [vmem:[#allocation2 + $0x50] sm:$0x3]  ;;  %v673_v61 = vmax.f32 %v631_v39, 0.0  ;;  %v2913_v60 = vsel %vm5706_vm9, %v4465_v44, %v2912_v20 }
 0x229   : > { %1755 = vrot.lane.b32.xlu0 %v4362_v55, %s5272_s8  ;;  %v6361_v55 = vld [vmem:[#allocation2 + $0x54] sm:$0xe]  ;;  %974 = vst.msk [vmem:[#allocation2 + $0x64] sm:$0xf] %vm693_vm2, %v859_v47  ;;  %v4601_v2 = vpack.c.bf16 %v675_v13, %v675_v13  ;;  %v2907_v8 = vrot.slane %v2905_v35, 4  ;;  %v3226_v9 = vrot.slane %v6400_v62, 6  ;;  %v3293_v11 = vsel %vm5666_vm5, %v3291_v0, %v3292_v19 }
 0x22a   : > { %1415 = vrot.lane.b32.xlu1 %v4322_v29, %s5273_s18  ;;  %v6371_v29 = vadd.f32 %v6174_v23, %v6069_v36  ;;  %v4513_v36 = vcombine.low %v6342_v18, %v6355_v10  ;;  %v6387_v23 = vsel %vm5666_vm5, %v4505_v59, %v3289_v53  ;;  %975 = vst.msk [vmem:[#allocation2 + $0x68] sm:$0x1] %vm709_vm6, %v860_v33  ;;  %v4387_v40 = vrot.slane %v6361_v55, 9  ;;  %v6426_v18 = vld [vmem:[#allocation2 + $0x54] sm:$0xc] }
 0x22b   : > { %v4496_v59 = vrot.slane %v6392_v45, 10  ;;  %v4599_v53 = vpack.c.bf16 %v673_v61, %v673_v61  ;;  %v676_v56 = vmax.f32 %v642_v38, 0.0  ;;  %v3229_v17 = vrot.slane %v6406_v57, 6  ;;  %v4919_v21 = vld [vmem:[#allocation2 + $0xb4] sm:$0xff]   ;;  %v6443_v58 = vld [vmem:[#allocation2 + $0x4c] sm:$0xf] }
 0x22c   : > { %v1911_v49 = vpop.permute.xlu1 %1910  ;;  %v674_v41 = vmax.f32 %v6371_v29, 0.0  ;;  %v2311_v39 = vld [vmem:[#allocation2 + $0x5c] sm:$0x3]  ;;  %v4419_v38 = vrot.slane %v6426_v18, 10  ;;  %v6454_v43 = vld [vmem:[#allocation2 + $0x48] sm:$0xe] }
 0x22d   : > { %2732 = vrot.lane.b32.xlu0 %v4912_v27, %s5275_s21  ;;  %1958 = vst.msk [vmem:[#allocation3 + $0x8] sm:$0xff] %vm1956_vm4, %v1911_v49  ;;  %v865_v27 = vrot.slane %v863_v24, 4  ;;  %v2914_v49 = vrot.slane %v2912_v20, 4  ;;  %v896_v3 = vrot.slane %v4599_v53, 7  ;;  %v4602_v19 = vpack.c.bf16 %v676_v56, %v676_v56  ;;  %v6479_v53 = vld [vmem:[#allocation2 + $0x48] sm:$0xc] }
 0x22e   : > { %1431 = vrot.lane.b32.xlu1 %v4330_v32, %s5273_s18  ;;  %v2915_v32 = vrot.slane %v6345_v34, 5  ;;  %v6428_v34 = vld [vmem:[#allocation2 + $0x58] sm:$0xf]  ;;  %v4600_v31 = vpack.c.bf16 %v674_v41, %v674_v41  ;;  %v2099_v44 = vrot.slane %v6443_v58, 5  ;;  %v3227_v5 = vsel %vm5666_vm5, %v4496_v59, %v3226_v9  ;;  %v6498_v62 = vld [vmem:[#allocation2 + $0x4c] sm:$0xf] }
 0x22f   : > { %v1909_v37 = vpop.permute.xlu0 %1908  ;;  %978 = vst.msk [vmem:[#allocation2 + $0x74] sm:$0x1] %vm709_vm6, %v865_v27  ;;  %v2427_v29 = vrot.slane %v6428_v34, 6  ;;  %v897_v7 = vrot.slane %v896_v3, 4  ;;  %v903_v63 = vrot.slane %v4602_v19, 7 }
 0x230   : > { %1957 = vst.msk [vmem:[#allocation3] sm:$0xff] %vm1956_vm4, %v1909_v37  ;;  %v6331_v15 = vpop.permute.xlu1 %2742  ;;  %v2908_v37 = vrot.slane %v6358_v46, 5  ;;  %v2916_v20 = vsel %vm5706_vm9, %v2914_v49, %v2915_v32  ;;  %v2906_v46 = vsel %vm5706_vm9, %v4464_v50, %v2905_v35  ;;  %v4521_v35 = vcombine.low %v6387_v23, %v3293_v11  ;;  %v6456_v27 = vld [vmem:[#allocation2 + $0x58] sm:$0xf]  ;;  %v6464_v50 = vld [vmem:[#allocation2 + $0x54] sm:$0xe] }
 0x231   : > { %1916 = vrot.lane.b32.xlu0 %v4913_v51, %s5274_s15  ;;  %v2106_v51 = vrot.slane %v6363_v28, 5  ;;  %997 = vst.msk [vmem:[#allocation2 + $0xc0] sm:$0xe] %vm954_vm12, %v896_v3  ;;  %v898_v47 = vrot.slane %v4600_v31, 7  ;;  %v4481_v33 = vcombine.low %v2913_v60, %v2916_v20  ;;  %v905_v0 = vrot.slane %v903_v63, 4 }
 0x232   : > { %2734 = vrot.lane.b32.xlu1 %v4914_v52, %s5275_s21  ;;  %v2109_v52 = vrot.slane %v6390_v30, 5  ;;  %v2909_v24 = vsel %vm5706_vm9, %v2907_v8, %v2908_v37  ;;  %v6459_v30 = vld [vmem:[#allocation2 + $0x4c] sm:$0xf]  ;;  %v2430_v32 = vrot.slane %v2311_v39, 6  ;;  %v6466_v37 = vld [vmem:[#allocation2 + $0x5c] sm:$0x1] }
 0x233   : > { %v6338_v16 = vpop.permute.xlu0 %2740  ;;  %v2108_v14 = vrot.slane %v2106_v51, 4  ;;  %v4480_v49 = vcombine.low %v2906_v46, %v2909_v24  ;;  %v899_v57 = vsel %vm5773_vm0, %v897_v7, %v898_v47  ;;  %v2429_v8 = vrot.slane %v2427_v29, 4  ;;  %1002 = vst.msk [vmem:[#allocation2 + $0xd4] sm:$0x1] %vm709_vm6, %v905_v0  ;;  %v2308_v60 = vld [vmem:[#allocation2 + $0x50] sm:$0x3] }
 0x234   : > { %v6374_v22 = vpop.permute.xlu1 %1926  ;;  %998 = vst.msk [vmem:[#allocation2 + $0xc4] sm:$0xf] %vm693_vm2, %v899_v57  ;;  %v2101_v56 = vrot.slane %v2099_v44, 4  ;;  %v1301_v18 = vrot.slane %v6466_v37, 5  ;;  %v1493_v34 = vld [vmem:[#allocation2 + $0x54] sm:$0xc] }
 0x235   : > { %2748 = vrot.lane.b32.xlu0 %v4915_v48, %s5275_s21  ;;  %v901_v48 = vrot.slane %v4601_v2, 7  ;;  %v900_v2 = vrot.slane %v898_v47, 4  ;;  %v1495_v41 = vld [vmem:[#allocation2 + $0x5c] sm:$0x3]  ;;  %v2827_v20 = vld [vmem:[#allocation2 + $0xb8] sm:$0xf] }
 0x236   : > { %1918 = vrot.lane.b32.xlu1 %v4916_v26, %s5274_s15  ;;  %v4418_v46 = vrot.slane %v6479_v53, 10  ;;  %v2423_v58 = vrot.slane %v2308_v60, 6  ;;  %v1492_v31 = vld [vmem:[#allocation2 + $0x50] sm:$0x3]  ;;  %v1625_v7 = vrot.slane %v1495_v41, 6  ;;  %v2968_v47 = vrot.slane %v2827_v20, 5 }
 0x237   : > { %v6381_v25 = vpop.permute.xlu0 %1924  ;;  %v902_v26 = vrot.slane %v901_v48, 4  ;;  %1000 = vst.msk [vmem:[#allocation2 + $0xcc] sm:$0xe] %vm954_vm12, %v901_v48  ;;  %v1298_v48 = vrot.slane %v6456_v27, 5  ;;  %v1618_v0 = vrot.slane %v1492_v31, 6  ;;  %vm3418_vm12 = vcmask 589312  }
 0x238   : > { %v2232_v42 = vpop.permute.xlu1 %2231  ;;  %999 = vst.msk [vmem:[#allocation2 + $0xc8] sm:$0x1] %vm709_vm6, %v900_v2  ;;  %v2825_v57 = vld [vmem:[#allocation2 + $0xb0] sm:$0x1]  ;;  %v6528_v2 = vld [vmem:[#allocation2 + $0xac] sm:$0xf] }
 0x239   : > { %1932 = vrot.lane.b32.xlu0 %v4917_v6, %s5274_s15  ;;  %2279 = vst.msk [vmem:[#allocation3 + $0x8] sm:$0xff] %vm2277_vm7, %v2232_v42  ;;  %v3228_v6 = vrot.slane %v3226_v9, 4  ;;  %v904_v13 = vsel %vm5773_vm0, %v902_v26, %v903_v63  ;;  %v2107_v42 = vsel %vm5706_vm9, %v4387_v40, %v2106_v51  ;;  %v4386_v51 = vrot.slane %v6454_v43, 9  ;;  %v2826_v63 = vld [vmem:[#allocation2 + $0xb4] sm:$0xe] }
 0x23a   : > { %2750 = vrot.lane.b32.xlu1 %v4918_v1, %s5275_s21  ;;  %1001 = vst.msk [vmem:[#allocation2 + $0xd0] sm:$0xf] %vm693_vm2, %v904_v13  ;;  %v2110_v1 = vsel %vm5706_vm9, %v2108_v14, %v2109_v52  ;;  %v2420_v40 = vrot.slane %v6459_v30, 6  ;;  %v6495_v52 = vld [vmem:[#allocation2 + $0x58] sm:$0xf]  ;;  %v2428_v9 = vsel %vm5666_vm5, %v4419_v38, %v2427_v29  ;;  %v2431_v26 = vsel %vm5666_vm5, %v2429_v8, %v2430_v32 }
 0x23b   : > { %v6415_v12 = vpop.permute.xlu0 %3384  ;;  %v3230_v28 = vsel %vm5666_vm5, %v3228_v6, %v3229_v17  ;;  %v4403_v59 = vcombine.low %v2107_v42, %v2110_v1  ;;  %v4309_v17 = vrot.slane %v6464_v50, 9  ;;  %v1300_v3 = vrot.slane %v1298_v48, 4  ;;  %v6556_v20 = vld [vmem:[#allocation2 + $0xac] sm:$0xf]  ;;  %v2333_v31 = vld [vmem:[#allocation2 + $0xb4] sm:$0xc] }
 0x23c   : > { %v2553_v10 = vpop.permute.xlu1 %2552  ;;  %v4512_v14 = vcombine.low %v3227_v5, %v3230_v28  ;;  %v1622_v19 = vrot.slane %v6495_v52, 6  ;;  %v2422_v24 = vrot.slane %v2420_v40, 4  ;;  %v2100_v39 = vsel %vm5706_vm9, %v4386_v51, %v2099_v44  ;;  %v2014_v51 = vld [vmem:[#allocation2 + $0xbc] sm:$0x1] }
 0x23d   : > { %3376 = vrot.lane.b32.xlu0 %v4513_v36, %s5277_s17  ;;  %2600 = vst.msk [vmem:[#allocation3 + $0x8] sm:$0xff] %vm2598_vm8, %v2553_v10  ;;  %v1987_v36 = vld [vmem:[#allocation2 + $0x50] sm:$0x1]  ;;  %v1490_v10 = vld [vmem:[#allocation2 + $0x48] sm:$0xc]  ;;  %v4341_v29 = vrot.slane %v1493_v34, 10  ;;  %v4435_v43 = vcombine.low %v2428_v9, %v2431_v26  ;;  %v1299_v44 = vsel %vm5706_vm9, %v4309_v17, %v1298_v48  ;;  %v1302_v30 = vsel %vm5706_vm9, %v1300_v3, %v1301_v18 }
 0x23e   : > { %1934 = vrot.lane.b32.xlu1 %v4919_v21, %s5274_s15  ;;  %v2102_v11 = vrot.slane %v1987_v36, 5  ;;  %v4340_v27 = vrot.slane %v1490_v10, 10  ;;  %v1624_v13 = vrot.slane %v1622_v19, 4  ;;  %v4473_v37 = vrot.slane %v2826_v63, 9  ;;  %v2012_v48 = vld [vmem:[#allocation2 + $0xb4] sm:$0xe] }
 0x23f   : > { %v2230_v55 = vpop.permute.xlu0 %2229  ;;  %v2424_v42 = vsel %vm5666_vm5, %v2422_v24, %v2423_v58  ;;  %v4325_v5 = vcombine.low %v1299_v44, %v1302_v30  ;;  %v2970_v28 = vrot.slane %v2968_v47, 4  ;;  %v2964_v18 = vrot.slane %v2825_v57, 5  ;;  %v3144_v34 = vld [vmem:[#allocation2 + $0xa8] sm:$0xc]  ;;  %v3146_v10 = vld [vmem:[#allocation2 + $0xb0] sm:$0x3] }
 0x240   : > { %2278 = vst.msk [vmem:[#allocation3] sm:$0xff] %vm2277_vm7, %v2230_v55  ;;  %v1414_v23 = vpop.permute.xlu1 %1413  ;;  %v1615_v55 = vrot.slane %v6498_v62, 6  ;;  %v2103_v38 = vsel %vm5706_vm9, %v2101_v56, %v2102_v11  ;;  %v1623_v11 = vsel %vm5666_vm5, %v4341_v29, %v1622_v19  ;;  %v3282_v41 = vrot.slane %v6528_v2, 6  ;;  %v2335_v63 = vld [vmem:[#allocation2 + $0xbc] sm:$0x3] }
 0x241   : > { %3392 = vrot.lane.b32.xlu0 %v4521_v35, %s5277_s17  ;;  %1459 = vst.msk [vmem:[#allocation3 + $0x18] sm:$0xff] %vm1455_vm15, %v1414_v23  ;;  %v2828_v35 = vld [vmem:[#allocation2 + $0xbc] sm:$0x1]  ;;  %v2823_v23 = vld [vmem:[#allocation2 + $0xa8] sm:$0xe]  ;;  %v4402_v32 = vcombine.low %v2100_v39, %v2103_v38  ;;  %v2969_v3 = vsel %vm5706_vm9, %v4473_v37, %v2968_v47  ;;  %v4395_v19 = vrot.slane %v2012_v48, 9 }
 0x242   : > { %3055 = vrot.lane.b32.xlu1 %v4481_v33, %s5279_s12  ;;  %v2824_v33 = vld [vmem:[#allocation2 + $0xac] sm:$0xf]  ;;  %v1617_v50 = vrot.slane %v1615_v55, 4  ;;  %v2971_v1 = vrot.slane %v2828_v35, 5  ;;  %v1616_v62 = vsel %vm5666_vm5, %v4340_v27, %v1615_v55  ;;  %v2165_v58 = vrot.slane %v2014_v51, 5 }
 0x243   : > { %v2551_v61 = vpop.permute.xlu0 %2550  ;;  %v2961_v8 = vrot.slane %v2824_v33, 5  ;;  %v6566_v35 = vld [vmem:[#allocation2 + $0x4c] sm:$0xf]  ;;  %v3284_v27 = vrot.slane %v3282_v41, 4  ;;  %v3285_v47 = vrot.slane %v3146_v10, 6  ;;  %v2155_v44 = vrot.slane %v6556_v20, 5 }
 0x244   : > { %2599 = vst.msk [vmem:[#allocation3] sm:$0xff] %vm2598_vm8, %v2551_v61  ;;  %v1738_v45 = vpop.permute.xlu1 %1737  ;;  %v2421_v61 = vsel %vm5666_vm5, %v4418_v46, %v2420_v40  ;;  %v1626_v40 = vsel %vm5666_vm5, %v1624_v13, %v1625_v7  ;;  %v1619_v9 = vsel %vm5666_vm5, %v1617_v50, %v1618_v0  ;;  %v2972_v46 = vsel %vm5706_vm9, %v2970_v28, %v2971_v1  ;;  %v2009_v33 = vld [vmem:[#allocation2 + $0xa8] sm:$0xe]  ;;  %v1168_v28 = vld [vmem:[#allocation2 + $0x50] sm:$0x1] }
 0x245   : > { %3053 = vrot.lane.b32.xlu0 %v4480_v49, %s5279_s12  ;;  %1783 = vst.msk [vmem:[#allocation3 + $0x18] sm:$0xff] %vm1779_vm3, %v1738_v45  ;;  %v2013_v49 = vld [vmem:[#allocation2 + $0xb8] sm:$0xf]  ;;  %v4434_v60 = vcombine.low %v2421_v61, %v2424_v42  ;;  %v4472_v45 = vrot.slane %v2823_v23, 9  ;;  %v2963_v17 = vrot.slane %v2961_v8, 4  ;;  %v4357_v26 = vcombine.low %v1623_v11, %v1626_v40  ;;  %v4945_v42 = vld [vmem:[#allocation2 + $0xa8] sm:$0xff]  }
 0x246   : > { %2239 = vrot.lane.b32.xlu1 %v4403_v59, %s5276_s19  ;;  %v2162_v52 = vrot.slane %v2013_v49, 5  ;;  %v6546_v59 = vld [vmem:[#allocation2 + $0xb8] sm:$0xf]  ;;  %v4356_v38 = vcombine.low %v1616_v62, %v1619_v9  ;;  %v4504_v7 = vrot.slane %v3144_v34, 10  ;;  %v4489_v13 = vcombine.low %v2969_v3, %v2972_v46  ;;  %v2011_v49 = vld [vmem:[#allocation2 + $0xb0] sm:$0x1] }
 0x247   : > { %v6506_v21 = vpop.permute.xlu0 %1735  ;;  %v2483_v55 = vrot.slane %v6546_v59, 6  ;;  %v2962_v29 = vsel %vm5706_vm9, %v4472_v45, %v2961_v8  ;;  %v4427_v23 = vrot.slane %v2333_v31, 10  ;;  %v2486_v57 = vrot.slane %v2335_v63, 6  ;;  %v1166_v2 = vld [vmem:[#allocation2 + $0x48] sm:$0xe]  ;;  %1146 = vst.msk [vmem:[#allocation3 + $0x70] sm:$0xff] %vm1131_vm11, %v4945_v42 }
 0x248   : > { %v6519_v6 = vpop.permute.xlu1 %3063  ;;  %v2164_v24 = vrot.slane %v2162_v52, 4  ;;  %v2163_v0 = vsel %vm5706_vm9, %v4395_v19, %v2162_v52  ;;  %v1291_v61 = vrot.slane %v6566_v35, 5  ;;  %v3283_v48 = vsel %vm5666_vm5, %v4504_v7, %v3282_v41  ;;  %v1191_v51 = vld [vmem:[#allocation2 + $0xac] sm:$0xf]  ;;  %v4948_v52 = vld [vmem:[#allocation2 + $0xb4] sm:$0xff]  }
 0x249   : > { %3374 = vrot.lane.b32.xlu0 %v4512_v14, %s5277_s17  ;;  %v2485_v37 = vrot.slane %v2483_v55, 4  ;;  %v3286_v11 = vsel %vm5666_vm5, %v3284_v27, %v3285_v47  ;;  %v2157_v40 = vrot.slane %v2155_v44, 4  ;;  %v2330_v62 = vld [vmem:[#allocation2 + $0xa8] sm:$0xc]  ;;  %v2332_v34 = vld [vmem:[#allocation2 + $0xb0] sm:$0x3] }
 0x24a   : > { %2560 = vrot.lane.b32.xlu1 %v4435_v43, %s5278_s9  ;;  %v2965_v43 = vsel %vm5706_vm9, %v2963_v17, %v2964_v18  ;;  %v2166_v50 = vsel %vm5706_vm9, %v2164_v24, %v2165_v58  ;;  %v2484_v17 = vsel %vm5666_vm5, %v4427_v23, %v2483_v55  ;;  %v4308_v18 = vrot.slane %v1166_v2, 9  ;;  %v4934_v41 = vld [vmem:[#allocation10 + $0x20] ss:$0 sps:$4 sm:$0xff]   ;;  %1147 = vst.msk [vmem:[#allocation3 + $0x78] sm:$0xff] %vm1131_vm11, %v4948_v52  ;;  %v1190_v58 = vld [vmem:[#allocation2 + $0xa8] sm:$0xe] }
 0x24b   : > { %v6521_v36 = vpop.permute.xlu0 %3061  ;;  %v4488_v8 = vcombine.low %v2962_v29, %v2965_v43  ;;  %v4411_v9 = vcombine.low %v2163_v0, %v2166_v50  ;;  %v1293_v3 = vrot.slane %v1291_v61, 4  ;;  %v1294_v19 = vrot.slane %v1168_v28, 5  ;;  %v1192_v31 = vld [vmem:[#allocation2 + $0xb0] sm:$0x1] }
 0x24c   : > { %v6535_v53 = vpop.permute.xlu1 %2247  ;;  %v1347_v10 = vrot.slane %v1191_v51, 5  ;;  %v4520_v46 = vcombine.low %v3283_v48, %v3286_v11  ;;  %v4426_v24 = vrot.slane %v2330_v62, 10  ;;  %vm3543_vm2 = vcmask 1043456   ;;  %v6626_v42 = vld [vmem:[#allocation2 + $0x70] sm:$0xf]  ;;  %v4924_v51 = vld [vmem:[#allocation2 + $0x60] sm:$0xff]  }
 0x24d   : > { %2237 = vrot.lane.b32.xlu0 %v4402_v32, %s5276_s19  ;;  %v6574_v32 = vld [vmem:[#allocation2 + $0xac] sm:$0xf]  ;;  %v2479_v7 = vrot.slane %v2332_v34, 6  ;;  %4773 = vmatprep.subr.msk.bf16.mxu1 %vm3543_vm2, %v4934_v41  ;;  %vm2776_vm6 = vcmask 458112   ;;  %v1292_v43 = vsel %vm5706_vm9, %v4308_v18, %v1291_v61  ;;  %v3545_v27 = vsel %vm3543_vm2, %v4934_v41, 0 }
 0x24e   : > { %1421 = vrot.lane.b32.xlu1 %v4325_v5, %s5273_s18  ;;  %v4394_v5 = vrot.slane %v2009_v33, 9  ;;  %v2476_v45 = vrot.slane %v6574_v32, 6  ;;  %v1295_v47 = vsel %vm5706_vm9, %v1293_v3, %v1294_v19  ;;  %v4316_v33 = vrot.slane %v1190_v58, 9  ;;  %4702 = vmatpush3.bf16.msra.mxu1 %v3545_v27  ;;  %v3130_v61 = vld [vmem:[#allocation2 + $0x70] sm:$0xf]  ;;  %v4926_v58 = vld [vmem:[#allocation2 + $0x60] sm:$0xff]  }
 0x24f   : > { %v6537_v56 = vpop.permute.xlu0 %3382  ;;  %v4324_v50 = vcombine.low %v1292_v43, %v1295_v47  ;;  %v6629_v28 = vld [vmem:[#allocation2 + $0xd0] sm:$0xf]  ;;  %v3247_v52 = vrot.slane %v3130_v61, 6  ;;  %v2808_v62 = vld [vmem:[#allocation2 + $0x6c] sm:$0xe] }
 0x250   : > { %v6552_v14 = vpop.permute.xlu1 %2568  ;;  %v2156_v55 = vsel %vm5706_vm9, %v4394_v5, %v2155_v44  ;;  %v2478_v29 = vrot.slane %v2476_v45, 4  ;;  %v1349_v44 = vrot.slane %v1347_v10, 4  ;;  %v2477_v23 = vsel %vm5666_vm5, %v4426_v24, %v2476_v45  ;;  %v3129_v5 = vld [vmem:[#allocation2 + $0x6c] sm:$0xc]  ;;  %v6637_v18 = vld [vmem:[#allocation2 + $0x70] sm:$0xf] }
 0x251   : > { %2558 = vrot.lane.b32.xlu0 %v4434_v60, %s5278_s9  ;;  %v2158_v60 = vrot.slane %v2011_v49, 5  ;;  %v2926_v45 = vrot.slane %v6626_v42, 5  ;;  %v3153_v41 = vld [vmem:[#allocation2 + $0xcc] sm:$0xc]  ;;  %v3249_v19 = vrot.slane %v3247_v52, 4 }
 0x252   : > { %1745 = vrot.lane.b32.xlu1 %v4357_v26, %s5272_s8  ;;  %v2487_v26 = vsel %vm5666_vm5, %v2485_v37, %v2486_v57  ;;  %v2480_v49 = vsel %vm5666_vm5, %v2478_v29, %v2479_v7  ;;  %v1994_v3 = vld [vmem:[#allocation2 + $0x6c] sm:$0xe]  ;;  %v2120_v29 = vrot.slane %v6637_v18, 5  ;;  %v2317_v42 = vld [vmem:[#allocation2 + $0x74] sm:$0x3] }
 0x253   : > { %v6561_v39 = vpop.permute.xlu0 %2245  ;;  %v4443_v35 = vcombine.low %v2484_v17, %v2487_v26  ;;  %v4442_v2 = vcombine.low %v2477_v23, %v2480_v49  ;;  %v3303_v17 = vrot.slane %v6629_v28, 6  ;;  %v3155_v26 = vld [vmem:[#allocation2 + $0xd4] sm:$0x3]  ;;  %v4927_v7 = vld [vmem:[#allocation2 + $0x6c] sm:$0xff]   ;;  %v4389_v27 = vrot.slane %v1994_v3, 9 }
 0x254   : > { %v1430_v30 = vpop.permute.xlu1 %1429  ;;  %v3306_v43 = vrot.slane %v3155_v26, 6  ;;  %v6652_v23 = vld [vmem:[#allocation2 + $0x70] sm:$0xf]  ;;  %v3128_v18 = vld [vmem:[#allocation2 + $0x68] sm:$0x3] }
 0x255   : > { %1743 = vrot.lane.b32.xlu0 %v4356_v38, %s5272_s8  ;;  %1467 = vst.msk [vmem:[#allocation3 + $0x58] sm:$0xff] %vm1455_vm15, %v1430_v30  ;;  %v2159_v38 = vsel %vm5706_vm9, %v2157_v40, %v2158_v60  ;;  %v1350_v30 = vrot.slane %v1192_v31, 5  ;;  %v4925_v40 = vld [vmem:[#allocation2 + $0x6c] sm:$0xff]   ;;  %v3131_v60 = vld [vmem:[#allocation2 + $0x74] sm:$0x3]  ;;  %v4467_v31 = vrot.slane %v2808_v62, 9  ;;  %v2121_v26 = vsel %vm5706_vm9, %v4389_v27, %v2120_v29 }
 0x256   : > { %3071 = vrot.lane.b32.xlu1 %v4489_v13, %s5279_s12  ;;  %v4410_v0 = vcombine.low %v2156_v55, %v2159_v38  ;;  %v2928_v55 = vrot.slane %v2926_v45, 4  ;;  %v4946_v61 = vld [vmem:[#allocation2 + $0x6c] sm:$0xff]  }
 0x257   : > { %v6580_v1 = vpop.permute.xlu0 %2566  ;;  %v1351_v37 = vsel %vm5706_vm9, %v1349_v44, %v1350_v30  ;;  %v2805_v30 = vld [vmem:[#allocation2 + $0x60] sm:$0xe]  ;;  %1141 = vst.msk [vmem:[#allocation3 + $0x48] sm:$0xff] %vm1131_vm11, %v4946_v61  ;;  %v6699_v27 = vld [vmem:[#allocation2 + $0x70] sm:$0xf] }
 0x258   : > { %v1754_v59 = vpop.permute.xlu1 %1753  ;;  %v1499_v61 = vld [vmem:[#allocation2 + $0x6c] sm:$0xc] }
 0x259   : > { %3069 = vrot.lane.b32.xlu0 %v4488_v8, %s5279_s12  ;;  %1791 = vst.msk [vmem:[#allocation3 + $0x58] sm:$0xff] %vm1779_vm3, %v1754_v59  ;;  %v4499_v59 = vrot.slane %v3129_v5, 10  ;;  %v4947_v5 = vld [vmem:[#allocation2 + $0x60] sm:$0xff]  }
 0x25a   : > { %2255 = vrot.lane.b32.xlu1 %v4411_v9, %s5276_s19  ;;  %v2810_v9 = vld [vmem:[#allocation2 + $0x74] sm:$0x1]  ;;  %1140 = vst.msk [vmem:[#allocation3 + $0x40] sm:$0xff] %vm1131_vm11, %v4947_v5 }
 0x25b   : > { %v1752_v20 = vpop.permute.xlu0 %1751  ;;  %v2929_v38 = vrot.slane %v2810_v9, 5  ;;  %v3248_v49 = vsel %vm5666_vm5, %v4499_v59, %v3247_v52  ;;  %v2927_v52 = vsel %vm5706_vm9, %v4467_v31, %v2926_v45  ;;  %v4466_v59 = vrot.slane %v2805_v30, 9 }
 0x25c   : > { %v1412_v63 = vpop.permute.xlu1 %1411 }
 0x25d   : > { %3390 = vrot.lane.b32.xlu0 %v4520_v46, %s5277_s17  ;;  %1458 = vst.msk [vmem:[#allocation3 + $0x10] sm:$0xff] %vm1455_vm15, %v1412_v63  ;;  %v6641_v46 = vld [vmem:[#allocation2 + $0x64] sm:$0xf]  ;;  %v4507_v63 = vrot.slane %v3153_v41, 10 }
 0x25e   : > { %1782 = vst.msk [vmem:[#allocation3 + $0x10] sm:$0xff] %vm1779_vm3, %v6506_v21  ;;  %2576 = vrot.lane.b32.xlu1 %v4443_v35, %s5278_s9  ;;  %v1348_v21 = vsel %vm5706_vm9, %v4316_v33, %v1347_v10  ;;  %v3250_v10 = vrot.slane %v3131_v60, 6  ;;  %v3305_v35 = vrot.slane %v3303_v17, 4  ;;  %v4929_v33 = vld [vmem:[#allocation2 + $0xc0] sm:$0xff]   ;;  %v6671_v60 = vld [vmem:[#allocation2 + $0x70] sm:$0xf] }
 0x25f   : > { %v2729_v13 = vpop.permute.xlu0 %2728  ;;  %v4332_v48 = vcombine.low %v1348_v21, %v1351_v37  ;;  %v4930_v37 = vld [vmem:[#allocation2 + $0xcc] sm:$0xff]   ;;  %v3304_v62 = vsel %vm5666_vm5, %v4507_v63, %v3303_v17 }
 0x260   : > { %2777 = vst.msk [vmem:[#allocation3] sm:$0xff] %vm2776_vm6, %v2729_v13  ;;  %v1428_v32 = vpop.permute.xlu1 %1427  ;;  %v6649_v13 = vld [vmem:[#allocation2 + $0x68] sm:$0x1]  ;;  %v3307_v41 = vsel %vm5666_vm5, %v3305_v35, %v3306_v43  ;;  %v6696_v35 = vld [vmem:[#allocation2 + $0x60] sm:$0xe] }
 0x261   : > { %2253 = vrot.lane.b32.xlu0 %v4410_v0, %s5276_s19  ;;  %1466 = vst.msk [vmem:[#allocation3 + $0x50] sm:$0xff] %vm1455_vm15, %v1428_v32  ;;  %v2919_v0 = vrot.slane %v6641_v46, 5  ;;  %v3251_v32 = vsel %vm5666_vm5, %v3249_v19, %v3250_v10  ;;  %v2922_v9 = vrot.slane %v6649_v13, 5  ;;  %v6688_v19 = vld [vmem:[#allocation2 + $0x64] sm:$0xf]  ;;  %v4388_v5 = vrot.slane %v6696_v35, 9 }
 0x262   : > { %1790 = vst.msk [vmem:[#allocation3 + $0x50] sm:$0xff] %vm1779_vm3, %v1752_v20  ;;  %1419 = vrot.lane.b32.xlu1 %v4324_v50, %s5273_s18  ;;  %v1996_v20 = vld [vmem:[#allocation2 + $0x74] sm:$0x1]  ;;  %v6658_v50 = vld [vmem:[#allocation2 + $0x6c] sm:$0xc]  ;;  %v2113_v43 = vrot.slane %v6688_v19, 5 }
 0x263   : > { %v1913_v57 = vpop.permute.xlu0 %1912  ;;  %v2123_v44 = vrot.slane %v1996_v20, 5  ;;  %v2921_v3 = vrot.slane %v2919_v0, 4  ;;  %v4421_v17 = vrot.slane %v6658_v50, 10  ;;  %v2444_v20 = vrot.slane %v2317_v42, 6  ;;  %v1501_v42 = vld [vmem:[#allocation2 + $0x74] sm:$0x3] }
 0x264   : > { %1959 = vst.msk [vmem:[#allocation3 + $0x10] sm:$0xff] %vm1956_vm4, %v1913_v57  ;;  %v2731_v8 = vpop.permute.xlu1 %2730  ;;  %v2122_v57 = vrot.slane %v2120_v29, 4  ;;  %v1175_v29 = vld [vmem:[#allocation2 + $0x6c] sm:$0xe]  ;;  %v2920_v13 = vsel %vm5706_vm9, %v4466_v59, %v2919_v0  ;;  %v1639_v19 = vrot.slane %v1501_v42, 6 }
 0x265   : > { %2574 = vrot.lane.b32.xlu0 %v4442_v2, %s5278_s9  ;;  %2778 = vst.msk [vmem:[#allocation3 + $0x8] sm:$0xff] %vm2776_vm6, %v2731_v8  ;;  %v6661_v2 = vld [vmem:[#allocation2 + $0x64] sm:$0xf]  ;;  %v2441_v8 = vrot.slane %v6652_v23, 6  ;;  %v1993_v23 = vld [vmem:[#allocation2 + $0x68] sm:$0x1] }
 0x266   : > { %1435 = vrot.lane.b32.xlu1 %v4332_v48, %s5273_s18  ;;  %v6664_v48 = vld [vmem:[#allocation2 + $0x60] sm:$0xc]  ;;  %v2124_v10 = vsel %vm5706_vm9, %v2122_v57, %v2123_v44  ;;  %v4523_v44 = vcombine.low %v3304_v62, %v3307_v41  ;;  %v4311_v50 = vrot.slane %v1175_v29, 9  ;;  %v6726_v41 = vld [vmem:[#allocation2 + $0xac] sm:$0xf] }
 0x267   : > { %v6632_v11 = vpop.permute.xlu0 %2744  ;;  %v4498_v46 = vrot.slane %v6664_v48, 10  ;;  %v4405_v30 = vcombine.low %v2121_v26, %v2124_v10  ;;  %v1636_v48 = vrot.slane %v6699_v27, 6  ;;  %v6733_v10 = vld [vmem:[#allocation2 + $0xcc] sm:$0xe]  ;;  %v1671_v35 = vrot.slane %v6726_v41, 6 }
 0x268   : > { %v1915_v34 = vpop.permute.xlu1 %1914 }
 0x269   : > { %2736 = vrot.lane.b32.xlu0 %v4924_v51, %s5275_s21  ;;  %1960 = vst.msk [vmem:[#allocation3 + $0x18] sm:$0xff] %vm1956_vm4, %v1915_v34  ;;  %v4515_v51 = vcombine.low %v3248_v49, %v3251_v32  ;;  %v3240_v34 = vrot.slane %v6661_v2, 6  ;;  %v6705_v49 = vld [vmem:[#allocation2 + $0x64] sm:$0xf]  ;;  %v2923_v32 = vsel %vm5706_vm9, %v2921_v3, %v2922_v9  ;;  %v2442_v2 = vsel %vm5666_vm5, %v4421_v17, %v2441_v8  ;;  %v2312_v9 = vld [vmem:[#allocation2 + $0x60] sm:$0xc] }
 0x26a   : > { %2738 = vrot.lane.b32.xlu1 %v4925_v40, %s5275_s21  ;;  %v2930_v40 = vsel %vm5706_vm9, %v2928_v55, %v2929_v38  ;;  %v2443_v55 = vrot.slane %v2441_v8, 4  ;;  %v3243_v38 = vrot.slane %v3128_v18, 6  ;;  %v4482_v8 = vcombine.low %v2920_v13, %v2923_v32  ;;  %v2314_v18 = vld [vmem:[#allocation2 + $0x68] sm:$0x3]  ;;  %v1172_v32 = vld [vmem:[#allocation2 + $0x60] sm:$0xe] }
 0x26b   : > { %v1929_v24 = vpop.permute.xlu0 %1928  ;;  %v4483_v31 = vcombine.low %v2927_v52, %v2930_v40  ;;  %v3242_v63 = vrot.slane %v3240_v34, 4  ;;  %v2434_v52 = vrot.slane %v6705_v49, 6  ;;  %v6719_v40 = vld [vmem:[#allocation2 + $0xd0] sm:$0xf]  ;;  %v3241_v62 = vsel %vm5666_vm5, %v4498_v46, %v3240_v34  ;;  %v6735_v34 = vld [vmem:[#allocation2 + $0xd4] sm:$0x1] }
 0x26c   : > { %1967 = vst.msk [vmem:[#allocation3 + $0x50] sm:$0xff] %vm1956_vm4, %v1929_v24  ;;  %v6647_v47 = vpop.permute.xlu1 %2746  ;;  %v1312_v24 = vrot.slane %v6671_v60, 5  ;;  %v2445_v0 = vsel %vm5666_vm5, %v2443_v55, %v2444_v20  ;;  %v4343_v17 = vrot.slane %v1499_v61, 10  ;;  %v6739_v55 = vld [vmem:[#allocation2 + $0x64] sm:$0xf] }
 0x26d   : > { %1920 = vrot.lane.b32.xlu0 %v4926_v58, %s5274_s15  ;;  %v3244_v59 = vsel %vm5666_vm5, %v3242_v63, %v3243_v38  ;;  %v4437_v46 = vcombine.low %v2442_v2, %v2445_v0  ;;  %v6741_v38 = vld [vmem:[#allocation2 + $0x64] sm:$0xf]  ;;  %v2436_v29 = vrot.slane %v2434_v52, 4  ;;  %v1514_v63 = vld [vmem:[#allocation2 + $0xa8] sm:$0xc] }
 0x26e   : > { %1922 = vrot.lane.b32.xlu1 %v4927_v7, %s5274_s15  ;;  %v1177_v7 = vld [vmem:[#allocation2 + $0x74] sm:$0x1]  ;;  %v1313_v26 = vsel %vm5706_vm9, %v4311_v50, %v1312_v24  ;;  %v1174_v50 = vld [vmem:[#allocation2 + $0x68] sm:$0x1]  ;;  %v1496_v2 = vld [vmem:[#allocation2 + $0x60] sm:$0xc]  ;;  %v1637_v61 = vsel %vm5666_vm5, %v4343_v17, %v1636_v48 }
 0x26f   : > { %v3373_v21 = vpop.permute.xlu0 %3372  ;;  %v1315_v57 = vrot.slane %v1177_v7, 5  ;;  %v2437_v7 = vrot.slane %v2314_v18, 6  ;;  %v1629_v0 = vrot.slane %v6741_v38, 6  ;;  %v1193_v17 = vld [vmem:[#allocation2 + $0xb4] sm:$0xe] }
 0x270   : > { %v1931_v28 = vpop.permute.xlu1 %1930 }
 0x271   : > { %2752 = vrot.lane.b32.xlu0 %v4929_v33, %s5275_s21  ;;  %1968 = vst.msk [vmem:[#allocation3 + $0x58] sm:$0xff] %vm1956_vm4, %v1931_v28  ;;  %v2115_v28 = vrot.slane %v2113_v43, 4 }
 0x272   : > { %2754 = vrot.lane.b32.xlu1 %v4930_v37, %s5275_s21  ;;  %v1314_v37 = vrot.slane %v1312_v24, 4  ;;  %v4420_v24 = vrot.slane %v2312_v9, 10 }
 0x273   : > { %v6680_v45 = vpop.permute.xlu0 %3388 }
 0x274   : > { %v3052_v58 = vpop.permute.xlu1 %3051  ;;  %v1316_v3 = vsel %vm5706_vm9, %v1314_v37, %v1315_v57  ;;  %v4475_v37 = vrot.slane %v6733_v10, 9  ;;  %v2985_v57 = vrot.slane %v6735_v34, 5 }
 0x275   : > { %3380 = vrot.lane.b32.xlu0 %v4515_v51, %s5277_s17  ;;  %3099 = vst.msk [vmem:[#allocation3 + $0x8] sm:$0xff] %vm3097_vm10, %v3052_v58  ;;  %v2116_v51 = vrot.slane %v1993_v23, 5  ;;  %v1638_v58 = vrot.slane %v1636_v48, 4  ;;  %v1516_v23 = vld [vmem:[#allocation2 + $0xb0] sm:$0x3]  ;;  %v2435_v48 = vsel %vm5666_vm5, %v4420_v24, %v2434_v52 }
 0x276   : > { %3420 = vst.msk [vmem:[#allocation3 + $0x8] sm:$0xff] %vm3418_vm12, %v3373_v21  ;;  %3059 = vrot.lane.b32.xlu1 %v4483_v31, %s5279_s12  ;;  %v2982_v31 = vrot.slane %v6719_v40, 5  ;;  %v1194_v40 = vld [vmem:[#allocation2 + $0xb8] sm:$0xf] }
 0x277   : > { %v3050_v33 = vpop.permute.xlu0 %3049  ;;  %v2117_v13 = vsel %vm5706_vm9, %v2115_v28, %v2116_v51  ;;  %v1640_v42 = vsel %vm5666_vm5, %v1638_v58, %v1639_v19  ;;  %v4348_v28 = vrot.slane %v1514_v63, 10  ;;  %v1498_v51 = vld [vmem:[#allocation2 + $0x68] sm:$0x3]  ;;  %v1195_v19 = vld [vmem:[#allocation2 + $0xbc] sm:$0x1]  ;;  %v1354_v58 = vrot.slane %v1194_v40, 5 }
 0x278   : > { %3098 = vst.msk [vmem:[#allocation3] sm:$0xff] %vm3097_vm10, %v3050_v33  ;;  %v2236_v21 = vpop.permute.xlu1 %2235  ;;  %v4514_v33 = vcombine.low %v3241_v62, %v3244_v59  ;;  %v4310_v62 = vrot.slane %v1172_v32, 9  ;;  %v1308_v59 = vrot.slane %v1174_v50, 5  ;;  %v4359_v52 = vcombine.low %v1637_v61, %v1640_v42 }
 0x279   : > { %3396 = vrot.lane.b32.xlu0 %v4523_v44, %s5277_s17  ;;  %2281 = vst.msk [vmem:[#allocation3 + $0x18] sm:$0xff] %vm2277_vm7, %v2236_v21  ;;  %v4327_v44 = vcombine.low %v1313_v26, %v1316_v3  ;;  %v1305_v21 = vrot.slane %v6739_v55, 5  ;;  %v2438_v26 = vsel %vm5666_vm5, %v2436_v29, %v2437_v7  ;;  %v4342_v3 = vrot.slane %v1496_v2, 10  ;;  %v1518_v55 = vld [vmem:[#allocation2 + $0xb8] sm:$0xf] }
 0x27a   : > { %2243 = vrot.lane.b32.xlu1 %v4405_v30, %s5276_s19  ;;  %v2114_v30 = vsel %vm5706_vm9, %v4388_v5, %v2113_v43  ;;  %v2984_v5 = vrot.slane %v2982_v31, 4  ;;  %v2983_v38 = vsel %vm5706_vm9, %v4475_v37, %v2982_v31  ;;  %v4317_v29 = vrot.slane %v1193_v17, 9  ;;  %v2836_v2 = vld [vmem:[#allocation2 + $0xdc] sm:$0xf] }
 0x27b   : > { %v3371_v60 = vpop.permute.xlu0 %3370  ;;  %v4404_v41 = vcombine.low %v2114_v30, %v2117_v13  ;;  %v1307_v34 = vrot.slane %v1305_v21, 4  ;;  %v1357_v7 = vrot.slane %v1195_v19, 5  ;;  %v1356_v13 = vrot.slane %v1354_v58, 4 }
 0x27c   : > { %3419 = vst.msk [vmem:[#allocation3] sm:$0xff] %vm3418_vm12, %v3371_v60  ;;  %v2557_v20 = vpop.permute.xlu1 %2556  ;;  %v1673_v60 = vrot.slane %v1671_v35, 4  ;;  %v2986_v24 = vsel %vm5706_vm9, %v2984_v5, %v2985_v57  ;;  %v1306_v50 = vsel %vm5706_vm9, %v4310_v62, %v1305_v21  ;;  %v1519_v57 = vld [vmem:[#allocation2 + $0xbc] sm:$0x3]  ;;  %v1630_v61 = vsel %vm5666_vm5, %v4342_v3, %v1629_v0  ;;  %v2835_v62 = vld [vmem:[#allocation2 + $0xd8] sm:$0xe] }
 0x27d   : > { %3057 = vrot.lane.b32.xlu0 %v4482_v8, %s5279_s12  ;;  %2602 = vst.msk [vmem:[#allocation3 + $0x18] sm:$0xff] %vm2598_vm8, %v2557_v20  ;;  %v1674_v8 = vrot.slane %v1516_v23, 6  ;;  %v3436_v10 = vld [vmem:[#allocation3 + $0x8] sm:$0xff]  ;;  %v1631_v20 = vrot.slane %v1629_v0, 4  ;;  %v1678_v23 = vrot.slane %v1518_v55, 6  ;;  %v4491_v32 = vcombine.low %v2983_v38, %v2986_v24  ;;  %v4936_v24 = vld [vmem:[#allocation2 + $0xc0] sm:$0xff]  }
 0x27e   : > { %2564 = vrot.lane.b32.xlu1 %v4437_v46, %s5278_s9  ;;  %v1632_v46 = vrot.slane %v1498_v51, 6  ;;  %v1309_v37 = vsel %vm5706_vm9, %v1307_v34, %v1308_v59  ;;  %v1355_v21 = vsel %vm5706_vm9, %v4317_v29, %v1354_v58  ;;  %v1358_v40 = vsel %vm5706_vm9, %v1356_v13, %v1357_v7  ;;  %v2837_v0 = vld [vmem:[#allocation2 + $0xe0] sm:$0x1]  ;;  %v2831_v29 = vld [vmem:[#allocation2 + $0xc8] sm:$0x1] }
 0x27f   : > { %v2234_v27 = vpop.permute.xlu0 %2233  ;;  %v1675_v30 = vsel %vm5666_vm5, %v1673_v60, %v1674_v8  ;;  %v4326_v42 = vcombine.low %v1306_v50, %v1309_v37  ;;  %v1680_v60 = vrot.slane %v1678_v23, 4  ;;  %v1681_v8 = vrot.slane %v1519_v57, 6  ;;  %v2340_v7 = vld [vmem:[#allocation2 + $0xd0] sm:$0xf] }
 0x280   : > { %2280 = vst.msk [vmem:[#allocation3 + $0x10] sm:$0xff] %vm2277_vm7, %v2234_v27  ;;  %v1418_v43 = vpop.permute.xlu1 %1417  ;;  %v4436_v27 = vcombine.low %v2435_v48, %v2438_v26  ;;  %v1633_v5 = vsel %vm5666_vm5, %v1631_v20, %v1632_v46  ;;  %v2989_v59 = vrot.slane %v2836_v2, 5  ;;  %v2830_v48 = vld [vmem:[#allocation2 + $0xc4] sm:$0xf]  ;;  %v4333_v26 = vcombine.low %v1355_v21, %v1358_v40  ;;  %v2018_v46 = vld [vmem:[#allocation2 + $0xcc] sm:$0xe] }
 0x281   : > { %3378 = vrot.lane.b32.xlu0 %v4514_v33, %s5277_s17  ;;  %1461 = vst.msk [vmem:[#allocation3 + $0x28] sm:$0xff] %vm1455_vm15, %v1418_v43  ;;  %v1517_v33 = vld [vmem:[#allocation2 + $0xb4] sm:$0xc]  ;;  %v4476_v17 = vrot.slane %v2835_v62, 9  ;;  %v2992_v20 = vrot.slane %v2837_v0, 5  ;;  %v2975_v55 = vrot.slane %v2830_v48, 5 }
 0x282   : > { %1425 = vrot.lane.b32.xlu1 %v4327_v44, %s5273_s18  ;;  %v1672_v44 = vsel %vm5666_vm5, %v4348_v28, %v1671_v35  ;;  %v4349_v28 = vrot.slane %v1517_v33, 10  ;;  %v2991_v34 = vrot.slane %v2989_v59, 4  ;;  %v2341_v21 = vld [vmem:[#allocation2 + $0xd4] sm:$0x3] }
 0x283   : > { %v2555_v9 = vpop.permute.xlu0 %2554  ;;  %v3435_v18 = vld [vmem:[#allocation3] sm:$0xff]  ;;  %v4364_v35 = vcombine.low %v1672_v44, %v1675_v30  ;;  %v2990_v33 = vsel %vm5706_vm9, %v4476_v17, %v2989_v59  ;;  %v4397_v44 = vrot.slane %v2018_v46, 9  ;;  %v3151_v30 = vld [vmem:[#allocation2 + $0xc4] sm:$0xf]  ;;  %v2977_v2 = vrot.slane %v2975_v55, 4 }
 0x284   : > { %2601 = vst.msk [vmem:[#allocation3 + $0x10] sm:$0xff] %vm2598_vm8, %v2555_v9  ;;  %4703 = vmatprep.mubr.msk.bf16.mxu1 %vm3494_vm13, %v3435_v18  ;;  %v1742_v49 = vpop.permute.xlu1 %1741  ;;  %v2019_v9 = vld [vmem:[#allocation2 + $0xd0] sm:$0xf]  ;;  %v1679_v3 = vsel %vm5666_vm5, %v4349_v28, %v1678_v23  ;;  %v4938_v23 = vld [vmem:[#allocation2 + $0xd8] sm:$0xff]   ;;  %v3150_v28 = vld [vmem:[#allocation2 + $0xc0] sm:$0xc] }
 0x285   : > { %2241 = vrot.lane.b32.xlu0 %v4404_v41, %s5276_s19  ;;  %4704 = vmatmul.mubr.msk.bf16.vlgmr.msra.gmra.mrb[16].mxu1 %vm3494_vm13, %v3436_v10  ;;  %1785 = vst.msk [vmem:[#allocation3 + $0x28] sm:$0xff] %vm1779_vm3, %v1742_v49  ;;  %v4358_v41 = vcombine.low %v1630_v61, %v1633_v5  ;;  %v1682_v10 = vsel %vm5666_vm5, %v1680_v60, %v1681_v8  ;;  %v2176_v58 = vrot.slane %v2019_v9, 5  ;;  %v2020_v49 = vld [vmem:[#allocation2 + $0xd4] sm:$0x1]  ;;  %v2339_v61 = vld [vmem:[#allocation2 + $0xcc] sm:$0xc] }
 0x286   : > { %1749 = vrot.lane.b32.xlu1 %v4359_v52, %s5272_s8  ;;  %v2829_v52 = vld [vmem:[#allocation2 + $0xc0] sm:$0xe]  ;;  %v2179_v37 = vrot.slane %v2020_v49, 5  ;;  %v3152_v60 = vld [vmem:[#allocation2 + $0xc8] sm:$0x3]  ;;  %v4939_v59 = vld [vmem:[#allocation2 + $0xcc] sm:$0xff]  }
 0x287   : > { %v6779_v63 = vpop.permute.xlu0 %1739  ;;  %v2178_v50 = vrot.slane %v2176_v58, 4  ;;  %v4474_v57 = vrot.slane %v2829_v52, 9  ;;  %v2016_v8 = vld [vmem:[#allocation2 + $0xc4] sm:$0xf]  ;;  %v2177_v0 = vsel %vm5706_vm9, %v4397_v44, %v2176_v58  ;;  %v4429_v48 = vrot.slane %v2339_v61, 10 }
 0x288   : > { %v6787_v31 = vpop.permute.xlu1 %3067  ;;  %v3299_v58 = vrot.slane %v3152_v60, 6  ;;  %v2017_v49 = vld [vmem:[#allocation2 + $0xc8] sm:$0x1]  ;;  %v2169_v52 = vrot.slane %v2016_v8, 5  ;;  %v2840_v44 = vld [vmem:[#allocation2 + $0xec] sm:$0x1] }
 0x289   : > { %2562 = vrot.lane.b32.xlu0 %v4436_v27, %s5278_s9  ;;  %v4365_v27 = vcombine.low %v1679_v3, %v1682_v10  ;;  %v2180_v9 = vsel %vm5706_vm9, %v2178_v50, %v2179_v37  ;;  %v4506_v10 = vrot.slane %v3150_v28, 10  ;;  %v2172_v50 = vrot.slane %v2017_v49, 5  ;;  %v2336_v37 = vld [vmem:[#allocation2 + $0xc0] sm:$0xc]  ;;  %v3159_v8 = vld [vmem:[#allocation2 + $0xe4] sm:$0xc] }
 0x28a   : > { %3075 = vrot.lane.b32.xlu1 %v4491_v32, %s5279_s12  ;;  %v2993_v32 = vsel %vm5706_vm9, %v2991_v34, %v2992_v20  ;;  %v2015_v34 = vld [vmem:[#allocation2 + $0xc0] sm:$0xe]  ;;  %v4509_v49 = vrot.slane %v3159_v8, 10 }
 0x28b   : > { %v6793_v43 = vpop.permute.xlu0 %3065  ;;  %v4492_v40 = vcombine.low %v2990_v33, %v2993_v32  ;;  %v4396_v32 = vrot.slane %v2015_v34, 9  ;;  %v3156_v34 = vld [vmem:[#allocation2 + $0xd8] sm:$0xc] }
 0x28c   : > { %v2252_v51 = vpop.permute.xlu1 %2251 }
 0x28d   : > { %1759 = vrot.lane.b32.xlu0 %v4364_v35, %s5272_s8  ;;  %2289 = vst.msk [vmem:[#allocation3 + $0x58] sm:$0xff] %vm2277_vm7, %v2252_v51  ;;  %v2978_v35 = vrot.slane %v2831_v29, 5  ;;  %v3296_v51 = vrot.slane %v3151_v30, 6  ;;  %v3160_v30 = vld [vmem:[#allocation2 + $0xe8] sm:$0xf] }
 0x28e   : > { %1423 = vrot.lane.b32.xlu1 %v4326_v42, %s5273_s18  ;;  %v2497_v42 = vrot.slane %v2340_v7, 6  ;;  %v4413_v7 = vcombine.low %v2177_v0, %v2180_v9  ;;  %v2170_v0 = vsel %vm5706_vm9, %v4396_v32, %v2169_v52  ;;  %v4942_v9 = vld [vmem:[#allocation2 + $0xe4] sm:$0xff]  }
 0x28f   : > { %v6806_v18 = vpop.permute.xlu0 %3386  ;;  %v2979_v3 = vsel %vm5706_vm9, %v2977_v2, %v2978_v35  ;;  %v3298_v46 = vrot.slane %v3296_v51, 4  ;;  %v2171_v35 = vrot.slane %v2169_v52, 4 }
 0x290   : > { %v2573_v19 = vpop.permute.xlu1 %2572  ;;  %v2499_v17 = vrot.slane %v2497_v42, 4  ;;  %v2498_v33 = vsel %vm5666_vm5, %v4429_v48, %v2497_v42 }
 0x291   : > { %1747 = vrot.lane.b32.xlu0 %v4358_v41, %s5272_s8  ;;  %2610 = vst.msk [vmem:[#allocation3 + $0x58] sm:$0xff] %vm2598_vm8, %v2573_v19  ;;  %v2976_v41 = vsel %vm5706_vm9, %v4474_v57, %v2975_v55  ;;  %v2500_v19 = vrot.slane %v2341_v21, 6  ;;  %v2838_v55 = vld [vmem:[#allocation2 + $0xe4] sm:$0xe]  ;;  %v3300_v2 = vsel %vm5666_vm5, %v3298_v46, %v3299_v58  ;;  %v2338_v21 = vld [vmem:[#allocation2 + $0xc8] sm:$0x3] }
 0x292   : > { %1437 = vrot.lane.b32.xlu1 %v4333_v26, %s5273_s18  ;;  %v2839_v26 = vld [vmem:[#allocation2 + $0xe8] sm:$0xf]  ;;  %v4477_v42 = vrot.slane %v2838_v55, 9  ;;  %v3158_v46 = vld [vmem:[#allocation2 + $0xe0] sm:$0x3]  ;;  %v4508_v55 = vrot.slane %v3156_v34, 10 }
 0x293   : > { %v2250_v38 = vpop.permute.xlu0 %2249 }
 0x294   : > { %2288 = vst.msk [vmem:[#allocation3 + $0x50] sm:$0xff] %vm2277_vm7, %v2250_v38  ;;  %v1434_v13 = vpop.permute.xlu1 %1433  ;;  %v6836_v38 = vld [vmem:[#allocation2 + $0xc4] sm:$0xf] }
 0x295   : > { %1936 = vrot.lane.b32.xlu0 %v4936_v24, %s5274_s15  ;;  %1469 = vst.msk [vmem:[#allocation3 + $0x68] sm:$0xff] %vm1455_vm15, %v1434_v13  ;;  %v2996_v24 = vrot.slane %v2839_v26, 5  ;;  %v2501_v13 = vsel %vm5666_vm5, %v2499_v17, %v2500_v19  ;;  %v2490_v61 = vrot.slane %v6836_v38, 6  ;;  %v2493_v19 = vrot.slane %v2338_v21, 6 }
 0x296   : > { %1761 = vrot.lane.b32.xlu1 %v4365_v27, %s5272_s8  ;;  %v4490_v27 = vcombine.low %v2976_v41, %v2979_v3  ;;  %v4445_v60 = vcombine.low %v2498_v33, %v2501_v13  ;;  %v4428_v41 = vrot.slane %v2336_v37, 10  ;;  %v2173_v3 = vsel %vm5706_vm9, %v2171_v35, %v2172_v50 }
 0x297   : > { %v2571_v5 = vpop.permute.xlu0 %2570  ;;  %v2998_v28 = vrot.slane %v2996_v24, 4  ;;  %v2492_v17 = vrot.slane %v2490_v61, 4 }
 0x298   : > { %2609 = vst.msk [vmem:[#allocation3 + $0x50] sm:$0xff] %vm2598_vm8, %v2571_v5  ;;  %v1758_v62 = vpop.permute.xlu1 %1757  ;;  %v3157_v5 = vld [vmem:[#allocation2 + $0xdc] sm:$0xf]  ;;  %v2491_v4 = vsel %vm5666_vm5, %v4428_v41, %v2490_v61 }
 0x299   : > { %2756 = vrot.lane.b32.xlu0 %v4938_v23, %s5275_s21  ;;  %1793 = vst.msk [vmem:[#allocation3 + $0x68] sm:$0xff] %vm1779_vm3, %v1758_v62  ;;  %v3297_v23 = vsel %vm5666_vm5, %v4506_v10, %v3296_v51  ;;  %v2999_v51 = vrot.slane %v2840_v44, 5  ;;  %v3161_v62 = vld [vmem:[#allocation2 + $0xec] sm:$0x3]  ;;  %v3310_v48 = vrot.slane %v3157_v5, 6  ;;  %v2997_v10 = vsel %vm5706_vm9, %v4477_v42, %v2996_v24 }
 0x29a   : > { %1938 = vrot.lane.b32.xlu1 %v4939_v59, %s5274_s15  ;;  %v4522_v59 = vcombine.low %v3297_v23, %v3300_v2  ;;  %v3320_v52 = vrot.slane %v3161_v62, 6  ;;  %v4412_v24 = vcombine.low %v2170_v0, %v2173_v3  ;;  %v2494_v44 = vsel %vm5666_vm5, %v2492_v17, %v2493_v19  ;;  %s7183_s15 = scalar_lea.hbm %s7244_s7, %s4603_s29 }
 0x29b   : > { %v1756_v20 = vpop.permute.xlu0 %1755  ;;  %v3000_v58 = vsel %vm5706_vm9, %v2998_v28, %v2999_v51  ;;  %v3311_v32 = vsel %vm5666_vm5, %v4508_v55, %v3310_v48 }
 0x29c   : > { %v1416_v29 = vpop.permute.xlu1 %1415  ;;  %v4493_v33 = vcombine.low %v2997_v10, %v3000_v58 }
 0x29d   : > { %3077 = vrot.lane.b32.xlu0 %v4492_v40, %s5279_s12  ;;  %1460 = vst.msk [vmem:[#allocation3 + $0x20] sm:$0xff] %vm1455_vm15, %v1416_v29  ;;  %v3317_v40 = vrot.slane %v3160_v30, 6  ;;  %v3312_v29 = vrot.slane %v3310_v48, 4 }
 0x29e   : > { %1784 = vst.msk [vmem:[#allocation3 + $0x20] sm:$0xff] %vm1779_vm3, %v6779_v63  ;;  %2259 = vrot.lane.b32.xlu1 %v4413_v7, %s5276_s19  ;;  %v3313_v7 = vrot.slane %v3158_v46, 6 }
 0x29f   : > { %v2733_v57 = vpop.permute.xlu0 %2732  ;;  %v3318_v30 = vsel %vm5666_vm5, %v4509_v49, %v3317_v40 }
 0x2a0   : > { %2779 = vst.msk [vmem:[#allocation3 + $0x10] sm:$0xff] %vm2776_vm6, %v2733_v57  ;;  %v1432_v63 = vpop.permute.xlu1 %1431  ;;  %v3314_v50 = vsel %vm5666_vm5, %v3312_v29, %v3313_v7  ;;  %v4444_v57 = vcombine.low %v2491_v4, %v2494_v44 }
 0x2a1   : > { %3073 = vrot.lane.b32.xlu0 %v4490_v27, %s5279_s12  ;;  %1468 = vst.msk [vmem:[#allocation3 + $0x60] sm:$0xff] %vm1455_vm15, %v1432_v63  ;;  %v4524_v61 = vcombine.low %v3311_v32, %v3314_v50 }
 0x2a2   : > { %1792 = vst.msk [vmem:[#allocation3 + $0x60] sm:$0xff] %vm1779_vm3, %v1756_v20  ;;  %2580 = vrot.lane.b32.xlu1 %v4445_v60, %s5278_s9  ;;  %v3319_v20 = vrot.slane %v3317_v40, 4 }
 0x2a3   : > { %v1917_v26 = vpop.permute.xlu0 %1916 }
 0x2a4   : > { %1961 = vst.msk [vmem:[#allocation3 + $0x20] sm:$0xff] %vm1956_vm4, %v1917_v26  ;;  %v2735_v38 = vpop.permute.xlu1 %2734  ;;  %v3321_v13 = vsel %vm5666_vm5, %v3319_v20, %v3320_v52 }
 0x2a5   : > { %3394 = vrot.lane.b32.xlu0 %v4522_v59, %s5277_s17  ;;  %2780 = vst.msk [vmem:[#allocation3 + $0x18] sm:$0xff] %vm2776_vm6, %v2735_v38  ;;  %v4525_v2 = vcombine.low %v3318_v30, %v3321_v13  ;;  %v3756_v38 = vld [vmem:[#allocation13] sm:$0xf] }
 0x2a6   : > { %2758 = vrot.lane.b32.xlu1 %v4942_v9, %s5275_s21  ;;  %4774 = vmatprep.subr.msk.bf16.mxu0 %vm3543_vm2, %v3756_v38  ;;  %v3813_v29 = vsel %vm3543_vm2, %v3756_v38, 0  ;;  %s5180_s21 = scalar_lea.vmem %s7188_s23, 4096 }
 0x2a7   : > { %v2749_v27 = vpop.permute.xlu0 %2748  ;;  %4736 = vmatpush3.bf16.msra.mxu0 %v3813_v29  ;;  %p5181_p6 = scmp.ne.s32.totalorder %s7188_s23, %s5180_s21 }
 0x2a8   : > { %2787 = vst.msk [vmem:[#allocation3 + $0x50] sm:$0xff] %vm2776_vm6, %v2749_v27  ;;  %v1919_v23 = vpop.permute.xlu1 %1918 }
 0x2a9   : > { %2257 = vrot.lane.b32.xlu0 %v4412_v24, %s5276_s19  ;;  %1962 = vst.msk [vmem:[#allocation3 + $0x28] sm:$0xff] %vm1956_vm4, %v1919_v23  ;;  %p5182_p5 = pnand %p5181_p6, %p7270_p12  ;;  %s5280_s19 = smov [#allocation16]  }
 0x2aa   : > { %3079 = vrot.lane.b32.xlu1 %v4493_v33, %s5279_s12 }
 0x2ab   : > { %v1933_v37 = vpop.permute.xlu0 %1932  ;;  %p5183_p7 = pneg %p5182_p5 }
 0x2ac   : > { %1969 = vst.msk [vmem:[#allocation3 + $0x60] sm:$0xff] %vm1956_vm4, %v1933_v37  ;;  %v2751_v35 = vpop.permute.xlu1 %2750 }
 0x2ad   : > { %2578 = vrot.lane.b32.xlu0 %v4444_v57, %s5278_s9  ;;  %2788 = vst.msk [vmem:[#allocation3 + $0x58] sm:$0xff] %vm2776_vm6, %v2751_v35 }
 0x2ae   : > { %3400 = vrot.lane.b32.xlu1 %v4525_v2, %s5277_s17 }
 0x2af   : > { %v3377_v42 = vpop.permute.xlu0 %3376 }
 0x2b0   : > { %v1935_v54 = vpop.permute.xlu1 %1934 }
 0x2b1   : > { %3398 = vrot.lane.b32.xlu0 %v4524_v61, %s5277_s17  ;;  %1970 = vst.msk [vmem:[#allocation3 + $0x68] sm:$0xff] %vm1956_vm4, %v1935_v54  ;;  %s5184_s17 = sshll.u32 %s5280_s19, 4  ;;  %s5185_s17 = int_to_ptr.vmem [resolvable:$false] %s5184_s17 }
 0x2b2   : > { %p5187_p4 = scmp.lt.s32.totalorder %s7188_s23, %s5185_s17 }
 0x2b3   : > { %v3393_v5 = vpop.permute.xlu0 %3392 }
 0x2b4   : > { %v3056_v21 = vpop.permute.xlu1 %3055 }
 0x2b5   : > { %3101 = vst.msk [vmem:[#allocation3 + $0x18] sm:$0xff] %vm3097_vm10, %v3056_v21 }
 0x2b6   : > { %3422 = vst.msk [vmem:[#allocation3 + $0x18] sm:$0xff] %vm3418_vm12, %v3377_v42 }
 0x2b7   : > { %v3054_v28 = vpop.permute.xlu0 %3053 }
 0x2b8   : > { %3100 = vst.msk [vmem:[#allocation3 + $0x10] sm:$0xff] %vm3097_vm10, %v3054_v28  ;;  %v2240_v51 = vpop.permute.xlu1 %2239 }
 0x2b9   : > { %2283 = vst.msk [vmem:[#allocation3 + $0x28] sm:$0xff] %vm2277_vm7, %v2240_v51 }
 0x2bb   : > { %v3375_v40 = vpop.permute.xlu0 %3374 }
 0x2bc   : > { %3421 = vst.msk [vmem:[#allocation3 + $0x10] sm:$0xff] %vm3418_vm12, %v3375_v40  ;;  %v2561_v63 = vpop.permute.xlu1 %2560 }
 0x2bd   : > { %2604 = vst.msk [vmem:[#allocation3 + $0x28] sm:$0xff] %vm2598_vm8, %v2561_v63  ;;  %v3438_v0 = vld [vmem:[#allocation3 + $0x18] sm:$0xff] }
 0x2bf   : > { %v2238_v60 = vpop.permute.xlu0 %2237 }
 0x2c0   : > { %2282 = vst.msk [vmem:[#allocation3 + $0x20] sm:$0xff] %vm2277_vm7, %v2238_v60  ;;  %v1422_v8 = vpop.permute.xlu1 %1421 }
 0x2c1   : > { %1463 = vst.msk [vmem:[#allocation3 + $0x38] sm:$0xff] %vm1455_vm15, %v1422_v8 }
 0x2c3   : > { %v2559_v62 = vpop.permute.xlu0 %2558  ;;  %v3437_v59 = vld [vmem:[#allocation3 + $0x10] sm:$0xff] }
 0x2c4   : > { %2603 = vst.msk [vmem:[#allocation3 + $0x20] sm:$0xff] %vm2598_vm8, %v2559_v62  ;;  %4707 = vmatprep.mubr.msk.bf16.mxu1 %vm3494_vm13, %v3437_v59  ;;  %v1746_v9 = vpop.permute.xlu1 %1745  ;;  %v7001_v59 = vld [vmem:[#allocation12] ss:$0 sm:$0xff] }
 0x2c5   : > { %4708 = vmatmul.mubr.msk.bf16.gmra.mrb[20].mxu1 %vm3494_vm13, %v3438_v0  ;;  %1787 = vst.msk [vmem:[#allocation3 + $0x38] sm:$0xff] %vm1779_vm3, %v1746_v9 }
 0x2c7   : > { %v1744_v41 = vpop.permute.xlu0 %1743 }
 0x2c8   : > { %v3072_v48 = vpop.permute.xlu1 %3071 }
 0x2c9   : > { %3109 = vst.msk [vmem:[#allocation3 + $0x58] sm:$0xff] %vm3097_vm10, %v3072_v48 }
 0x2ca   : > { %3430 = vst.msk [vmem:[#allocation3 + $0x58] sm:$0xff] %vm3418_vm12, %v3393_v5 }
 0x2cb   : > { %v3070_v26 = vpop.permute.xlu0 %3069 }
 0x2cc   : > { %3108 = vst.msk [vmem:[#allocation3 + $0x50] sm:$0xff] %vm3097_vm10, %v3070_v26  ;;  %v2256_v3 = vpop.permute.xlu1 %2255 }
 0x2cd   : > { %2291 = vst.msk [vmem:[#allocation3 + $0x68] sm:$0xff] %vm2277_vm7, %v2256_v3 }
 0x2cf   : > { %v3391_v17 = vpop.permute.xlu0 %3390 }
 0x2d0   : > { %3429 = vst.msk [vmem:[#allocation3 + $0x50] sm:$0xff] %vm3418_vm12, %v3391_v17  ;;  %v2577_v19 = vpop.permute.xlu1 %2576 }
 0x2d1   : > { %2612 = vst.msk [vmem:[#allocation3 + $0x68] sm:$0xff] %vm2598_vm8, %v2577_v19  ;;  %v3446_v54 = vld [vmem:[#allocation3 + $0x58] sm:$0xff] }
 0x2d3   : > { %v2254_v10 = vpop.permute.xlu0 %2253 }
 0x2d4   : > { %2290 = vst.msk [vmem:[#allocation3 + $0x60] sm:$0xff] %vm2277_vm7, %v2254_v10  ;;  %v1420_v34 = vpop.permute.xlu1 %1419 }
 0x2d5   : > { %1462 = vst.msk [vmem:[#allocation3 + $0x30] sm:$0xff] %vm1455_vm15, %v1420_v34 }
 0x2d6   : > { %1786 = vst.msk [vmem:[#allocation3 + $0x30] sm:$0xff] %vm1779_vm3, %v1744_v41 }
 0x2d7   : > { %v2575_v46 = vpop.permute.xlu0 %2574 }
 0x2d8   : > { %2611 = vst.msk [vmem:[#allocation3 + $0x60] sm:$0xff] %vm2598_vm8, %v2575_v46  ;;  %v1436_v58 = vpop.permute.xlu1 %1435 }
 0x2d9   : > { %1470 = vst.msk [vmem:[#allocation3 + $0x70] sm:$0xff] %vm1455_vm15, %v1436_v58 }
 0x2db   : > { %v2737_v49 = vpop.permute.xlu0 %2736 }
 0x2dc   : > { %2781 = vst.msk [vmem:[#allocation3 + $0x20] sm:$0xff] %vm2776_vm6, %v2737_v49  ;;  %v2739_v20 = vpop.permute.xlu1 %2738 }
 0x2dd   : > { %2782 = vst.msk [vmem:[#allocation3 + $0x28] sm:$0xff] %vm2776_vm6, %v2739_v20 }
 0x2df   : > { %v1921_v52 = vpop.permute.xlu0 %1920 }
 0x2e0   : > { %1963 = vst.msk [vmem:[#allocation3 + $0x30] sm:$0xff] %vm1956_vm4, %v1921_v52  ;;  %v1923_v55 = vpop.permute.xlu1 %1922 }
 0x2e1   : > { %1964 = vst.msk [vmem:[#allocation3 + $0x38] sm:$0xff] %vm1956_vm4, %v1923_v55 }
 0x2e3   : > { %v2753_v7 = vpop.permute.xlu0 %2752 }
 0x2e4   : > { %2789 = vst.msk [vmem:[#allocation3 + $0x60] sm:$0xff] %vm2776_vm6, %v2753_v7  ;;  %v2755_v27 = vpop.permute.xlu1 %2754 }
 0x2e5   : > { %2790 = vst.msk [vmem:[#allocation3 + $0x68] sm:$0xff] %vm2776_vm6, %v2755_v27 }
 0x2e7   : > { %v3381_v24 = vpop.permute.xlu0 %3380 }
 0x2e8   : > { %v3060_v33 = vpop.permute.xlu1 %3059 }
 0x2e9   : > { %3103 = vst.msk [vmem:[#allocation3 + $0x28] sm:$0xff] %vm3097_vm10, %v3060_v33 }
 0x2ea   : > { %3424 = vst.msk [vmem:[#allocation3 + $0x28] sm:$0xff] %vm3418_vm12, %v3381_v24 }
 0x2eb   : > { %v3397_v4 = vpop.permute.xlu0 %3396 }
 0x2ec   : > { %v2244_v44 = vpop.permute.xlu1 %2243 }
 0x2ed   : > { %2285 = vst.msk [vmem:[#allocation3 + $0x38] sm:$0xff] %vm2277_vm7, %v2244_v44 }
 0x2ef   : > { %v3058_v30 = vpop.permute.xlu0 %3057 }
 0x2f0   : > { %3102 = vst.msk [vmem:[#allocation3 + $0x20] sm:$0xff] %vm3097_vm10, %v3058_v30  ;;  %v2565_v13 = vpop.permute.xlu1 %2564 }
 0x2f1   : > { %2606 = vst.msk [vmem:[#allocation3 + $0x38] sm:$0xff] %vm2598_vm8, %v2565_v13 }
 0x2f2   : > { %2784 = vst.msk [vmem:[#allocation3 + $0x38] sm:$0xff] %vm2776_vm6, %v6331_v15 }
 0x2f3   : > { %v3379_v23 = vpop.permute.xlu0 %3378  ;;  %3105 = vst.msk [vmem:[#allocation3 + $0x38] sm:$0xff] %vm3097_vm10, %v6519_v6 }
 0x2f4   : > { %3423 = vst.msk [vmem:[#allocation3 + $0x20] sm:$0xff] %vm3418_vm12, %v3379_v23  ;;  %3426 = vst.msk [vmem:[#allocation3 + $0x38] sm:$0xff] %vm3418_vm12, %v6415_v12  ;;  %v1426_v32 = vpop.permute.xlu1 %1425  ;;  %v3440_v12 = vld [vmem:[#allocation3 + $0x28] sm:$0xff] }
 0x2f5   : > { %1465 = vst.msk [vmem:[#allocation3 + $0x48] sm:$0xff] %vm1455_vm15, %v1426_v32 }
 0x2f7   : > { %v2242_v50 = vpop.permute.xlu0 %2241 }
 0x2f8   : > { %2284 = vst.msk [vmem:[#allocation3 + $0x30] sm:$0xff] %vm2277_vm7, %v2242_v50  ;;  %v1750_v37 = vpop.permute.xlu1 %1749 }
 0x2f9   : > { %1789 = vst.msk [vmem:[#allocation3 + $0x48] sm:$0xff] %vm1779_vm3, %v1750_v37 }
 0x2fa   : > { %1966 = vst.msk [vmem:[#allocation3 + $0x48] sm:$0xff] %vm1956_vm4, %v6374_v22 }
 0x2fb   : > { %v2563_v15 = vpop.permute.xlu0 %2562  ;;  %v3439_v57 = vld [vmem:[#allocation3 + $0x20] sm:$0xff]  ;;  %2287 = vst.msk [vmem:[#allocation3 + $0x48] sm:$0xff] %vm2277_vm7, %v6535_v53 }
 0x2fc   : > { %2605 = vst.msk [vmem:[#allocation3 + $0x30] sm:$0xff] %vm2598_vm8, %v2563_v15  ;;  %4711 = vmatprep.mubr.msk.bf16.mxu1 %vm3494_vm13, %v3439_v57  ;;  %2608 = vst.msk [vmem:[#allocation3 + $0x48] sm:$0xff] %vm2598_vm8, %v6552_v14  ;;  %v3076_v6 = vpop.permute.xlu1 %3075 }
 0x2fd   : > { %2783 = vst.msk [vmem:[#allocation3 + $0x30] sm:$0xff] %vm2776_vm6, %v6338_v16  ;;  %4712 = vmatmul.mubr.msk.bf16.gmra.mrb[24].mxu1 %vm3494_vm13, %v3440_v12  ;;  %2786 = vst.msk [vmem:[#allocation3 + $0x48] sm:$0xff] %vm2776_vm6, %v6647_v47  ;;  %v3442_v47 = vld [vmem:[#allocation3 + $0x38] sm:$0xff] }
 0x2fe   : > { %3104 = vst.msk [vmem:[#allocation3 + $0x30] sm:$0xff] %vm3097_vm10, %v6521_v36  ;;  %3111 = vst.msk [vmem:[#allocation3 + $0x68] sm:$0xff] %vm3097_vm10, %v3076_v6 }
 0x2ff   : > { %3107 = vst.msk [vmem:[#allocation3 + $0x48] sm:$0xff] %vm3097_vm10, %v6787_v31  ;;  %v1760_v16 = vpop.permute.xlu0 %1759 }
 0x300   : > { %3425 = vst.msk [vmem:[#allocation3 + $0x30] sm:$0xff] %vm3418_vm12, %v6537_v56  ;;  %3432 = vst.msk [vmem:[#allocation3 + $0x68] sm:$0xff] %vm3418_vm12, %v3397_v4  ;;  %v1424_v22 = vpop.permute.xlu1 %1423 }
 0x301   : > { %3428 = vst.msk [vmem:[#allocation3 + $0x48] sm:$0xff] %vm3418_vm12, %v6680_v45 }
 0x302   : > { %1794 = vst.msk [vmem:[#allocation3 + $0x70] sm:$0xff] %vm1779_vm3, %v1760_v16 }
 0x303   : > { %1464 = vst.msk [vmem:[#allocation3 + $0x40] sm:$0xff] %vm1455_vm15, %v1424_v22  ;;  %v1748_v36 = vpop.permute.xlu0 %1747 }
 0x304   : > { %1788 = vst.msk [vmem:[#allocation3 + $0x40] sm:$0xff] %vm1779_vm3, %v1748_v36  ;;  %v1438_v53 = vpop.permute.xlu1 %1437 }
 0x305   : > { %1965 = vst.msk [vmem:[#allocation3 + $0x40] sm:$0xff] %vm1956_vm4, %v6381_v25 }
 0x306   : > { %2286 = vst.msk [vmem:[#allocation3 + $0x40] sm:$0xff] %vm2277_vm7, %v6561_v39 }
 0x307   : > { %1471 = vst.msk [vmem:[#allocation3 + $0x78] sm:$0xff] %vm1455_vm15, %v1438_v53  ;;  %v3441_v56 = vld [vmem:[#allocation3 + $0x30] sm:$0xff]  ;;  %v1937_v14 = vpop.permute.xlu0 %1936  ;;  %v3448_v63 = vld [vmem:[#allocation3 + $0x68] sm:$0xff] }
 0x308   : > { %2607 = vst.msk [vmem:[#allocation3 + $0x40] sm:$0xff] %vm2598_vm8, %v6580_v1  ;;  %4715 = vmatprep.mubr.msk.bf16.mxu1 %vm3494_vm13, %v3441_v56  ;;  %v1762_v25 = vpop.permute.xlu1 %1761  ;;  %v3444_v2 = vld [vmem:[#allocation3 + $0x48] sm:$0xff] }
 0x309   : > { %2785 = vst.msk [vmem:[#allocation3 + $0x40] sm:$0xff] %vm2776_vm6, %v6632_v11  ;;  %4716 = vmatmul.mubr.msk.bf16.gmra.mrb[28].mxu1 %vm3494_vm13, %v3442_v47 }
 0x30a   : > { %1971 = vst.msk [vmem:[#allocation3 + $0x70] sm:$0xff] %vm1956_vm4, %v1937_v14 }
 0x30b   : > { %3106 = vst.msk [vmem:[#allocation3 + $0x40] sm:$0xff] %vm3097_vm10, %v6793_v43  ;;  %v2757_v39 = vpop.permute.xlu0 %2756  ;;  %v3445_v43 = vld [vmem:[#allocation3 + $0x50] sm:$0xff] }
 0x30c   : > { %3427 = vst.msk [vmem:[#allocation3 + $0x40] sm:$0xff] %vm3418_vm12, %v6806_v18  ;;  %v1939_v1 = vpop.permute.xlu1 %1938 }
 0x30d   : > { %1795 = vst.msk [vmem:[#allocation3 + $0x78] sm:$0xff] %vm1779_vm3, %v1762_v25 }
 0x30e   : > { %1972 = vst.msk [vmem:[#allocation3 + $0x78] sm:$0xff] %vm1956_vm4, %v1939_v1 }
 0x30f   : > { %v3078_v45 = vpop.permute.xlu0 %3077 }
 0x310   : > { %v2260_v31 = vpop.permute.xlu1 %2259 }
 0x311   : > { %2293 = vst.msk [vmem:[#allocation3 + $0x78] sm:$0xff] %vm2277_vm7, %v2260_v31 }
 0x313   : > { %v3443_v11 = vld [vmem:[#allocation3 + $0x40] sm:$0xff]  ;;  %v3074_v35 = vpop.permute.xlu0 %3073 }
 0x314   : > { %4719 = vmatprep.mubr.msk.bf16.mxu1 %vm3494_vm13, %v3443_v11  ;;  %3110 = vst.msk [vmem:[#allocation3 + $0x60] sm:$0xff] %vm3097_vm10, %v3074_v35  ;;  %v2581_v18 = vpop.permute.xlu1 %2580 }
 0x315   : > { %4720 = vmatmul.mubr.msk.bf16.gmra.mrb[32].mxu1 %vm3494_vm13, %v3444_v2  ;;  %2614 = vst.msk [vmem:[#allocation3 + $0x78] sm:$0xff] %vm2598_vm8, %v2581_v18 }
 0x316   : > { %4723 = vmatprep.mubr.msk.bf16.mxu1 %vm3494_vm13, %v3445_v43 }
 0x317   : > { %v3395_v61 = vpop.permute.xlu0 %3394 }
 0x318   : > { %3431 = vst.msk [vmem:[#allocation3 + $0x60] sm:$0xff] %vm3418_vm12, %v3395_v61  ;;  %v2759_v42 = vpop.permute.xlu1 %2758 }
 0x319   : > { %2792 = vst.msk [vmem:[#allocation3 + $0x78] sm:$0xff] %vm2776_vm6, %v2759_v42 }
 0x31b   : > { %v2258_v5 = vpop.permute.xlu0 %2257 }
 0x31c   : > { %2292 = vst.msk [vmem:[#allocation3 + $0x70] sm:$0xff] %vm2277_vm7, %v2258_v5  ;;  %v3080_v21 = vpop.permute.xlu1 %3079 }
 0x31d   : > { %4724 = vmatmul.mubr.msk.bf16.gmra.mrb[36].mxu1 %vm3494_vm13, %v3446_v54  ;;  %3113 = vst.msk [vmem:[#allocation3 + $0x78] sm:$0xff] %vm3097_vm10, %v3080_v21 }
 0x31f   : > { %v2579_v28 = vpop.permute.xlu0 %2578  ;;  %v3447_v51 = vld [vmem:[#allocation3 + $0x60] sm:$0xff] }
 0x320   : > { %2613 = vst.msk [vmem:[#allocation3 + $0x70] sm:$0xff] %vm2598_vm8, %v2579_v28  ;;  %4727 = vmatprep.mubr.msk.bf16.mxu1 %vm3494_vm13, %v3447_v51  ;;  %v3401_v40 = vpop.permute.xlu1 %3400 }
 0x321   : > { %2791 = vst.msk [vmem:[#allocation3 + $0x70] sm:$0xff] %vm2776_vm6, %v2757_v39 }
 0x322   : > { %3112 = vst.msk [vmem:[#allocation3 + $0x70] sm:$0xff] %vm3097_vm10, %v3078_v45 }
 0x323   : > { %3434 = vst.msk [vmem:[#allocation3 + $0x78] sm:$0xff] %vm3418_vm12, %v3401_v40  ;;  %v3399_v60 = vpop.permute.xlu0 %3398 }
 0x324   : > { %3433 = vst.msk [vmem:[#allocation3 + $0x70] sm:$0xff] %vm3418_vm12, %v3399_v60 }
 0x325   : > { %4728 = vmatmul.mubr.msk.bf16.gmra.mrb[40].mxu1 %vm3494_vm13, %v3448_v63 }
 0x32a   : > { %v3450_v8 = vld [vmem:[#allocation3 + $0x78] sm:$0xff] }
 0x32b   : > { %v3449_v62 = vld [vmem:[#allocation3 + $0x70] sm:$0xff] }
 0x32c   : > { %4731 = vmatprep.mubr.msk.bf16.mxu1 %vm3494_vm13, %v3449_v62 }
 0x32d   : > { %4732 = vmatmul.mubr.msk.bf16.gmra.mrb[44].mxu1 %vm3494_vm13, %v3450_v8 }
 0x358   : > { %v4705_v0 = vpop.f32.mrb[16].mxu1 }
 0x359   : > { %v3590_v9 = vadd.f32 %v4705_v0, %v7001_v59  ;;  %v3581_v41 = vpop.f32.mrb[17].mxu1 }
 0x35a   : > { %v3582_v48 = vadd.f32 %v7001_v59, %v3581_v41  ;;  %v4706_v26 = vpop.f32.mrb[18].mxu1 }
 0x35b   : > { %v3593_v3 = vadd.f32 %v4706_v26, %v7001_v59  ;;  %v3584_v17 = vpop.f32.mrb[19].mxu1  ;;  %v3710_v10 = vmax.f32 %v3590_v9, 0.0 }
 0x35c   : > { %v3585_v19 = vadd.f32 %v7001_v59, %v3584_v17  ;;  %v3708_v46 = vmax.f32 %v3582_v48, 0.0 }
 0x35d   : > { %v3711_v34 = vmax.f32 %v3593_v3, 0.0 }
 0x35e   : > { %v3709_v58 = vmax.f32 %v3585_v19, 0.0 }
 0x35f   : > { %v3741_v49 = vpack.c.bf16 %v3711_v34, %v3710_v10 }
 0x360   : > { %v3740_v20 = vpack.c.bf16 %v3709_v58, %v3708_v46 }
 0x362   : > { %4737 = vmatprep.mubr.msk.bf16.mxu0 %vm1131_vm11, %v3740_v20 }
 0x363   : > { %4738 = vmatmul.mubr.msk.bf16.vlgmr.msra.gmra.mrb[16].mxu0 %vm1131_vm11, %v3741_v49 }
 0x398   : > { %v4709_v52 = vpop.f32.mrb[20].mxu1 }
 0x399   : > { %v3606_v38 = vadd.f32 %v4709_v52, %v7001_v59  ;;  %v3597_v55 = vpop.f32.mrb[21].mxu1 }
 0x39a   : > { %v3598_v29 = vadd.f32 %v7001_v59, %v3597_v55  ;;  %v4710_v7 = vpop.f32.mrb[22].mxu1 }
 0x39b   : > { %v3609_v27 = vadd.f32 %v4710_v7, %v7001_v59  ;;  %v3600_v24 = vpop.f32.mrb[23].mxu1  ;;  %v3714_v4 = vmax.f32 %v3606_v38, 0.0 }
 0x39c   : > { %v3601_v33 = vadd.f32 %v7001_v59, %v3600_v24  ;;  %v3712_v30 = vmax.f32 %v3598_v29, 0.0 }
 0x39d   : > { %v3715_v44 = vmax.f32 %v3609_v27, 0.0 }
 0x39e   : > { %v3713_v13 = vmax.f32 %v3601_v33, 0.0 }
 0x39f   : > { %v3743_v23 = vpack.c.bf16 %v3715_v44, %v3714_v4 }
 0x3a0   : > { %v3742_v32 = vpack.c.bf16 %v3713_v13, %v3712_v30 }
 0x3a2   : > { %4741 = vmatprep.mubr.msk.bf16.mxu0 %vm1131_vm11, %v3742_v32 }
 0x3a3   : > { %4742 = vmatmul.mubr.msk.bf16.gmra.mrb[20].mxu0 %vm1131_vm11, %v3743_v23 }
 0x3d0   : > { %v4713_v50 = vpop.f32.mrb[24].mxu1 }
 0x3d1   : > { %v3622_v37 = vadd.f32 %v4713_v50, %v7001_v59  ;;  %v3613_v15 = vpop.f32.mrb[25].mxu1 }
 0x3d2   : > { %v3614_v57 = vadd.f32 %v7001_v59, %v3613_v15  ;;  %v4714_v12 = vpop.f32.mrb[26].mxu1 }
 0x3d3   : > { %v3625_v6 = vadd.f32 %v4714_v12, %v7001_v59  ;;  %v3616_v16 = vpop.f32.mrb[27].mxu1  ;;  %v3718_v36 = vmax.f32 %v3622_v37, 0.0 }
 0x3d4   : > { %v3617_v22 = vadd.f32 %v7001_v59, %v3616_v16  ;;  %v3716_v56 = vmax.f32 %v3614_v57, 0.0 }
 0x3d5   : > { %v3719_v53 = vmax.f32 %v3625_v6, 0.0 }
 0x3d6   : > { %v3717_v14 = vmax.f32 %v3617_v22, 0.0 }
 0x3d7   : > { %v3745_v47 = vpack.c.bf16 %v3719_v53, %v3718_v36 }
 0x3d8   : > { %v3744_v25 = vpack.c.bf16 %v3717_v14, %v3716_v56 }
 0x3da   : > { %4745 = vmatprep.mubr.msk.bf16.mxu0 %vm1131_vm11, %v3744_v25 }
 0x3db   : > { %4746 = vmatmul.mubr.msk.bf16.gmra.mrb[24].mxu0 %vm1131_vm11, %v3745_v47 }
 0x3dc   : > { %v4717_v39 = vpop.f32.mrb[28].mxu1 }
 0x3dd   : > { %v3638_v1 = vadd.f32 %v4717_v39, %v7001_v59  ;;  %v3629_v45 = vpop.f32.mrb[29].mxu1 }
 0x3de   : > { %v3630_v31 = vadd.f32 %v7001_v59, %v3629_v45  ;;  %v4718_v11 = vpop.f32.mrb[30].mxu1 }
 0x3df   : > { %v3641_v2 = vadd.f32 %v4718_v11, %v7001_v59  ;;  %v3632_v35 = vpop.f32.mrb[31].mxu1  ;;  %v3722_v18 = vmax.f32 %v3638_v1, 0.0 }
 0x3e0   : > { %v3633_v43 = vadd.f32 %v7001_v59, %v3632_v35  ;;  %v3720_v42 = vmax.f32 %v3630_v31, 0.0 }
 0x3e1   : > { %v3723_v61 = vmax.f32 %v3641_v2, 0.0 }
 0x3e2   : > { %v3721_v54 = vmax.f32 %v3633_v43, 0.0  ;;  %v7051_v43 = vld [vmem:[#allocation15] ss:$0 sm:$0xff] }
 0x3e3   : > { %v3747_v5 = vpack.c.bf16 %v3723_v61, %v3722_v18 }
 0x3e4   : > { %v3746_v21 = vpack.c.bf16 %v3721_v54, %v3720_v42 }
 0x3e6   : > { %4749 = vmatprep.mubr.msk.bf16.mxu0 %vm1131_vm11, %v3746_v21 }
 0x3e7   : > { %4750 = vmatmul.mubr.msk.bf16.gmra.mrb[28].mxu0 %vm1131_vm11, %v3747_v5 }
 0x3e8   : > { %v4721_v28 = vpop.f32.mrb[32].mxu1 }
 0x3e9   : > { %v3654_v51 = vadd.f32 %v4721_v28, %v7001_v59  ;;  %v3645_v40 = vpop.f32.mrb[33].mxu1 }
 0x3ea   : > { %v3646_v63 = vadd.f32 %v7001_v59, %v3645_v40  ;;  %v4722_v60 = vpop.f32.mrb[34].mxu1 }
 0x3eb   : > { %v3657_v8 = vadd.f32 %v4722_v60, %v7001_v59  ;;  %v3648_v62 = vpop.f32.mrb[35].mxu1  ;;  %v3726_v9 = vmax.f32 %v3654_v51, 0.0 }
 0x3ec   : > { %v3649_v0 = vadd.f32 %v7001_v59, %v3648_v62  ;;  %v3724_v48 = vmax.f32 %v3646_v63, 0.0  ;;  %v4950_v63 = vld [vmem:[%s5576_s16 + $0x10] sm:$0xff]  ;;  %v4951_v62 = vld [vmem:[%s5576_s16] sm:$0xff] }
 0x3ed   : > { %v3727_v41 = vmax.f32 %v3657_v8, 0.0 }
 0x3ee   : > { %v3725_v26 = vmax.f32 %v3649_v0, 0.0 }
 0x3ef   : > { %v3749_v3 = vpack.c.bf16 %v3727_v41, %v3726_v9  ;;  %v4952_v41 = vld [vmem:[%s5576_s16 + $0x18] sm:$0xff] }
 0x3f0   : > { %v3748_v17 = vpack.c.bf16 %v3725_v26, %v3724_v48  ;;  %v4725_v19 = vpop.f32.mrb[36].mxu1  ;;  %v4953_v26 = vld [vmem:[%s5576_s16 + $0x8] sm:$0xff] }
 0x3f1   : > { %v3670_v10 = vadd.f32 %v4725_v19, %v7001_v59  ;;  %v3661_v34 = vpop.f32.mrb[37].mxu1 }
 0x3f2   : > { %v3662_v46 = vadd.f32 %v7001_v59, %v3661_v34  ;;  %v4726_v58 = vpop.f32.mrb[38].mxu1  ;;  %4753 = vmatprep.mubr.msk.bf16.mxu0 %vm1131_vm11, %v3748_v17 }
 0x3f3   : > { %v3673_v49 = vadd.f32 %v4726_v58, %v7001_v59  ;;  %v3664_v20 = vpop.f32.mrb[39].mxu1  ;;  %4754 = vmatmul.mubr.msk.bf16.gmra.mrb[32].mxu0 %vm1131_vm11, %v3749_v3  ;;  %v3730_v38 = vmax.f32 %v3670_v10, 0.0 }
 0x3f4   : > { %v3665_v52 = vadd.f32 %v7001_v59, %v3664_v20  ;;  %v3728_v29 = vmax.f32 %v3662_v46, 0.0 }
 0x3f5   : > { %v3731_v55 = vmax.f32 %v3673_v49, 0.0 }
 0x3f6   : > { %v3729_v7 = vmax.f32 %v3665_v52, 0.0 }
 0x3f7   : > { %v3751_v27 = vpack.c.bf16 %v3731_v55, %v3730_v38  ;;  %v4954_v55 = vld [vmem:[%s5576_s16 + $0x30] sm:$0xff] }
 0x3f8   : > { %v3750_v24 = vpack.c.bf16 %v3729_v7, %v3728_v29  ;;  %v4729_v33 = vpop.f32.mrb[40].mxu1 }
 0x3f9   : > { %v3686_v4 = vadd.f32 %v4729_v33, %v7001_v59  ;;  %v3677_v44 = vpop.f32.mrb[41].mxu1 }
 0x3fa   : > { %v3678_v30 = vadd.f32 %v7001_v59, %v3677_v44  ;;  %v4730_v13 = vpop.f32.mrb[42].mxu1  ;;  %4757 = vmatprep.mubr.msk.bf16.mxu0 %vm1131_vm11, %v3750_v24 }
 0x3fb   : > { %v3689_v23 = vadd.f32 %v4730_v13, %v7001_v59  ;;  %v3680_v32 = vpop.f32.mrb[43].mxu1  ;;  %4758 = vmatmul.mubr.msk.bf16.gmra.mrb[36].mxu0 %vm1131_vm11, %v3751_v27  ;;  %v3734_v37 = vmax.f32 %v3686_v4, 0.0  ;;  %v4955_v27 = vld [vmem:[%s5576_s16 + $0x20] sm:$0xff]  ;;  %v4956_v4 = vld [vmem:[%s5576_s16 + $0x38] sm:$0xff] }
 0x3fc   : > { %v3681_v50 = vadd.f32 %v7001_v59, %v3680_v32  ;;  %v3732_v57 = vmax.f32 %v3678_v30, 0.0  ;;  %v4957_v30 = vld [vmem:[%s5576_s16 + $0x28] sm:$0xff] }
 0x3fd   : > { %v3735_v15 = vmax.f32 %v3689_v23, 0.0 }
 0x3fe   : > { %v3733_v12 = vmax.f32 %v3681_v50, 0.0 }
 0x3ff   : > { %v3753_v6 = vpack.c.bf16 %v3735_v15, %v3734_v37 }
 0x400   : > { %v3752_v16 = vpack.c.bf16 %v3733_v12, %v3732_v57  ;;  %v4733_v22 = vpop.f32.mrb[44].mxu1 }
 0x401   : > { %v3702_v36 = vadd.f32 %v4733_v22, %v7001_v59  ;;  %v3693_v53 = vpop.f32.mrb[45].mxu1 }
 0x402   : > { %4761 = vmatprep.mubr.msk.bf16.mxu0 %vm1131_vm11, %v3752_v16  ;;  %v3694_v56 = vadd.f32 %v7001_v59, %v3693_v53  ;;  %v4734_v14 = vpop.f32.mrb[46].mxu1 }
 0x403   : > { %4762 = vmatmul.mubr.msk.bf16.gmra.mrb[40].mxu0 %vm1131_vm11, %v3753_v6  ;;  %v3705_v47 = vadd.f32 %v4734_v14, %v7001_v59  ;;  %v3696_v25 = vpop.f32.mrb[47].mxu1  ;;  %v3738_v1 = vmax.f32 %v3702_v36, 0.0  ;;  %v4958_v36 = vld [vmem:[%s5576_s16 + $0x50] sm:$0xff]  ;;  %v4959_v14 = vld [vmem:[%s5576_s16 + $0x40] sm:$0xff] }
 0x404   : > { %v3697_v39 = vadd.f32 %v7001_v59, %v3696_v25  ;;  %v3736_v31 = vmax.f32 %v3694_v56, 0.0 }
 0x405   : > { %v3739_v45 = vmax.f32 %v3705_v47, 0.0 }
 0x406   : > { %v3737_v11 = vmax.f32 %v3697_v39, 0.0  ;;  %v4960_v39 = vld [vmem:[%s5576_s16 + $0x58] sm:$0xff] }
 0x407   : > { %v3755_v2 = vpack.c.bf16 %v3739_v45, %v3738_v1  ;;  %v4961_v45 = vld [vmem:[%s5576_s16 + $0x48] sm:$0xff] }
 0x408   : > { %v3754_v35 = vpack.c.bf16 %v3737_v11, %v3736_v31 }
 0x40a   : > { %4765 = vmatprep.mubr.msk.bf16.mxu0 %vm1131_vm11, %v3754_v35 }
 0x40b   : > { %4766 = vmatmul.mubr.msk.bf16.gmra.mrb[44].mxu0 %vm1131_vm11, %v3755_v2 }
 0x436   : > { %v4739_v18 = vpop.f32.mrb[16].mxu0 }
 0x437   : > { %v3858_v61 = vadd.f32 %v4739_v18, %v7051_v43  ;;  %v3849_v42 = vpop.f32.mrb[17].mxu0 }
 0x438   : > { %v3850_v59 = vadd.f32 %v7051_v43, %v3849_v42  ;;  %v4740_v54 = vpop.f32.mrb[18].mxu0 }
 0x439   : > { %v3978_v5 = vmax.f32 %v3858_v61, 0.0  ;;  %v3861_v21 = vadd.f32 %v4740_v54, %v7051_v43  ;;  %v3852_v28 = vpop.f32.mrb[19].mxu0 }
 0x43a   : > { %v3976_v51 = vmax.f32 %v3850_v59, 0.0  ;;  %v3853_v40 = vadd.f32 %v7051_v43, %v3852_v28  ;;  %v4962_v28 = vld [vmem:[%s5576_s16 + $0x70] sm:$0xff] }
 0x43b   : > { %v4010_v60 = vadd.f32 %v4950_v63, %v3978_v5  ;;  %v3979_v8 = vmax.f32 %v3861_v21, 0.0  ;;  %v4963_v63 = vld [vmem:[%s5576_s16 + $0x60] sm:$0xff] }
 0x43c   : > { %v4008_v0 = vadd.f32 %v4951_v62, %v3976_v51  ;;  %v3977_v9 = vmax.f32 %v3853_v40, 0.0  ;;  %v4964_v62 = vld [vmem:[%s5576_s16 + $0x78] sm:$0xff] }
 0x43d   : > { %4042 = vst.msk [vmem:[%s7061_s13 + $0x10] sm:$0xff] %vm431_vm1, %v4010_v60  ;;  %v4011_v48 = vadd.f32 %v4952_v41, %v3979_v8 }
 0x43e   : > { %4040 = vst.msk [vmem:[%s7061_s13] sm:$0xff] %vm431_vm1, %v4008_v0  ;;  %v4009_v3 = vadd.f32 %v4953_v26, %v3977_v9  ;;  %v4965_v9 = vld [vmem:[%s5576_s16 + $0x68] sm:$0xff] }
 0x43f   : > { %4043 = vst.msk [vmem:[%s7061_s13 + $0x18] sm:$0xff] %vm431_vm1, %v4011_v48 }
 0x440   : > { %4041 = vst.msk [vmem:[%s7061_s13 + $0x8] sm:$0xff] %vm431_vm1, %v4009_v3 }
 0x476   : > { %v4743_v17 = vpop.f32.mrb[20].mxu0 }
 0x477   : > { %v3874_v19 = vadd.f32 %v4743_v17, %v7051_v43  ;;  %v3865_v10 = vpop.f32.mrb[21].mxu0 }
 0x478   : > { %v3866_v34 = vadd.f32 %v7051_v43, %v3865_v10  ;;  %v4744_v46 = vpop.f32.mrb[22].mxu0 }
 0x479   : > { %v3982_v58 = vmax.f32 %v3874_v19, 0.0  ;;  %v3877_v49 = vadd.f32 %v4744_v46, %v7051_v43  ;;  %v3868_v20 = vpop.f32.mrb[23].mxu0 }
 0x47a   : > { %v3980_v52 = vmax.f32 %v3866_v34, 0.0  ;;  %v3869_v38 = vadd.f32 %v7051_v43, %v3868_v20  ;;  %v4966_v20 = vld [vmem:[%s5576_s16 + $0x90] sm:$0xff] }
 0x47b   : > { %v4014_v29 = vadd.f32 %v4954_v55, %v3982_v58  ;;  %v3983_v7 = vmax.f32 %v3877_v49, 0.0  ;;  %v4967_v55 = vld [vmem:[%s5576_s16 + $0x80] sm:$0xff] }
 0x47c   : > { %v4012_v24 = vadd.f32 %v4955_v27, %v3980_v52  ;;  %v3981_v33 = vmax.f32 %v3869_v38, 0.0  ;;  %v4968_v27 = vld [vmem:[%s5576_s16 + $0x98] sm:$0xff] }
 0x47d   : > { %4046 = vst.msk [vmem:[%s7061_s13 + $0x30] sm:$0xff] %vm431_vm1, %v4014_v29  ;;  %v4015_v44 = vadd.f32 %v4956_v4, %v3983_v7 }
 0x47e   : > { %4044 = vst.msk [vmem:[%s7061_s13 + $0x20] sm:$0xff] %vm431_vm1, %v4012_v24  ;;  %v4013_v13 = vadd.f32 %v4957_v30, %v3981_v33  ;;  %v4969_v33 = vld [vmem:[%s5576_s16 + $0x88] sm:$0xff] }
 0x47f   : > { %4047 = vst.msk [vmem:[%s7061_s13 + $0x38] sm:$0xff] %vm431_vm1, %v4015_v44 }
 0x480   : > { %4045 = vst.msk [vmem:[%s7061_s13 + $0x28] sm:$0xff] %vm431_vm1, %v4013_v13 }
 0x4ae   : > { %v4747_v23 = vpop.f32.mrb[24].mxu0 }
 0x4af   : > { %v3890_v32 = vadd.f32 %v4747_v23, %v7051_v43  ;;  %v3881_v50 = vpop.f32.mrb[25].mxu0 }
 0x4b0   : > { %v3882_v37 = vadd.f32 %v7051_v43, %v3881_v50  ;;  %v4748_v15 = vpop.f32.mrb[26].mxu0 }
 0x4b1   : > { %v3986_v57 = vmax.f32 %v3890_v32, 0.0  ;;  %v3893_v12 = vadd.f32 %v4748_v15, %v7051_v43  ;;  %v3884_v6 = vpop.f32.mrb[27].mxu0 }
 0x4b2   : > { %v3984_v16 = vmax.f32 %v3882_v37, 0.0  ;;  %v3885_v22 = vadd.f32 %v7051_v43, %v3884_v6  ;;  %v4970_v6 = vld [vmem:[%s5576_s16 + $0xb0] sm:$0xff] }
 0x4b3   : > { %v4018_v53 = vadd.f32 %v4958_v36, %v3986_v57  ;;  %v3987_v56 = vmax.f32 %v3893_v12, 0.0  ;;  %v4971_v36 = vld [vmem:[%s5576_s16 + $0xa0] sm:$0xff] }
 0x4b4   : > { %v4016_v47 = vadd.f32 %v4959_v14, %v3984_v16  ;;  %v3985_v25 = vmax.f32 %v3885_v22, 0.0  ;;  %v4972_v14 = vld [vmem:[%s5576_s16 + $0xb8] sm:$0xff] }
 0x4b5   : > { %4050 = vst.msk [vmem:[%s7061_s13 + $0x50] sm:$0xff] %vm431_vm1, %v4018_v53  ;;  %v4019_v1 = vadd.f32 %v4960_v39, %v3987_v56 }
 0x4b6   : > { %4048 = vst.msk [vmem:[%s7061_s13 + $0x40] sm:$0xff] %vm431_vm1, %v4016_v47  ;;  %v4017_v31 = vadd.f32 %v4961_v45, %v3985_v25  ;;  %v4973_v25 = vld [vmem:[%s5576_s16 + $0xa8] sm:$0xff] }
 0x4b7   : > { %4051 = vst.msk [vmem:[%s7061_s13 + $0x58] sm:$0xff] %vm431_vm1, %v4019_v1 }
 0x4b8   : > { %4049 = vst.msk [vmem:[%s7061_s13 + $0x48] sm:$0xff] %vm431_vm1, %v4017_v31 }
 0x4ba   : > { %v4751_v11 = vpop.f32.mrb[28].mxu0 }
 0x4bb   : > { %v3906_v2 = vadd.f32 %v4751_v11, %v7051_v43  ;;  %v3897_v35 = vpop.f32.mrb[29].mxu0 }
 0x4bc   : > { %v3898_v18 = vadd.f32 %v7051_v43, %v3897_v35  ;;  %v4752_v61 = vpop.f32.mrb[30].mxu0 }
 0x4bd   : > { %v3990_v42 = vmax.f32 %v3906_v2, 0.0  ;;  %v3909_v59 = vadd.f32 %v4752_v61, %v7051_v43  ;;  %v3900_v54 = vpop.f32.mrb[31].mxu0 }
 0x4be   : > { %v3988_v5 = vmax.f32 %v3898_v18, 0.0  ;;  %v3901_v21 = vadd.f32 %v7051_v43, %v3900_v54  ;;  %v4974_v54 = vld [vmem:[%s5576_s16 + $0xd0] sm:$0xff] }
 0x4bf   : > { %v4022_v51 = vadd.f32 %v4962_v28, %v3990_v42  ;;  %v3991_v40 = vmax.f32 %v3909_v59, 0.0  ;;  %v4975_v28 = vld [vmem:[%s5576_s16 + $0xc0] sm:$0xff] }
 0x4c0   : > { %v4020_v60 = vadd.f32 %v4963_v63, %v3988_v5  ;;  %v3989_v8 = vmax.f32 %v3901_v21, 0.0  ;;  %v4976_v63 = vld [vmem:[%s5576_s16 + $0xd8] sm:$0xff] }
 0x4c1   : > { %4054 = vst.msk [vmem:[%s7061_s13 + $0x70] sm:$0xff] %vm431_vm1, %v4022_v51  ;;  %v4023_v0 = vadd.f32 %v4964_v62, %v3991_v40 }
 0x4c2   : > { %4052 = vst.msk [vmem:[%s7061_s13 + $0x60] sm:$0xff] %vm431_vm1, %v4020_v60  ;;  %v4021_v41 = vadd.f32 %v4965_v9, %v3989_v8  ;;  %v4977_v8 = vld [vmem:[%s5576_s16 + $0xc8] sm:$0xff] }
 0x4c3   : > { %4055 = vst.msk [vmem:[%s7061_s13 + $0x78] sm:$0xff] %vm431_vm1, %v4023_v0 }
 0x4c4   : > { %4053 = vst.msk [vmem:[%s7061_s13 + $0x68] sm:$0xff] %vm431_vm1, %v4021_v41 }
 0x4c6   : > { %v4755_v48 = vpop.f32.mrb[32].mxu0 }
 0x4c7   : > { %v3922_v26 = vadd.f32 %v4755_v48, %v7051_v43  ;;  %v3913_v3 = vpop.f32.mrb[33].mxu0 }
 0x4c8   : > { %v3914_v17 = vadd.f32 %v7051_v43, %v3913_v3  ;;  %v4756_v19 = vpop.f32.mrb[34].mxu0 }
 0x4c9   : > { %v3994_v10 = vmax.f32 %v3922_v26, 0.0  ;;  %v3925_v34 = vadd.f32 %v4756_v19, %v7051_v43  ;;  %v3916_v46 = vpop.f32.mrb[35].mxu0 }
 0x4ca   : > { %v3992_v58 = vmax.f32 %v3914_v17, 0.0  ;;  %v3917_v49 = vadd.f32 %v7051_v43, %v3916_v46  ;;  %v4978_v46 = vld [vmem:[%s5576_s16 + $0xf0] sm:$0xff] }
 0x4cb   : > { %v4026_v52 = vadd.f32 %v4966_v20, %v3994_v10  ;;  %v3995_v38 = vmax.f32 %v3925_v34, 0.0  ;;  %v4979_v20 = vld [vmem:[%s5576_s16 + $0xe0] sm:$0xff] }
 0x4cc   : > { %v4024_v29 = vadd.f32 %v4967_v55, %v3992_v58  ;;  %v3993_v7 = vmax.f32 %v3917_v49, 0.0  ;;  %v4980_v55 = vld [vmem:[%s5576_s16 + $0xf8] sm:$0xff] }
 0x4cd   : > { %4058 = vst.msk [vmem:[%s7061_s13 + $0x90] sm:$0xff] %vm431_vm1, %v4026_v52  ;;  %v4027_v24 = vadd.f32 %v4968_v27, %v3995_v38 }
 0x4ce   : > { %4056 = vst.msk [vmem:[%s7061_s13 + $0x80] sm:$0xff] %vm431_vm1, %v4024_v29  ;;  %v4025_v4 = vadd.f32 %v4969_v33, %v3993_v7  ;;  %v4759_v44 = vpop.f32.mrb[36].mxu0 }
 0x4cf   : > { %4059 = vst.msk [vmem:[%s7061_s13 + $0x98] sm:$0xff] %vm431_vm1, %v4027_v24  ;;  %v3938_v30 = vadd.f32 %v4759_v44, %v7051_v43  ;;  %v3929_v13 = vpop.f32.mrb[37].mxu0 }
 0x4d0   : > { %4057 = vst.msk [vmem:[%s7061_s13 + $0x88] sm:$0xff] %vm431_vm1, %v4025_v4  ;;  %v3930_v23 = vadd.f32 %v7051_v43, %v3929_v13  ;;  %v4760_v32 = vpop.f32.mrb[38].mxu0 }
 0x4d1   : > { %v3998_v50 = vmax.f32 %v3938_v30, 0.0  ;;  %v3941_v37 = vadd.f32 %v4760_v32, %v7051_v43  ;;  %v3932_v15 = vpop.f32.mrb[39].mxu0 }
 0x4d2   : > { %v3996_v57 = vmax.f32 %v3930_v23, 0.0  ;;  %v3933_v12 = vadd.f32 %v7051_v43, %v3932_v15 }
 0x4d3   : > { %v4030_v16 = vadd.f32 %v4970_v6, %v3998_v50  ;;  %v3999_v22 = vmax.f32 %v3941_v37, 0.0 }
 0x4d4   : > { %v4028_v53 = vadd.f32 %v4971_v36, %v3996_v57  ;;  %v3997_v56 = vmax.f32 %v3933_v12, 0.0 }
 0x4d5   : > { %4062 = vst.msk [vmem:[%s7061_s13 + $0xb0] sm:$0xff] %vm431_vm1, %v4030_v16  ;;  %v4031_v47 = vadd.f32 %v4972_v14, %v3999_v22 }
 0x4d6   : > { %4060 = vst.msk [vmem:[%s7061_s13 + $0xa0] sm:$0xff] %vm431_vm1, %v4028_v53  ;;  %v4029_v39 = vadd.f32 %v4973_v25, %v3997_v56  ;;  %v4763_v1 = vpop.f32.mrb[40].mxu0 }
 0x4d7   : > { %4063 = vst.msk [vmem:[%s7061_s13 + $0xb8] sm:$0xff] %vm431_vm1, %v4031_v47  ;;  %v3954_v45 = vadd.f32 %v4763_v1, %v7051_v43  ;;  %v3945_v31 = vpop.f32.mrb[41].mxu0 }
 0x4d8   : > { %4061 = vst.msk [vmem:[%s7061_s13 + $0xa8] sm:$0xff] %vm431_vm1, %v4029_v39  ;;  %v3946_v11 = vadd.f32 %v7051_v43, %v3945_v31  ;;  %v4764_v2 = vpop.f32.mrb[42].mxu0 }
 0x4d9   : > { %v4002_v35 = vmax.f32 %v3954_v45, 0.0  ;;  %v3957_v18 = vadd.f32 %v4764_v2, %v7051_v43  ;;  %v3948_v61 = vpop.f32.mrb[43].mxu0 }
 0x4da   : > { %v4000_v42 = vmax.f32 %v3946_v11, 0.0  ;;  %v3949_v59 = vadd.f32 %v7051_v43, %v3948_v61 }
 0x4db   : > { %v4034_v5 = vadd.f32 %v4974_v54, %v4002_v35  ;;  %v4003_v21 = vmax.f32 %v3957_v18, 0.0 }
 0x4dc   : > { %v4032_v51 = vadd.f32 %v4975_v28, %v4000_v42  ;;  %v4001_v40 = vmax.f32 %v3949_v59, 0.0 }
 0x4dd   : > { %4066 = vst.msk [vmem:[%s7061_s13 + $0xd0] sm:$0xff] %vm431_vm1, %v4034_v5  ;;  %v4035_v60 = vadd.f32 %v4976_v63, %v4003_v21 }
 0x4de   : > { %4064 = vst.msk [vmem:[%s7061_s13 + $0xc0] sm:$0xff] %vm431_vm1, %v4032_v51  ;;  %v4033_v62 = vadd.f32 %v4977_v8, %v4001_v40  ;;  %v4767_v0 = vpop.f32.mrb[44].mxu0 }
 0x4df   : > { %4067 = vst.msk [vmem:[%s7061_s13 + $0xd8] sm:$0xff] %vm431_vm1, %v4035_v60  ;;  %v3970_v9 = vadd.f32 %v4767_v0, %v7051_v43  ;;  %v3961_v41 = vpop.f32.mrb[45].mxu0 }
 0x4e0   : > { %4065 = vst.msk [vmem:[%s7061_s13 + $0xc8] sm:$0xff] %vm431_vm1, %v4033_v62  ;;  %v3962_v48 = vadd.f32 %v7051_v43, %v3961_v41  ;;  %v4768_v26 = vpop.f32.mrb[46].mxu0 }
 0x4e1   : > { %v4006_v3 = vmax.f32 %v3970_v9, 0.0  ;;  %v3973_v17 = vadd.f32 %v4768_v26, %v7051_v43  ;;  %v3964_v19 = vpop.f32.mrb[47].mxu0 }
 0x4e2   : > { %v4004_v10 = vmax.f32 %v3962_v48, 0.0  ;;  %v3965_v34 = vadd.f32 %v7051_v43, %v3964_v19  ;;  %v4981_v43 = vld [vmem:[%s5576_s16 + $0xe8] sm:$0xff]  ;;  %s5186_s16 = scalar_lea.vmem %s5185_s17, 8192 }
 0x4e3   : > { %v4038_v58 = vadd.f32 %v4978_v46, %v4006_v3  ;;  %v4007_v49 = vmax.f32 %v3973_v17, 0.0  ;;  %p5188_p1 = scmp.lt.s32.totalorder %s5186_s16, %s5180_s21 }
 0x4e4   : > { %v4036_v52 = vadd.f32 %v4979_v20, %v4004_v10  ;;  %v4005_v38 = vmax.f32 %v3965_v34, 0.0 }
 0x4e5   : > { %4070 = vst.msk [vmem:[%s7061_s13 + $0xf0] sm:$0xff] %vm431_vm1, %v4038_v58  ;;  %v4039_v29 = vadd.f32 %v4980_v55, %v4007_v49  ;;  %p5189_p3 = por %p5188_p1, %p5187_p4 }
 0x4e6   : > { %4068 = vst.msk [vmem:[%s7061_s13 + $0xe0] sm:$0xff] %vm431_vm1, %v4036_v52  ;;  %v4037_v7 = vadd.f32 %v4981_v43, %v4005_v38 }
 0x4e7   : > { %4071 = vst.msk [vmem:[%s7061_s13 + $0xf8] sm:$0xff] %vm431_vm1, %v4039_v29  ;;  %p5190_p8 = pnand %p5189_p3, %p5183_p7 }
 0x4e8   : > { %4069 = vst.msk [vmem:[%s7061_s13 + $0xe8] sm:$0xff] %vm431_vm1, %v4037_v7 }
 0x4e9   : > { %5193 = shalt.err (!%p5190_p8)
}
 0x4ea   : > { %s5194_s9 = scalar_lea.hbm %s7183_s15, 4096  ;;  %s5198_s29 = scalar_lea.hbm %s7244_s7, 8192 }
 0x4eb   : > { %p5195_p13 = scmp.ne.s32.totalorder %s7183_s15, %s5194_s9  ;;  %p5199_p9 = scmp.lt.u32.totalorder %s7183_s15, %s7244_s7 }
 0x4ec   : > { %p5200_p10 = scmp.lt.u32.totalorder %s5198_s29, %s5194_s9  ;;  %p5202_p6 = scmp.lt.u32.totalorder %s5194_s9, %s7183_s15 }
 0x4ed   : > { %p5196_p0 = pnand %p5195_p13, %p7270_p12 }
 0x4ee   : > { %p5201_p11 = por %p5200_p10, %p5199_p9 }
 0x4ef   : > { %p5197_p2 = pneg %p5196_p0 }
 0x4f0   : > { %p5203_p5 = por %p5202_p6, %p5201_p11 }
 0x4f2   : > { %p5204_p7 = pnand %p5203_p5, %p5197_p2 }
 0x4f4   : > { %5207 = shalt.err (!%p5204_p7)
}
 0x4f5   : > { %s5281_s21 = smov 128  }
 0x4f6   : > { %4801 = dma.vmem_to_hbm [thread:$0]  (%p7270_p12), %s7188_s23, 4096, %s7183_s15, %s4073_s30, %s5281_s21, %s5281_s21, %s5273_s18  }
 0x4f7 PF: > { %s4101_s19 = sand.u32 1, %s5246_s24   ;;  %p7271_p4 = scmp.ne.s32.totalorder %s7255_s28, 0 }
 0x4f8   : > { %p7272_p1 = scmp.ge.s32.totalorder %s5258_s27, 2  ;;  %s4102_s17 = scalar_lea.sflag [#allocation6], %s4101_s19 }
 0x4fa   : > { %p4827_p3 = pnand %p7272_p1, %p7271_p4 }
 0x4fc   : > { %5241 = dma.done.wait (!%p4827_p3), %s4102_s17, 4096  }
 0x4fd   : > { %5243 = vsyncadd (!%p4827_p3), %s4102_s17, 4294963200  ;;  %p23_p8 = scmp.ge.s32.totalorder %s5491_s11, 4   ;;  %s7273_s24 = smov %s5250_s25 }
 0x4fe   : > { %s7274_s25 = smov %s5254_s26  ;;  %s7275_s26 = smov %s5502_s10 }
 0x4ff   : > { %s7276_s27 = smov %s5491_s11  ;;  %25 = sbr.rel (!%p23_p8) target bundleno = 8 (0x8), region = 120 }
 0x506   :  { %4107 = vsyncpa [#allocation5], 1 }
 0x507   :  { %4109 = vsyncpa [#allocation5 + $0x1], 1 }
 0x508   :  { %4110 = vsyncpa [#allocation8], 1 }
 0x509   :  { %4111 = vsyncpa [#allocation11], 1 }
 0x50a   :  { %4112 = vsyncpa [#allocation14], 1 }
 0x50b   :  { %4113 = vsyncpa [#allocation6], 1 }
 0x50c   :  { %4115 = vsyncpa [#allocation6 + $0x1], 1 }

</bundles_post_ra>
